<compile_context>
chip_gen: v7x
topology: tpu7x:2x2x1
jax: 0.10.0
libtpu: 0.0.40
codegen_flags: <defaults>
</compile_context>

<pallas_src>
import functools

import jax
import jax.numpy as jnp
import numpy as np
from jax.experimental import pallas as pl
from jax.experimental.pallas import tpu as pltpu


_GELU_C = 0.7978845608028654  # sqrt(2 / pi)


def _gelu(x):
    # TODO(synk): PyTorch nn.GELU() defaults to the exact erf form; the tanh
    # approximation is used here (max abs diff ~1e-3) because erf is not a
    # guaranteed Mosaic lowering. The in-file reference uses the same form.
    return 0.5 * x * (1.0 + jnp.tanh(_GELU_C * (x + 0.044715 * x * x * x)))


def _sigmoid(x):
    return 1.0 / (1.0 + jnp.exp(-x))


# ---------------------------------------------------------------------------
# Fused kernel: one batch element per grid step, everything lane-dense 2-D.
# ---------------------------------------------------------------------------
def _esa_kernel(x_ref,
                w1_ref, b1_ref, wf_ref, bf_ref,
                w2pw_ref, w2dw_ref, b2_ref,
                w31pw_ref, w31dw_ref, b31_ref,
                w32pw_ref, w32dw_ref, b32_ref,
                w33pw_ref, w33dw_ref, b33_ref,
                w4_ref, b4_ref,
                sub2_ref, pool_ref, pad3_ref, sel3_ref, rsz_ref,
                out_ref,
                *, img_w, wo, wp):
    f32 = jnp.float32

    def mm(a, b):
        return jnp.dot(a, b, preferred_element_type=f32)

    x = x_ref[0]                                            # (C, H*W)

    # ---- conv1: 1x1 (C -> f) ------------------------------------- MXU ----
    c1_ = mm(w1_ref[...], x) + b1_ref[...]                  # (f, H*W)

    # ---- conv2 = BSConvU(f, f, k=3, stride=2, pad=0) -----------------------
    c2p = mm(w2pw_ref[...], c1_)                            # pointwise, no bias
    # depthwise 3x3 taps as shifted-lane FMAs, then a one-hot matmul that
    # keeps only valid, stride-2 output positions.
    l2 = sub2_ref.shape[0]
    wdw2 = w2dw_ref[...]                                    # (f, 9)
    acc = None
    for dy in range(3):
        for dx in range(3):
            t = dy * 3 + dx
            off = dy * img_w + dx
            tap = wdw2[:, t:t + 1] * c2p[:, off:off + l2]
            acc = tap if acc is None else acc + tap
    c1 = mm(acc, sub2_ref[...]) + b2_ref[...]               # (f, ho*wo)

    # ---- maxpool k=7, s=3 (valid): separable shifted maxes + selection -----
    n1 = c1.shape[1] - 6
    m1 = c1[:, 0:n1]
    for dx in range(1, 7):
        m1 = jnp.maximum(m1, c1[:, dx:dx + n1])
    n2 = pool_ref.shape[0]
    m2 = m1[:, 0:n2]
    for dy in range(1, 7):
        m2 = jnp.maximum(m2, m1[:, dy * wo:dy * wo + n2])
    v = mm(m2, pool_ref[...])                               # (f, hp*wp)

    # ---- conv3_x = BSConvU(f, f, k=3, s=1, p=1) chain (tiny grid) ----------
    pw2 = wp + 2
    l3 = sel3_ref.shape[0]

    def bsconv_same(pw_ref, dw_ref, b_ref, y):
        y = mm(pw_ref[...], y)                              # pointwise, no bias
        p = mm(y, pad3_ref[...])                            # zero-pad scatter
        wdw = dw_ref[...]                                   # (f, 9)
        a = None
        for dy in range(3):
            for dx in range(3):
                t = dy * 3 + dx
                off = dy * pw2 + dx
                s = wdw[:, t:t + 1] * p[:, off:off + l3]
                a = s if a is None else a + s
        return mm(a, sel3_ref[...]) + b_ref[...]            # (f, hp*wp)

    v = _gelu(bsconv_same(w31pw_ref, w31dw_ref, b31_ref, v))
    v = _gelu(bsconv_same(w32pw_ref, w32dw_ref, b32_ref, v))
    c3 = bsconv_same(w33pw_ref, w33dw_ref, b33_ref, v)      # (f, hp*wp)

    # ---- bilinear resize (align_corners=False) to H*W: one matmul ----------
    c3r = mm(c3, rsz_ref[...])                              # (f, H*W), lane-dense

    # ---- conv_f + add + conv4 + sigmoid gate --------------------------------
    cf = mm(wf_ref[...], c1_) + bf_ref[...]                 # (f, H*W)
    c4 = mm(w4_ref[...], c3r + cf) + b4_ref[...]            # (C, H*W)
    out_ref[0] = x_ref[0] * _sigmoid(c4)                    # re-read x here


# ---------------------------------------------------------------------------
# Host-side precomputed operator matrices.
# ---------------------------------------------------------------------------
def _one_hot_cols(length, positions):
    """(length, P): column j selects row positions[j]."""
    m = np.zeros((length, len(positions)), np.float32)
    m[np.asarray(positions), np.arange(len(positions))] = 1.0
    return m


def _one_hot_rows(length, positions):
    """(P, length): row i scatters into column positions[i]."""
    m = np.zeros((len(positions), length), np.float32)
    m[np.arange(len(positions)), np.asarray(positions)] = 1.0
    return m


def _bilinear_matrix(n_out, n_in):
    """(n_out, n_in) matrix matching F.interpolate(mode='bilinear',
    align_corners=False) along one axis."""
    scale = n_in / n_out
    dst = np.arange(n_out, dtype=np.float64)
    src = np.maximum((dst + 0.5) * scale - 0.5, 0.0)
    i0 = np.clip(np.floor(src).astype(np.int64), 0, n_in - 1)
    i1 = np.minimum(i0 + 1, n_in - 1)
    frac = (src - i0).astype(np.float32)
    m = np.zeros((n_out, n_in), np.float32)
    rows = np.arange(n_out)
    m[rows, i0] += (1.0 - frac)
    m[rows, i1] += frac
    return m


@jax.jit
def esa_forward(x, params):
    """x: (B, C, H, W) float32 -> (B, C, H, W) float32."""
    B, C, H, W = x.shape
    HW = H * W

    ho, wo = (H - 3) // 2 + 1, (W - 3) // 2 + 1        # conv2 (k3, s2, p0)
    if ho < 7 or wo < 7:
        raise ValueError("ESA needs input spatial size >= 15x15")
    hp, wp = (ho - 7) // 3 + 1, (wo - 7) // 3 + 1      # maxpool (k7, s3)

    def pw(w):      # (Cout, Cin, 1, 1) -> (Cout, Cin)
        return w.reshape(w.shape[0], w.shape[1]).astype(jnp.float32)

    def dw(w):      # depthwise (C, 1, 3, 3) -> (C, 9), tap = dy*3 + dx
        return w.reshape(w.shape[0], 9).astype(jnp.float32)

    def bias(b):    # (C,) -> (C, 1)
        return b.reshape(-1, 1).astype(jnp.float32)

    # Precomputed one-hot / interpolation operators (trace-time constants).
    sub2 = _one_hot_cols(HW - 2 * W - 2,
                         [2 * qy * W + 2 * qx
                          for qy in range(ho) for qx in range(wo)])
    pool = _one_hot_cols(ho * wo - 6 * wo - 6,
                         [3 * qy * wo + 3 * qx
                          for qy in range(hp) for qx in range(wp)])
    pad3 = _one_hot_rows((hp + 2) * (wp + 2),
                         [(qy + 1) * (wp + 2) + (qx + 1)
                          for qy in range(hp) for qx in range(wp)])
    sel3 = _one_hot_cols((hp + 2) * (wp + 2) - 2 * (wp + 2) - 2,
                         [qy * (wp + 2) + qx
                          for qy in range(hp) for qx in range(wp)])
    mh = _bilinear_matrix(H, hp)                       # (H, hp)
    mw = _bilinear_matrix(W, wp)                       # (W, wp)
    rsz = np.einsum("ih,jw->hwij", mh, mw).reshape(hp * wp, HW).astype(np.float32)

    consts = [
        pw(params["conv1_w"]), bias(params["conv1_b"]),
        pw(params["convf_w"]), bias(params["convf_b"]),
        pw(params["conv2_pw_w"]), dw(params["conv2_dw_w"]), bias(params["conv2_dw_b"]),
        pw(params["conv3_1_pw_w"]), dw(params["conv3_1_dw_w"]), bias(params["conv3_1_dw_b"]),
        pw(params["conv3_2_pw_w"]), dw(params["conv3_2_dw_w"]), bias(params["conv3_2_dw_b"]),
        pw(params["conv3_3_pw_w"]), dw(params["conv3_3_dw_w"]), bias(params["conv3_3_dw_b"]),
        pw(params["conv4_w"]), bias(params["conv4_b"]),
        jnp.asarray(sub2), jnp.asarray(pool), jnp.asarray(pad3),
        jnp.asarray(sel3), jnp.asarray(rsz),
    ]

    x2 = x.reshape(B, C, HW).astype(jnp.float32)       # lane-dense full-res path

    kern = functools.partial(_esa_kernel, img_w=W, wo=wo, wp=wp)
    in_specs = ([pl.BlockSpec((1, C, HW), lambda b: (b, 0, 0))]
                + [pl.BlockSpec(a.shape, lambda b: (0, 0)) for a in consts])

    out = pl.pallas_call(
        kern,
        out_shape=jax.ShapeDtypeStruct((B, C, HW), jnp.float32),
        grid=(B,),
        in_specs=in_specs,
        out_specs=pl.BlockSpec((1, C, HW), lambda b: (b, 0, 0)),
        compiler_params=pltpu.CompilerParams(
            dimension_semantics=("parallel",),
            vmem_limit_bytes=32 * 1024 * 1024),
    )(x2, *consts)

    return out.reshape(B, C, H, W)


# ---------------------------------------------------------------------------
# Pure-JAX reference (lax convolutions / reduce_window) for correctness check.
# ---------------------------------------------------------------------------
def _conv2d_ref(x, w, b=None, stride=1, padding=0, groups=1):
    out = jax.lax.conv_general_dilated(
        x, w, window_strides=(stride, stride),
        padding=((padding, padding), (padding, padding)),
        dimension_numbers=("NCHW", "OIHW", "NCHW"),
        feature_group_count=groups,
        precision=jax.lax.Precision.HIGHEST)
    if b is not None:
        out = out + b.reshape(1, -1, 1, 1)
    return out


def _bsconv_ref(x, pw_w, dw_w, dw_b, stride, padding):
    y = _conv2d_ref(x, pw_w)                           # pointwise 1x1, no bias
    return _conv2d_ref(y, dw_w, dw_b, stride=stride, padding=padding,
                       groups=y.shape[1])              # depthwise, with bias


def _esa_reference(x, p):
    _, _, H, W = x.shape
    c1_ = _conv2d_ref(x, p["conv1_w"], p["conv1_b"])
    c1 = _bsconv_ref(c1_, p["conv2_pw_w"], p["conv2_dw_w"], p["conv2_dw_b"], 2, 0)
    v_max = jax.lax.reduce_window(c1, -jnp.inf, jax.lax.max,
                                  (1, 1, 7, 7), (1, 1, 3, 3), "VALID")
    v_range = _gelu(_bsconv_ref(v_max, p["conv3_1_pw_w"], p["conv3_1_dw_w"],
                                p["conv3_1_dw_b"], 1, 1))
    c3_ = _gelu(_bsconv_ref(v_range, p["conv3_2_pw_w"], p["conv3_2_dw_w"],
                            p["conv3_2_dw_b"], 1, 1))
    c3 = _bsconv_ref(c3_, p["conv3_3_pw_w"], p["conv3_3_dw_w"],
                     p["conv3_3_dw_b"], 1, 1)
    mh = _bilinear_matrix(H, c3.shape[2])
    mw = _bilinear_matrix(W, c3.shape[3])
    c3 = jnp.einsum("ih,bchw,jw->bcij", mh, c3, mw,
                    precision=jax.lax.Precision.HIGHEST)
    cf = _conv2d_ref(c1_, p["convf_w"], p["convf_b"])
    c4 = _conv2d_ref(c3 + cf, p["conv4_w"], p["conv4_b"])
    return x * _sigmoid(c4)


def make_params(key, num_feat):
    """Deterministic synthetic ESA parameters in PyTorch layouts."""
    f = num_feat // 4
    ks = iter(jax.random.split(key, 32))

    def u(shape, s=0.25):
        return jax.random.uniform(next(ks), shape, jnp.float32, minval=-s, maxval=s)

    p = {
        "conv1_w": u((f, num_feat, 1, 1)), "conv1_b": u((f,)),
        "convf_w": u((f, f, 1, 1)), "convf_b": u((f,)),
        "conv2_pw_w": u((f, f, 1, 1)),
        "conv2_dw_w": u((f, 1, 3, 3)), "conv2_dw_b": u((f,)),
        "conv4_w": u((num_feat, f, 1, 1)), "conv4_b": u((num_feat,)),
    }
    for name in ("conv3_1", "conv3_2", "conv3_3"):
        p[name + "_pw_w"] = u((f, f, 1, 1))
        p[name + "_dw_w"] = u((f, 1, 3, 3))
        p[name + "_dw_b"] = u((f,))
    return p


if __name__ == "__main__":
    # Small shapes consistent with the module: NCHW input, f = num_feat // 4.
    B, num_feat, H, W = 2, 16, 32, 32

    key = jax.random.PRNGKey(0)
    kx, kp = jax.random.split(key)
    x = jax.random.normal(kx, (B, num_feat, H, W), jnp.float32)
    params = make_params(kp, num_feat)

    out = jax.block_until_ready(esa_forward(x, params))
    ref = _esa_reference(x, params)

    assert out.shape == x.shape
    err = float(jnp.max(jnp.abs(out - ref)))
    assert jnp.allclose(out, ref, rtol=3e-3, atol=3e-3), (
        "kernel/reference mismatch, max abs err = %s" % err)
    print("KERNEL_OK")
</pallas_src>

<mosaic_0001>
module attributes {stable_mosaic.version = 11 : i64} {
  func.func @_esa_kernel(%arg0: i32, %arg1: memref<1x16x1024xf32, #tpu.memory_space<vmem>>, %arg2: memref<4x16xf32, #tpu.memory_space<vmem>>, %arg3: memref<4x1xf32, #tpu.memory_space<vmem>>, %arg4: memref<4x4xf32, #tpu.memory_space<vmem>>, %arg5: memref<4x1xf32, #tpu.memory_space<vmem>>, %arg6: memref<4x4xf32, #tpu.memory_space<vmem>>, %arg7: memref<4x9xf32, #tpu.memory_space<vmem>>, %arg8: memref<4x1xf32, #tpu.memory_space<vmem>>, %arg9: memref<4x4xf32, #tpu.memory_space<vmem>>, %arg10: memref<4x9xf32, #tpu.memory_space<vmem>>, %arg11: memref<4x1xf32, #tpu.memory_space<vmem>>, %arg12: memref<4x4xf32, #tpu.memory_space<vmem>>, %arg13: memref<4x9xf32, #tpu.memory_space<vmem>>, %arg14: memref<4x1xf32, #tpu.memory_space<vmem>>, %arg15: memref<4x4xf32, #tpu.memory_space<vmem>>, %arg16: memref<4x9xf32, #tpu.memory_space<vmem>>, %arg17: memref<4x1xf32, #tpu.memory_space<vmem>>, %arg18: memref<16x4xf32, #tpu.memory_space<vmem>>, %arg19: memref<16x1xf32, #tpu.memory_space<vmem>>, %arg20: memref<958x225xf32, #tpu.memory_space<vmem>>, %arg21: memref<129x9xf32, #tpu.memory_space<vmem>>, %arg22: memref<9x25xf32, #tpu.memory_space<vmem>>, %arg23: memref<13x9xf32, #tpu.memory_space<vmem>>, %arg24: memref<9x1024xf32, #tpu.memory_space<vmem>>, %arg25: memref<1x16x1024xf32, #tpu.memory_space<vmem>>) attributes {dimension_semantics = [#tpu.dimension_semantics<parallel>], iteration_bounds = array<i64: 2>, scalar_prefetch = 0 : i64, scratch_operands = 0 : i64, tpu.core_type = #tpu.core_type<tc>, window_params = [{transform_indices = @transform_0, window_bounds = array<i64: 1, 16, 1024>}, {pipeline_mode = #tpu.pipeline_mode<synchronous>, transform_indices = @transform_1, window_bounds = array<i64: 4, 16>}, {pipeline_mode = #tpu.pipeline_mode<synchronous>, transform_indices = @transform_2, window_bounds = array<i64: 4, 1>}, {pipeline_mode = #tpu.pipeline_mode<synchronous>, transform_indices = @transform_3, window_bounds = array<i64: 4, 4>}, {pipeline_mode = #tpu.pipeline_mode<synchronous>, transform_indices = @transform_4, window_bounds = array<i64: 4, 1>}, {pipeline_mode = #tpu.pipeline_mode<synchronous>, transform_indices = @transform_5, window_bounds = array<i64: 4, 4>}, {pipeline_mode = #tpu.pipeline_mode<synchronous>, transform_indices = @transform_6, window_bounds = array<i64: 4, 9>}, {pipeline_mode = #tpu.pipeline_mode<synchronous>, transform_indices = @transform_7, window_bounds = array<i64: 4, 1>}, {pipeline_mode = #tpu.pipeline_mode<synchronous>, transform_indices = @transform_8, window_bounds = array<i64: 4, 4>}, {pipeline_mode = #tpu.pipeline_mode<synchronous>, transform_indices = @transform_9, window_bounds = array<i64: 4, 9>}, {pipeline_mode = #tpu.pipeline_mode<synchronous>, transform_indices = @transform_10, window_bounds = array<i64: 4, 1>}, {pipeline_mode = #tpu.pipeline_mode<synchronous>, transform_indices = @transform_11, window_bounds = array<i64: 4, 4>}, {pipeline_mode = #tpu.pipeline_mode<synchronous>, transform_indices = @transform_12, window_bounds = array<i64: 4, 9>}, {pipeline_mode = #tpu.pipeline_mode<synchronous>, transform_indices = @transform_13, window_bounds = array<i64: 4, 1>}, {pipeline_mode = #tpu.pipeline_mode<synchronous>, transform_indices = @transform_14, window_bounds = array<i64: 4, 4>}, {pipeline_mode = #tpu.pipeline_mode<synchronous>, transform_indices = @transform_15, window_bounds = array<i64: 4, 9>}, {pipeline_mode = #tpu.pipeline_mode<synchronous>, transform_indices = @transform_16, window_bounds = array<i64: 4, 1>}, {pipeline_mode = #tpu.pipeline_mode<synchronous>, transform_indices = @transform_17, window_bounds = array<i64: 16, 4>}, {pipeline_mode = #tpu.pipeline_mode<synchronous>, transform_indices = @transform_18, window_bounds = array<i64: 16, 1>}, {pipeline_mode = #tpu.pipeline_mode<synchronous>, transform_indices = @transform_19, window_bounds = array<i64: 958, 225>}, {pipeline_mode = #tpu.pipeline_mode<synchronous>, transform_indices = @transform_20, window_bounds = array<i64: 129, 9>}, {pipeline_mode = #tpu.pipeline_mode<synchronous>, transform_indices = @transform_21, window_bounds = array<i64: 9, 25>}, {pipeline_mode = #tpu.pipeline_mode<synchronous>, transform_indices = @transform_22, window_bounds = array<i64: 13, 9>}, {pipeline_mode = #tpu.pipeline_mode<synchronous>, transform_indices = @transform_23, window_bounds = array<i64: 9, 1024>}, {transform_indices = @transform_24, window_bounds = array<i64: 1, 16, 1024>}]} {
    %c0 = arith.constant 0 : index
    %c0_0 = arith.constant 0 : index
    %c0_1 = arith.constant 0 : index
    %0 = vector.load %arg1[%c0, %c0_0, %c0_1] : memref<1x16x1024xf32, #tpu.memory_space<vmem>>, vector<1x16x1024xf32>
    %1 = vector.shape_cast %0 : vector<1x16x1024xf32> to vector<16x1024xf32>
    %c0_2 = arith.constant 0 : index
    %c0_3 = arith.constant 0 : index
    %2 = vector.load %arg2[%c0_2, %c0_3] : memref<4x16xf32, #tpu.memory_space<vmem>>, vector<4x16xf32>
    %cst = arith.constant dense<0.000000e+00> : vector<4x1024xf32>
    %3 = tpu.matmul %2, %1, %cst {dimension_numbers = #tpu.dot_dimension_numbers<[1], [0], [0], [1], [0, 0, 1, 1], [], []>} : vector<4x16xf32>, vector<16x1024xf32>, vector<4x1024xf32> -> vector<4x1024xf32>
    %c0_4 = arith.constant 0 : index
    %c0_5 = arith.constant 0 : index
    %4 = vector.load %arg3[%c0_4, %c0_5] : memref<4x1xf32, #tpu.memory_space<vmem>>, vector<4x1xf32>
    %5 = vector.broadcast %4 : vector<4x1xf32> to vector<4x1024xf32>
    %6 = arith.addf %3, %5 : vector<4x1024xf32>
    %c0_6 = arith.constant 0 : index
    %c0_7 = arith.constant 0 : index
    %7 = vector.load %arg6[%c0_6, %c0_7] : memref<4x4xf32, #tpu.memory_space<vmem>>, vector<4x4xf32>
    %cst_8 = arith.constant dense<0.000000e+00> : vector<4x1024xf32>
    %8 = tpu.matmul %7, %6, %cst_8 {dimension_numbers = #tpu.dot_dimension_numbers<[1], [0], [0], [1], [0, 0, 1, 1], [], []>} : vector<4x4xf32>, vector<4x1024xf32>, vector<4x1024xf32> -> vector<4x1024xf32>
    %c0_9 = arith.constant 0 : index
    %c0_10 = arith.constant 0 : index
    %9 = vector.load %arg7[%c0_9, %c0_10] : memref<4x9xf32, #tpu.memory_space<vmem>>, vector<4x9xf32>
    %10 = vector.extract_strided_slice %9 {offsets = [0, 0], sizes = [4, 1], strides = [1, 1]} : vector<4x9xf32> to vector<4x1xf32>
    %11 = vector.extract_strided_slice %8 {offsets = [0, 0], sizes = [4, 958], strides = [1, 1]} : vector<4x1024xf32> to vector<4x958xf32>
    %12 = vector.broadcast %10 : vector<4x1xf32> to vector<4x958xf32>
    %13 = arith.mulf %12, %11 : vector<4x958xf32>
    %14 = vector.extract_strided_slice %9 {offsets = [0, 1], sizes = [4, 1], strides = [1, 1]} : vector<4x9xf32> to vector<4x1xf32>
    %15 = vector.extract_strided_slice %8 {offsets = [0, 1], sizes = [4, 958], strides = [1, 1]} : vector<4x1024xf32> to vector<4x958xf32>
    %16 = vector.broadcast %14 : vector<4x1xf32> to vector<4x958xf32>
    %17 = arith.mulf %16, %15 : vector<4x958xf32>
    %18 = arith.addf %13, %17 : vector<4x958xf32>
    %19 = vector.extract_strided_slice %9 {offsets = [0, 2], sizes = [4, 1], strides = [1, 1]} : vector<4x9xf32> to vector<4x1xf32>
    %20 = vector.extract_strided_slice %8 {offsets = [0, 2], sizes = [4, 958], strides = [1, 1]} : vector<4x1024xf32> to vector<4x958xf32>
    %21 = vector.broadcast %19 : vector<4x1xf32> to vector<4x958xf32>
    %22 = arith.mulf %21, %20 : vector<4x958xf32>
    %23 = arith.addf %18, %22 : vector<4x958xf32>
    %24 = vector.extract_strided_slice %9 {offsets = [0, 3], sizes = [4, 1], strides = [1, 1]} : vector<4x9xf32> to vector<4x1xf32>
    %25 = vector.extract_strided_slice %8 {offsets = [0, 32], sizes = [4, 958], strides = [1, 1]} : vector<4x1024xf32> to vector<4x958xf32>
    %26 = vector.broadcast %24 : vector<4x1xf32> to vector<4x958xf32>
    %27 = arith.mulf %26, %25 : vector<4x958xf32>
    %28 = arith.addf %23, %27 : vector<4x958xf32>
    %29 = vector.extract_strided_slice %9 {offsets = [0, 4], sizes = [4, 1], strides = [1, 1]} : vector<4x9xf32> to vector<4x1xf32>
    %30 = vector.extract_strided_slice %8 {offsets = [0, 33], sizes = [4, 958], strides = [1, 1]} : vector<4x1024xf32> to vector<4x958xf32>
    %31 = vector.broadcast %29 : vector<4x1xf32> to vector<4x958xf32>
    %32 = arith.mulf %31, %30 : vector<4x958xf32>
    %33 = arith.addf %28, %32 : vector<4x958xf32>
    %34 = vector.extract_strided_slice %9 {offsets = [0, 5], sizes = [4, 1], strides = [1, 1]} : vector<4x9xf32> to vector<4x1xf32>
    %35 = vector.extract_strided_slice %8 {offsets = [0, 34], sizes = [4, 958], strides = [1, 1]} : vector<4x1024xf32> to vector<4x958xf32>
    %36 = vector.broadcast %34 : vector<4x1xf32> to vector<4x958xf32>
    %37 = arith.mulf %36, %35 : vector<4x958xf32>
    %38 = arith.addf %33, %37 : vector<4x958xf32>
    %39 = vector.extract_strided_slice %9 {offsets = [0, 6], sizes = [4, 1], strides = [1, 1]} : vector<4x9xf32> to vector<4x1xf32>
    %40 = vector.extract_strided_slice %8 {offsets = [0, 64], sizes = [4, 958], strides = [1, 1]} : vector<4x1024xf32> to vector<4x958xf32>
    %41 = vector.broadcast %39 : vector<4x1xf32> to vector<4x958xf32>
    %42 = arith.mulf %41, %40 : vector<4x958xf32>
    %43 = arith.addf %38, %42 : vector<4x958xf32>
    %44 = vector.extract_strided_slice %9 {offsets = [0, 7], sizes = [4, 1], strides = [1, 1]} : vector<4x9xf32> to vector<4x1xf32>
    %45 = vector.extract_strided_slice %8 {offsets = [0, 65], sizes = [4, 958], strides = [1, 1]} : vector<4x1024xf32> to vector<4x958xf32>
    %46 = vector.broadcast %44 : vector<4x1xf32> to vector<4x958xf32>
    %47 = arith.mulf %46, %45 : vector<4x958xf32>
    %48 = arith.addf %43, %47 : vector<4x958xf32>
    %49 = vector.extract_strided_slice %9 {offsets = [0, 8], sizes = [4, 1], strides = [1, 1]} : vector<4x9xf32> to vector<4x1xf32>
    %50 = vector.extract_strided_slice %8 {offsets = [0, 66], sizes = [4, 958], strides = [1, 1]} : vector<4x1024xf32> to vector<4x958xf32>
    %51 = vector.broadcast %49 : vector<4x1xf32> to vector<4x958xf32>
    %52 = arith.mulf %51, %50 : vector<4x958xf32>
    %53 = arith.addf %48, %52 : vector<4x958xf32>
    %c0_11 = arith.constant 0 : index
    %c0_12 = arith.constant 0 : index
    %54 = vector.load %arg20[%c0_11, %c0_12] : memref<958x225xf32, #tpu.memory_space<vmem>>, vector<958x225xf32>
    %cst_13 = arith.constant dense<0.000000e+00> : vector<4x225xf32>
    %55 = tpu.matmul %53, %54, %cst_13 {dimension_numbers = #tpu.dot_dimension_numbers<[1], [0], [0], [1], [0, 0, 1, 1], [], []>} : vector<4x958xf32>, vector<958x225xf32>, vector<4x225xf32> -> vector<4x225xf32>
    %c0_14 = arith.constant 0 : index
    %c0_15 = arith.constant 0 : index
    %56 = vector.load %arg8[%c0_14, %c0_15] : memref<4x1xf32, #tpu.memory_space<vmem>>, vector<4x1xf32>
    %57 = vector.broadcast %56 : vector<4x1xf32> to vector<4x225xf32>
    %58 = arith.addf %55, %57 : vector<4x225xf32>
    %59 = vector.extract_strided_slice %58 {offsets = [0, 0], sizes = [4, 219], strides = [1, 1]} : vector<4x225xf32> to vector<4x219xf32>
    %60 = vector.extract_strided_slice %58 {offsets = [0, 1], sizes = [4, 219], strides = [1, 1]} : vector<4x225xf32> to vector<4x219xf32>
    %61 = arith.maximumf %59, %60 : vector<4x219xf32>
    %62 = vector.extract_strided_slice %58 {offsets = [0, 2], sizes = [4, 219], strides = [1, 1]} : vector<4x225xf32> to vector<4x219xf32>
    %63 = arith.maximumf %61, %62 : vector<4x219xf32>
    %64 = vector.extract_strided_slice %58 {offsets = [0, 3], sizes = [4, 219], strides = [1, 1]} : vector<4x225xf32> to vector<4x219xf32>
    %65 = arith.maximumf %63, %64 : vector<4x219xf32>
    %66 = vector.extract_strided_slice %58 {offsets = [0, 4], sizes = [4, 219], strides = [1, 1]} : vector<4x225xf32> to vector<4x219xf32>
    %67 = arith.maximumf %65, %66 : vector<4x219xf32>
    %68 = vector.extract_strided_slice %58 {offsets = [0, 5], sizes = [4, 219], strides = [1, 1]} : vector<4x225xf32> to vector<4x219xf32>
    %69 = arith.maximumf %67, %68 : vector<4x219xf32>
    %70 = vector.extract_strided_slice %58 {offsets = [0, 6], sizes = [4, 219], strides = [1, 1]} : vector<4x225xf32> to vector<4x219xf32>
    %71 = arith.maximumf %69, %70 : vector<4x219xf32>
    %72 = vector.extract_strided_slice %71 {offsets = [0, 0], sizes = [4, 129], strides = [1, 1]} : vector<4x219xf32> to vector<4x129xf32>
    %73 = vector.extract_strided_slice %71 {offsets = [0, 15], sizes = [4, 129], strides = [1, 1]} : vector<4x219xf32> to vector<4x129xf32>
    %74 = arith.maximumf %72, %73 : vector<4x129xf32>
    %75 = vector.extract_strided_slice %71 {offsets = [0, 30], sizes = [4, 129], strides = [1, 1]} : vector<4x219xf32> to vector<4x129xf32>
    %76 = arith.maximumf %74, %75 : vector<4x129xf32>
    %77 = vector.extract_strided_slice %71 {offsets = [0, 45], sizes = [4, 129], strides = [1, 1]} : vector<4x219xf32> to vector<4x129xf32>
    %78 = arith.maximumf %76, %77 : vector<4x129xf32>
    %79 = vector.extract_strided_slice %71 {offsets = [0, 60], sizes = [4, 129], strides = [1, 1]} : vector<4x219xf32> to vector<4x129xf32>
    %80 = arith.maximumf %78, %79 : vector<4x129xf32>
    %81 = vector.extract_strided_slice %71 {offsets = [0, 75], sizes = [4, 129], strides = [1, 1]} : vector<4x219xf32> to vector<4x129xf32>
    %82 = arith.maximumf %80, %81 : vector<4x129xf32>
    %83 = vector.extract_strided_slice %71 {offsets = [0, 90], sizes = [4, 129], strides = [1, 1]} : vector<4x219xf32> to vector<4x129xf32>
    %84 = arith.maximumf %82, %83 : vector<4x129xf32>
    %c0_16 = arith.constant 0 : index
    %c0_17 = arith.constant 0 : index
    %85 = vector.load %arg21[%c0_16, %c0_17] : memref<129x9xf32, #tpu.memory_space<vmem>>, vector<129x9xf32>
    %cst_18 = arith.constant dense<0.000000e+00> : vector<4x9xf32>
    %86 = tpu.matmul %84, %85, %cst_18 {dimension_numbers = #tpu.dot_dimension_numbers<[1], [0], [0], [1], [0, 0, 1, 1], [], []>} : vector<4x129xf32>, vector<129x9xf32>, vector<4x9xf32> -> vector<4x9xf32>
    %c0_19 = arith.constant 0 : index
    %c0_20 = arith.constant 0 : index
    %87 = vector.load %arg9[%c0_19, %c0_20] : memref<4x4xf32, #tpu.memory_space<vmem>>, vector<4x4xf32>
    %cst_21 = arith.constant dense<0.000000e+00> : vector<4x9xf32>
    %88 = tpu.matmul %87, %86, %cst_21 {dimension_numbers = #tpu.dot_dimension_numbers<[1], [0], [0], [1], [0, 0, 1, 1], [], []>} : vector<4x4xf32>, vector<4x9xf32>, vector<4x9xf32> -> vector<4x9xf32>
    %c0_22 = arith.constant 0 : index
    %c0_23 = arith.constant 0 : index
    %89 = vector.load %arg22[%c0_22, %c0_23] : memref<9x25xf32, #tpu.memory_space<vmem>>, vector<9x25xf32>
    %cst_24 = arith.constant dense<0.000000e+00> : vector<4x25xf32>
    %90 = tpu.matmul %88, %89, %cst_24 {dimension_numbers = #tpu.dot_dimension_numbers<[1], [0], [0], [1], [0, 0, 1, 1], [], []>} : vector<4x9xf32>, vector<9x25xf32>, vector<4x25xf32> -> vector<4x25xf32>
    %c0_25 = arith.constant 0 : index
    %c0_26 = arith.constant 0 : index
    %91 = vector.load %arg10[%c0_25, %c0_26] : memref<4x9xf32, #tpu.memory_space<vmem>>, vector<4x9xf32>
    %92 = vector.extract_strided_slice %91 {offsets = [0, 0], sizes = [4, 1], strides = [1, 1]} : vector<4x9xf32> to vector<4x1xf32>
    %93 = vector.extract_strided_slice %90 {offsets = [0, 0], sizes = [4, 13], strides = [1, 1]} : vector<4x25xf32> to vector<4x13xf32>
    %94 = vector.broadcast %92 : vector<4x1xf32> to vector<4x13xf32>
    %95 = arith.mulf %94, %93 : vector<4x13xf32>
    %96 = vector.extract_strided_slice %91 {offsets = [0, 1], sizes = [4, 1], strides = [1, 1]} : vector<4x9xf32> to vector<4x1xf32>
    %97 = vector.extract_strided_slice %90 {offsets = [0, 1], sizes = [4, 13], strides = [1, 1]} : vector<4x25xf32> to vector<4x13xf32>
    %98 = vector.broadcast %96 : vector<4x1xf32> to vector<4x13xf32>
    %99 = arith.mulf %98, %97 : vector<4x13xf32>
    %100 = arith.addf %95, %99 : vector<4x13xf32>
    %101 = vector.extract_strided_slice %91 {offsets = [0, 2], sizes = [4, 1], strides = [1, 1]} : vector<4x9xf32> to vector<4x1xf32>
    %102 = vector.extract_strided_slice %90 {offsets = [0, 2], sizes = [4, 13], strides = [1, 1]} : vector<4x25xf32> to vector<4x13xf32>
    %103 = vector.broadcast %101 : vector<4x1xf32> to vector<4x13xf32>
    %104 = arith.mulf %103, %102 : vector<4x13xf32>
    %105 = arith.addf %100, %104 : vector<4x13xf32>
    %106 = vector.extract_strided_slice %91 {offsets = [0, 3], sizes = [4, 1], strides = [1, 1]} : vector<4x9xf32> to vector<4x1xf32>
    %107 = vector.extract_strided_slice %90 {offsets = [0, 5], sizes = [4, 13], strides = [1, 1]} : vector<4x25xf32> to vector<4x13xf32>
    %108 = vector.broadcast %106 : vector<4x1xf32> to vector<4x13xf32>
    %109 = arith.mulf %108, %107 : vector<4x13xf32>
    %110 = arith.addf %105, %109 : vector<4x13xf32>
    %111 = vector.extract_strided_slice %91 {offsets = [0, 4], sizes = [4, 1], strides = [1, 1]} : vector<4x9xf32> to vector<4x1xf32>
    %112 = vector.extract_strided_slice %90 {offsets = [0, 6], sizes = [4, 13], strides = [1, 1]} : vector<4x25xf32> to vector<4x13xf32>
    %113 = vector.broadcast %111 : vector<4x1xf32> to vector<4x13xf32>
    %114 = arith.mulf %113, %112 : vector<4x13xf32>
    %115 = arith.addf %110, %114 : vector<4x13xf32>
    %116 = vector.extract_strided_slice %91 {offsets = [0, 5], sizes = [4, 1], strides = [1, 1]} : vector<4x9xf32> to vector<4x1xf32>
    %117 = vector.extract_strided_slice %90 {offsets = [0, 7], sizes = [4, 13], strides = [1, 1]} : vector<4x25xf32> to vector<4x13xf32>
    %118 = vector.broadcast %116 : vector<4x1xf32> to vector<4x13xf32>
    %119 = arith.mulf %118, %117 : vector<4x13xf32>
    %120 = arith.addf %115, %119 : vector<4x13xf32>
    %121 = vector.extract_strided_slice %91 {offsets = [0, 6], sizes = [4, 1], strides = [1, 1]} : vector<4x9xf32> to vector<4x1xf32>
    %122 = vector.extract_strided_slice %90 {offsets = [0, 10], sizes = [4, 13], strides = [1, 1]} : vector<4x25xf32> to vector<4x13xf32>
    %123 = vector.broadcast %121 : vector<4x1xf32> to vector<4x13xf32>
    %124 = arith.mulf %123, %122 : vector<4x13xf32>
    %125 = arith.addf %120, %124 : vector<4x13xf32>
    %126 = vector.extract_strided_slice %91 {offsets = [0, 7], sizes = [4, 1], strides = [1, 1]} : vector<4x9xf32> to vector<4x1xf32>
    %127 = vector.extract_strided_slice %90 {offsets = [0, 11], sizes = [4, 13], strides = [1, 1]} : vector<4x25xf32> to vector<4x13xf32>
    %128 = vector.broadcast %126 : vector<4x1xf32> to vector<4x13xf32>
    %129 = arith.mulf %128, %127 : vector<4x13xf32>
    %130 = arith.addf %125, %129 : vector<4x13xf32>
    %131 = vector.extract_strided_slice %91 {offsets = [0, 8], sizes = [4, 1], strides = [1, 1]} : vector<4x9xf32> to vector<4x1xf32>
    %132 = vector.extract_strided_slice %90 {offsets = [0, 12], sizes = [4, 13], strides = [1, 1]} : vector<4x25xf32> to vector<4x13xf32>
    %133 = vector.broadcast %131 : vector<4x1xf32> to vector<4x13xf32>
    %134 = arith.mulf %133, %132 : vector<4x13xf32>
    %135 = arith.addf %130, %134 : vector<4x13xf32>
    %c0_27 = arith.constant 0 : index
    %c0_28 = arith.constant 0 : index
    %136 = vector.load %arg23[%c0_27, %c0_28] : memref<13x9xf32, #tpu.memory_space<vmem>>, vector<13x9xf32>
    %cst_29 = arith.constant dense<0.000000e+00> : vector<4x9xf32>
    %137 = tpu.matmul %135, %136, %cst_29 {dimension_numbers = #tpu.dot_dimension_numbers<[1], [0], [0], [1], [0, 0, 1, 1], [], []>} : vector<4x13xf32>, vector<13x9xf32>, vector<4x9xf32> -> vector<4x9xf32>
    %c0_30 = arith.constant 0 : index
    %c0_31 = arith.constant 0 : index
    %138 = vector.load %arg11[%c0_30, %c0_31] : memref<4x1xf32, #tpu.memory_space<vmem>>, vector<4x1xf32>
    %139 = vector.broadcast %138 : vector<4x1xf32> to vector<4x9xf32>
    %140 = arith.addf %137, %139 : vector<4x9xf32>
    %cst_32 = arith.constant 5.000000e-01 : f32
    %141 = vector.broadcast %cst_32 : f32 to vector<4x9xf32>
    %142 = arith.mulf %141, %140 : vector<4x9xf32>
    %cst_33 = arith.constant 4.471500e-02 : f32
    %143 = vector.broadcast %cst_33 : f32 to vector<4x9xf32>
    %144 = arith.mulf %143, %140 : vector<4x9xf32>
    %145 = arith.mulf %144, %140 : vector<4x9xf32>
    %146 = arith.mulf %145, %140 : vector<4x9xf32>
    %147 = arith.addf %140, %146 : vector<4x9xf32>
    %cst_34 = arith.constant 0.797884583 : f32
    %148 = vector.broadcast %cst_34 : f32 to vector<4x9xf32>
    %149 = arith.mulf %148, %147 : vector<4x9xf32>
    %150 = math.tanh %149 : vector<4x9xf32>
    %cst_35 = arith.constant 1.000000e+00 : f32
    %151 = vector.broadcast %cst_35 : f32 to vector<4x9xf32>
    %152 = arith.addf %151, %150 : vector<4x9xf32>
    %153 = arith.mulf %142, %152 : vector<4x9xf32>
    %c0_36 = arith.constant 0 : index
    %c0_37 = arith.constant 0 : index
    %154 = vector.load %arg12[%c0_36, %c0_37] : memref<4x4xf32, #tpu.memory_space<vmem>>, vector<4x4xf32>
    %cst_38 = arith.constant dense<0.000000e+00> : vector<4x9xf32>
    %155 = tpu.matmul %154, %153, %cst_38 {dimension_numbers = #tpu.dot_dimension_numbers<[1], [0], [0], [1], [0, 0, 1, 1], [], []>} : vector<4x4xf32>, vector<4x9xf32>, vector<4x9xf32> -> vector<4x9xf32>
    %c0_39 = arith.constant 0 : index
    %c0_40 = arith.constant 0 : index
    %156 = vector.load %arg22[%c0_39, %c0_40] : memref<9x25xf32, #tpu.memory_space<vmem>>, vector<9x25xf32>
    %cst_41 = arith.constant dense<0.000000e+00> : vector<4x25xf32>
    %157 = tpu.matmul %155, %156, %cst_41 {dimension_numbers = #tpu.dot_dimension_numbers<[1], [0], [0], [1], [0, 0, 1, 1], [], []>} : vector<4x9xf32>, vector<9x25xf32>, vector<4x25xf32> -> vector<4x25xf32>
    %c0_42 = arith.constant 0 : index
    %c0_43 = arith.constant 0 : index
    %158 = vector.load %arg13[%c0_42, %c0_43] : memref<4x9xf32, #tpu.memory_space<vmem>>, vector<4x9xf32>
    %159 = vector.extract_strided_slice %158 {offsets = [0, 0], sizes = [4, 1], strides = [1, 1]} : vector<4x9xf32> to vector<4x1xf32>
    %160 = vector.extract_strided_slice %157 {offsets = [0, 0], sizes = [4, 13], strides = [1, 1]} : vector<4x25xf32> to vector<4x13xf32>
    %161 = vector.broadcast %159 : vector<4x1xf32> to vector<4x13xf32>
    %162 = arith.mulf %161, %160 : vector<4x13xf32>
    %163 = vector.extract_strided_slice %158 {offsets = [0, 1], sizes = [4, 1], strides = [1, 1]} : vector<4x9xf32> to vector<4x1xf32>
    %164 = vector.extract_strided_slice %157 {offsets = [0, 1], sizes = [4, 13], strides = [1, 1]} : vector<4x25xf32> to vector<4x13xf32>
    %165 = vector.broadcast %163 : vector<4x1xf32> to vector<4x13xf32>
    %166 = arith.mulf %165, %164 : vector<4x13xf32>
    %167 = arith.addf %162, %166 : vector<4x13xf32>
    %168 = vector.extract_strided_slice %158 {offsets = [0, 2], sizes = [4, 1], strides = [1, 1]} : vector<4x9xf32> to vector<4x1xf32>
    %169 = vector.extract_strided_slice %157 {offsets = [0, 2], sizes = [4, 13], strides = [1, 1]} : vector<4x25xf32> to vector<4x13xf32>
    %170 = vector.broadcast %168 : vector<4x1xf32> to vector<4x13xf32>
    %171 = arith.mulf %170, %169 : vector<4x13xf32>
    %172 = arith.addf %167, %171 : vector<4x13xf32>
    %173 = vector.extract_strided_slice %158 {offsets = [0, 3], sizes = [4, 1], strides = [1, 1]} : vector<4x9xf32> to vector<4x1xf32>
    %174 = vector.extract_strided_slice %157 {offsets = [0, 5], sizes = [4, 13], strides = [1, 1]} : vector<4x25xf32> to vector<4x13xf32>
    %175 = vector.broadcast %173 : vector<4x1xf32> to vector<4x13xf32>
    %176 = arith.mulf %175, %174 : vector<4x13xf32>
    %177 = arith.addf %172, %176 : vector<4x13xf32>
    %178 = vector.extract_strided_slice %158 {offsets = [0, 4], sizes = [4, 1], strides = [1, 1]} : vector<4x9xf32> to vector<4x1xf32>
    %179 = vector.extract_strided_slice %157 {offsets = [0, 6], sizes = [4, 13], strides = [1, 1]} : vector<4x25xf32> to vector<4x13xf32>
    %180 = vector.broadcast %178 : vector<4x1xf32> to vector<4x13xf32>
    %181 = arith.mulf %180, %179 : vector<4x13xf32>
    %182 = arith.addf %177, %181 : vector<4x13xf32>
    %183 = vector.extract_strided_slice %158 {offsets = [0, 5], sizes = [4, 1], strides = [1, 1]} : vector<4x9xf32> to vector<4x1xf32>
    %184 = vector.extract_strided_slice %157 {offsets = [0, 7], sizes = [4, 13], strides = [1, 1]} : vector<4x25xf32> to vector<4x13xf32>
    %185 = vector.broadcast %183 : vector<4x1xf32> to vector<4x13xf32>
    %186 = arith.mulf %185, %184 : vector<4x13xf32>
    %187 = arith.addf %182, %186 : vector<4x13xf32>
    %188 = vector.extract_strided_slice %158 {offsets = [0, 6], sizes = [4, 1], strides = [1, 1]} : vector<4x9xf32> to vector<4x1xf32>
    %189 = vector.extract_strided_slice %157 {offsets = [0, 10], sizes = [4, 13], strides = [1, 1]} : vector<4x25xf32> to vector<4x13xf32>
    %190 = vector.broadcast %188 : vector<4x1xf32> to vector<4x13xf32>
    %191 = arith.mulf %190, %189 : vector<4x13xf32>
    %192 = arith.addf %187, %191 : vector<4x13xf32>
    %193 = vector.extract_strided_slice %158 {offsets = [0, 7], sizes = [4, 1], strides = [1, 1]} : vector<4x9xf32> to vector<4x1xf32>
    %194 = vector.extract_strided_slice %157 {offsets = [0, 11], sizes = [4, 13], strides = [1, 1]} : vector<4x25xf32> to vector<4x13xf32>
    %195 = vector.broadcast %193 : vector<4x1xf32> to vector<4x13xf32>
    %196 = arith.mulf %195, %194 : vector<4x13xf32>
    %197 = arith.addf %192, %196 : vector<4x13xf32>
    %198 = vector.extract_strided_slice %158 {offsets = [0, 8], sizes = [4, 1], strides = [1, 1]} : vector<4x9xf32> to vector<4x1xf32>
    %199 = vector.extract_strided_slice %157 {offsets = [0, 12], sizes = [4, 13], strides = [1, 1]} : vector<4x25xf32> to vector<4x13xf32>
    %200 = vector.broadcast %198 : vector<4x1xf32> to vector<4x13xf32>
    %201 = arith.mulf %200, %199 : vector<4x13xf32>
    %202 = arith.addf %197, %201 : vector<4x13xf32>
    %c0_44 = arith.constant 0 : index
    %c0_45 = arith.constant 0 : index
    %203 = vector.load %arg23[%c0_44, %c0_45] : memref<13x9xf32, #tpu.memory_space<vmem>>, vector<13x9xf32>
    %cst_46 = arith.constant dense<0.000000e+00> : vector<4x9xf32>
    %204 = tpu.matmul %202, %203, %cst_46 {dimension_numbers = #tpu.dot_dimension_numbers<[1], [0], [0], [1], [0, 0, 1, 1], [], []>} : vector<4x13xf32>, vector<13x9xf32>, vector<4x9xf32> -> vector<4x9xf32>
    %c0_47 = arith.constant 0 : index
    %c0_48 = arith.constant 0 : index
    %205 = vector.load %arg14[%c0_47, %c0_48] : memref<4x1xf32, #tpu.memory_space<vmem>>, vector<4x1xf32>
    %206 = vector.broadcast %205 : vector<4x1xf32> to vector<4x9xf32>
    %207 = arith.addf %204, %206 : vector<4x9xf32>
    %cst_49 = arith.constant 5.000000e-01 : f32
    %208 = vector.broadcast %cst_49 : f32 to vector<4x9xf32>
    %209 = arith.mulf %208, %207 : vector<4x9xf32>
    %cst_50 = arith.constant 4.471500e-02 : f32
    %210 = vector.broadcast %cst_50 : f32 to vector<4x9xf32>
    %211 = arith.mulf %210, %207 : vector<4x9xf32>
    %212 = arith.mulf %211, %207 : vector<4x9xf32>
    %213 = arith.mulf %212, %207 : vector<4x9xf32>
    %214 = arith.addf %207, %213 : vector<4x9xf32>
    %cst_51 = arith.constant 0.797884583 : f32
    %215 = vector.broadcast %cst_51 : f32 to vector<4x9xf32>
    %216 = arith.mulf %215, %214 : vector<4x9xf32>
    %217 = math.tanh %216 : vector<4x9xf32>
    %cst_52 = arith.constant 1.000000e+00 : f32
    %218 = vector.broadcast %cst_52 : f32 to vector<4x9xf32>
    %219 = arith.addf %218, %217 : vector<4x9xf32>
    %220 = arith.mulf %209, %219 : vector<4x9xf32>
    %c0_53 = arith.constant 0 : index
    %c0_54 = arith.constant 0 : index
    %221 = vector.load %arg15[%c0_53, %c0_54] : memref<4x4xf32, #tpu.memory_space<vmem>>, vector<4x4xf32>
    %cst_55 = arith.constant dense<0.000000e+00> : vector<4x9xf32>
    %222 = tpu.matmul %221, %220, %cst_55 {dimension_numbers = #tpu.dot_dimension_numbers<[1], [0], [0], [1], [0, 0, 1, 1], [], []>} : vector<4x4xf32>, vector<4x9xf32>, vector<4x9xf32> -> vector<4x9xf32>
    %c0_56 = arith.constant 0 : index
    %c0_57 = arith.constant 0 : index
    %223 = vector.load %arg22[%c0_56, %c0_57] : memref<9x25xf32, #tpu.memory_space<vmem>>, vector<9x25xf32>
    %cst_58 = arith.constant dense<0.000000e+00> : vector<4x25xf32>
    %224 = tpu.matmul %222, %223, %cst_58 {dimension_numbers = #tpu.dot_dimension_numbers<[1], [0], [0], [1], [0, 0, 1, 1], [], []>} : vector<4x9xf32>, vector<9x25xf32>, vector<4x25xf32> -> vector<4x25xf32>
    %c0_59 = arith.constant 0 : index
    %c0_60 = arith.constant 0 : index
    %225 = vector.load %arg16[%c0_59, %c0_60] : memref<4x9xf32, #tpu.memory_space<vmem>>, vector<4x9xf32>
    %226 = vector.extract_strided_slice %225 {offsets = [0, 0], sizes = [4, 1], strides = [1, 1]} : vector<4x9xf32> to vector<4x1xf32>
    %227 = vector.extract_strided_slice %224 {offsets = [0, 0], sizes = [4, 13], strides = [1, 1]} : vector<4x25xf32> to vector<4x13xf32>
    %228 = vector.broadcast %226 : vector<4x1xf32> to vector<4x13xf32>
    %229 = arith.mulf %228, %227 : vector<4x13xf32>
    %230 = vector.extract_strided_slice %225 {offsets = [0, 1], sizes = [4, 1], strides = [1, 1]} : vector<4x9xf32> to vector<4x1xf32>
    %231 = vector.extract_strided_slice %224 {offsets = [0, 1], sizes = [4, 13], strides = [1, 1]} : vector<4x25xf32> to vector<4x13xf32>
    %232 = vector.broadcast %230 : vector<4x1xf32> to vector<4x13xf32>
    %233 = arith.mulf %232, %231 : vector<4x13xf32>
    %234 = arith.addf %229, %233 : vector<4x13xf32>
    %235 = vector.extract_strided_slice %225 {offsets = [0, 2], sizes = [4, 1], strides = [1, 1]} : vector<4x9xf32> to vector<4x1xf32>
    %236 = vector.extract_strided_slice %224 {offsets = [0, 2], sizes = [4, 13], strides = [1, 1]} : vector<4x25xf32> to vector<4x13xf32>
    %237 = vector.broadcast %235 : vector<4x1xf32> to vector<4x13xf32>
    %238 = arith.mulf %237, %236 : vector<4x13xf32>
    %239 = arith.addf %234, %238 : vector<4x13xf32>
    %240 = vector.extract_strided_slice %225 {offsets = [0, 3], sizes = [4, 1], strides = [1, 1]} : vector<4x9xf32> to vector<4x1xf32>
    %241 = vector.extract_strided_slice %224 {offsets = [0, 5], sizes = [4, 13], strides = [1, 1]} : vector<4x25xf32> to vector<4x13xf32>
    %242 = vector.broadcast %240 : vector<4x1xf32> to vector<4x13xf32>
    %243 = arith.mulf %242, %241 : vector<4x13xf32>
    %244 = arith.addf %239, %243 : vector<4x13xf32>
    %245 = vector.extract_strided_slice %225 {offsets = [0, 4], sizes = [4, 1], strides = [1, 1]} : vector<4x9xf32> to vector<4x1xf32>
    %246 = vector.extract_strided_slice %224 {offsets = [0, 6], sizes = [4, 13], strides = [1, 1]} : vector<4x25xf32> to vector<4x13xf32>
    %247 = vector.broadcast %245 : vector<4x1xf32> to vector<4x13xf32>
    %248 = arith.mulf %247, %246 : vector<4x13xf32>
    %249 = arith.addf %244, %248 : vector<4x13xf32>
    %250 = vector.extract_strided_slice %225 {offsets = [0, 5], sizes = [4, 1], strides = [1, 1]} : vector<4x9xf32> to vector<4x1xf32>
    %251 = vector.extract_strided_slice %224 {offsets = [0, 7], sizes = [4, 13], strides = [1, 1]} : vector<4x25xf32> to vector<4x13xf32>
    %252 = vector.broadcast %250 : vector<4x1xf32> to vector<4x13xf32>
    %253 = arith.mulf %252, %251 : vector<4x13xf32>
    %254 = arith.addf %249, %253 : vector<4x13xf32>
    %255 = vector.extract_strided_slice %225 {offsets = [0, 6], sizes = [4, 1], strides = [1, 1]} : vector<4x9xf32> to vector<4x1xf32>
    %256 = vector.extract_strided_slice %224 {offsets = [0, 10], sizes = [4, 13], strides = [1, 1]} : vector<4x25xf32> to vector<4x13xf32>
    %257 = vector.broadcast %255 : vector<4x1xf32> to vector<4x13xf32>
    %258 = arith.mulf %257, %256 : vector<4x13xf32>
    %259 = arith.addf %254, %258 : vector<4x13xf32>
    %260 = vector.extract_strided_slice %225 {offsets = [0, 7], sizes = [4, 1], strides = [1, 1]} : vector<4x9xf32> to vector<4x1xf32>
    %261 = vector.extract_strided_slice %224 {offsets = [0, 11], sizes = [4, 13], strides = [1, 1]} : vector<4x25xf32> to vector<4x13xf32>
    %262 = vector.broadcast %260 : vector<4x1xf32> to vector<4x13xf32>
    %263 = arith.mulf %262, %261 : vector<4x13xf32>
    %264 = arith.addf %259, %263 : vector<4x13xf32>
    %265 = vector.extract_strided_slice %225 {offsets = [0, 8], sizes = [4, 1], strides = [1, 1]} : vector<4x9xf32> to vector<4x1xf32>
    %266 = vector.extract_strided_slice %224 {offsets = [0, 12], sizes = [4, 13], strides = [1, 1]} : vector<4x25xf32> to vector<4x13xf32>
    %267 = vector.broadcast %265 : vector<4x1xf32> to vector<4x13xf32>
    %268 = arith.mulf %267, %266 : vector<4x13xf32>
    %269 = arith.addf %264, %268 : vector<4x13xf32>
    %c0_61 = arith.constant 0 : index
    %c0_62 = arith.constant 0 : index
    %270 = vector.load %arg23[%c0_61, %c0_62] : memref<13x9xf32, #tpu.memory_space<vmem>>, vector<13x9xf32>
    %cst_63 = arith.constant dense<0.000000e+00> : vector<4x9xf32>
    %271 = tpu.matmul %269, %270, %cst_63 {dimension_numbers = #tpu.dot_dimension_numbers<[1], [0], [0], [1], [0, 0, 1, 1], [], []>} : vector<4x13xf32>, vector<13x9xf32>, vector<4x9xf32> -> vector<4x9xf32>
    %c0_64 = arith.constant 0 : index
    %c0_65 = arith.constant 0 : index
    %272 = vector.load %arg17[%c0_64, %c0_65] : memref<4x1xf32, #tpu.memory_space<vmem>>, vector<4x1xf32>
    %273 = vector.broadcast %272 : vector<4x1xf32> to vector<4x9xf32>
    %274 = arith.addf %271, %273 : vector<4x9xf32>
    %c0_66 = arith.constant 0 : index
    %c0_67 = arith.constant 0 : index
    %275 = vector.load %arg24[%c0_66, %c0_67] : memref<9x1024xf32, #tpu.memory_space<vmem>>, vector<9x1024xf32>
    %cst_68 = arith.constant dense<0.000000e+00> : vector<4x1024xf32>
    %276 = tpu.matmul %274, %275, %cst_68 {dimension_numbers = #tpu.dot_dimension_numbers<[1], [0], [0], [1], [0, 0, 1, 1], [], []>} : vector<4x9xf32>, vector<9x1024xf32>, vector<4x1024xf32> -> vector<4x1024xf32>
    %c0_69 = arith.constant 0 : index
    %c0_70 = arith.constant 0 : index
    %277 = vector.load %arg4[%c0_69, %c0_70] : memref<4x4xf32, #tpu.memory_space<vmem>>, vector<4x4xf32>
    %cst_71 = arith.constant dense<0.000000e+00> : vector<4x1024xf32>
    %278 = tpu.matmul %277, %6, %cst_71 {dimension_numbers = #tpu.dot_dimension_numbers<[1], [0], [0], [1], [0, 0, 1, 1], [], []>} : vector<4x4xf32>, vector<4x1024xf32>, vector<4x1024xf32> -> vector<4x1024xf32>
    %c0_72 = arith.constant 0 : index
    %c0_73 = arith.constant 0 : index
    %279 = vector.load %arg5[%c0_72, %c0_73] : memref<4x1xf32, #tpu.memory_space<vmem>>, vector<4x1xf32>
    %280 = vector.broadcast %279 : vector<4x1xf32> to vector<4x1024xf32>
    %281 = arith.addf %278, %280 : vector<4x1024xf32>
    %c0_74 = arith.constant 0 : index
    %c0_75 = arith.constant 0 : index
    %282 = vector.load %arg18[%c0_74, %c0_75] : memref<16x4xf32, #tpu.memory_space<vmem>>, vector<16x4xf32>
    %283 = arith.addf %276, %281 : vector<4x1024xf32>
    %cst_76 = arith.constant dense<0.000000e+00> : vector<16x1024xf32>
    %284 = tpu.matmul %282, %283, %cst_76 {dimension_numbers = #tpu.dot_dimension_numbers<[1], [0], [0], [1], [0, 0, 1, 1], [], []>} : vector<16x4xf32>, vector<4x1024xf32>, vector<16x1024xf32> -> vector<16x1024xf32>
    %c0_77 = arith.constant 0 : index
    %c0_78 = arith.constant 0 : index
    %285 = vector.load %arg19[%c0_77, %c0_78] : memref<16x1xf32, #tpu.memory_space<vmem>>, vector<16x1xf32>
    %286 = vector.broadcast %285 : vector<16x1xf32> to vector<16x1024xf32>
    %287 = arith.addf %284, %286 : vector<16x1024xf32>
    %c0_79 = arith.constant 0 : index
    %c0_80 = arith.constant 0 : index
    %c0_81 = arith.constant 0 : index
    %288 = vector.load %arg1[%c0_79, %c0_80, %c0_81] : memref<1x16x1024xf32, #tpu.memory_space<vmem>>, vector<1x16x1024xf32>
    %289 = vector.shape_cast %288 : vector<1x16x1024xf32> to vector<16x1024xf32>
    %cst_82 = arith.constant 0.000000e+00 : f32
    %290 = vector.broadcast %cst_82 : f32 to vector<16x1024xf32>
    %291 = arith.subf %290, %287 : vector<16x1024xf32>
    %292 = math.exp %291 : vector<16x1024xf32>
    %cst_83 = arith.constant 1.000000e+00 : f32
    %293 = vector.broadcast %cst_83 : f32 to vector<16x1024xf32>
    %294 = arith.addf %293, %292 : vector<16x1024xf32>
    %cst_84 = arith.constant 1.000000e+00 : f32
    %295 = vector.broadcast %cst_84 : f32 to vector<16x1024xf32>
    %296 = arith.divf %295, %294 : vector<16x1024xf32>
    %297 = arith.mulf %289, %296 : vector<16x1024xf32>
    %c0_85 = arith.constant 0 : index
    %c0_86 = arith.constant 0 : index
    %c0_87 = arith.constant 0 : index
    %298 = vector.load %arg25[%c0_85, %c0_86, %c0_87] : memref<1x16x1024xf32, #tpu.memory_space<vmem>>, vector<1x16x1024xf32>
    %299 = vector.shape_cast %298 : vector<1x16x1024xf32> to vector<16x1024xf32>
    %300 = vector.shape_cast %297 : vector<16x1024xf32> to vector<1x16x1024xf32>
    tpu.vector_store %arg25[%c0_85, %c0_86, %c0_87], %300 {strides = array<i32>} : memref<1x16x1024xf32, #tpu.memory_space<vmem>>, vector<1x16x1024xf32>,
    return
  }
  func.func @transform_0(%arg0: i32) -> (i32, i32, i32) {
    %c0_i32 = arith.constant 0 : i32
    %c0_i32_0 = arith.constant 0 : i32
    %c0_i32_1 = arith.constant 0 : i32
    return %arg0, %c0_i32, %c0_i32_0 : i32, i32, i32
  }
  func.func @transform_1(%arg0: i32) -> (i32, i32) {
    %c0_i32 = arith.constant 0 : i32
    %c0_i32_0 = arith.constant 0 : i32
    %c0_i32_1 = arith.constant 0 : i32
    return %c0_i32, %c0_i32_0 : i32, i32
  }
  func.func @transform_2(%arg0: i32) -> (i32, i32) {
    %c0_i32 = arith.constant 0 : i32
    %c0_i32_0 = arith.constant 0 : i32
    %c0_i32_1 = arith.constant 0 : i32
    return %c0_i32, %c0_i32_0 : i32, i32
  }
  func.func @transform_3(%arg0: i32) -> (i32, i32) {
    %c0_i32 = arith.constant 0 : i32
    %c0_i32_0 = arith.constant 0 : i32
    %c0_i32_1 = arith.constant 0 : i32
    return %c0_i32, %c0_i32_0 : i32, i32
  }
  func.func @transform_4(%arg0: i32) -> (i32, i32) {
    %c0_i32 = arith.constant 0 : i32
    %c0_i32_0 = arith.constant 0 : i32
    %c0_i32_1 = arith.constant 0 : i32
    return %c0_i32, %c0_i32_0 : i32, i32
  }
  func.func @transform_5(%arg0: i32) -> (i32, i32) {
    %c0_i32 = arith.constant 0 : i32
    %c0_i32_0 = arith.constant 0 : i32
    %c0_i32_1 = arith.constant 0 : i32
    return %c0_i32, %c0_i32_0 : i32, i32
  }
  func.func @transform_6(%arg0: i32) -> (i32, i32) {
    %c0_i32 = arith.constant 0 : i32
    %c0_i32_0 = arith.constant 0 : i32
    %c0_i32_1 = arith.constant 0 : i32
    return %c0_i32, %c0_i32_0 : i32, i32
  }
  func.func @transform_7(%arg0: i32) -> (i32, i32) {
    %c0_i32 = arith.constant 0 : i32
    %c0_i32_0 = arith.constant 0 : i32
    %c0_i32_1 = arith.constant 0 : i32
    return %c0_i32, %c0_i32_0 : i32, i32
  }
  func.func @transform_8(%arg0: i32) -> (i32, i32) {
    %c0_i32 = arith.constant 0 : i32
    %c0_i32_0 = arith.constant 0 : i32
    %c0_i32_1 = arith.constant 0 : i32
    return %c0_i32, %c0_i32_0 : i32, i32
  }
  func.func @transform_9(%arg0: i32) -> (i32, i32) {
    %c0_i32 = arith.constant 0 : i32
    %c0_i32_0 = arith.constant 0 : i32
    %c0_i32_1 = arith.constant 0 : i32
    return %c0_i32, %c0_i32_0 : i32, i32
  }
  func.func @transform_10(%arg0: i32) -> (i32, i32) {
    %c0_i32 = arith.constant 0 : i32
    %c0_i32_0 = arith.constant 0 : i32
    %c0_i32_1 = arith.constant 0 : i32
    return %c0_i32, %c0_i32_0 : i32, i32
  }
  func.func @transform_11(%arg0: i32) -> (i32, i32) {
    %c0_i32 = arith.constant 0 : i32
    %c0_i32_0 = arith.constant 0 : i32
    %c0_i32_1 = arith.constant 0 : i32
    return %c0_i32, %c0_i32_0 : i32, i32
  }
  func.func @transform_12(%arg0: i32) -> (i32, i32) {
    %c0_i32 = arith.constant 0 : i32
    %c0_i32_0 = arith.constant 0 : i32
    %c0_i32_1 = arith.constant 0 : i32
    return %c0_i32, %c0_i32_0 : i32, i32
  }
  func.func @transform_13(%arg0: i32) -> (i32, i32) {
    %c0_i32 = arith.constant 0 : i32
    %c0_i32_0 = arith.constant 0 : i32
    %c0_i32_1 = arith.constant 0 : i32
    return %c0_i32, %c0_i32_0 : i32, i32
  }
  func.func @transform_14(%arg0: i32) -> (i32, i32) {
    %c0_i32 = arith.constant 0 : i32
    %c0_i32_0 = arith.constant 0 : i32
    %c0_i32_1 = arith.constant 0 : i32
    return %c0_i32, %c0_i32_0 : i32, i32
  }
  func.func @transform_15(%arg0: i32) -> (i32, i32) {
    %c0_i32 = arith.constant 0 : i32
    %c0_i32_0 = arith.constant 0 : i32
    %c0_i32_1 = arith.constant 0 : i32
    return %c0_i32, %c0_i32_0 : i32, i32
  }
  func.func @transform_16(%arg0: i32) -> (i32, i32) {
    %c0_i32 = arith.constant 0 : i32
    %c0_i32_0 = arith.constant 0 : i32
    %c0_i32_1 = arith.constant 0 : i32
    return %c0_i32, %c0_i32_0 : i32, i32
  }
  func.func @transform_17(%arg0: i32) -> (i32, i32) {
    %c0_i32 = arith.constant 0 : i32
    %c0_i32_0 = arith.constant 0 : i32
    %c0_i32_1 = arith.constant 0 : i32
    return %c0_i32, %c0_i32_0 : i32, i32
  }
  func.func @transform_18(%arg0: i32) -> (i32, i32) {
    %c0_i32 = arith.constant 0 : i32
    %c0_i32_0 = arith.constant 0 : i32
    %c0_i32_1 = arith.constant 0 : i32
    return %c0_i32, %c0_i32_0 : i32, i32
  }
  func.func @transform_19(%arg0: i32) -> (i32, i32) {
    %c0_i32 = arith.constant 0 : i32
    %c0_i32_0 = arith.constant 0 : i32
    %c0_i32_1 = arith.constant 0 : i32
    return %c0_i32, %c0_i32_0 : i32, i32
  }
  func.func @transform_20(%arg0: i32) -> (i32, i32) {
    %c0_i32 = arith.constant 0 : i32
    %c0_i32_0 = arith.constant 0 : i32
    %c0_i32_1 = arith.constant 0 : i32
    return %c0_i32, %c0_i32_0 : i32, i32
  }
  func.func @transform_21(%arg0: i32) -> (i32, i32) {
    %c0_i32 = arith.constant 0 : i32
    %c0_i32_0 = arith.constant 0 : i32
    %c0_i32_1 = arith.constant 0 : i32
    return %c0_i32, %c0_i32_0 : i32, i32
  }
  func.func @transform_22(%arg0: i32) -> (i32, i32) {
    %c0_i32 = arith.constant 0 : i32
    %c0_i32_0 = arith.constant 0 : i32
    %c0_i32_1 = arith.constant 0 : i32
    return %c0_i32, %c0_i32_0 : i32, i32
  }
  func.func @transform_23(%arg0: i32) -> (i32, i32) {
    %c0_i32 = arith.constant 0 : i32
    %c0_i32_0 = arith.constant 0 : i32
    %c0_i32_1 = arith.constant 0 : i32
    return %c0_i32, %c0_i32_0 : i32, i32
  }
  func.func @transform_24(%arg0: i32) -> (i32, i32, i32) {
    %c0_i32 = arith.constant 0 : i32
    %c0_i32_0 = arith.constant 0 : i32
    %c0_i32_1 = arith.constant 0 : i32
    return %arg0, %c0_i32, %c0_i32_0 : i32, i32, i32
  }
}

</mosaic_0001>

<bundles_post_ra>
// kernel: esa_forward.1
= control target key start
LH: loop header
LB: loop body
LE: loop exit
PB: predicated region body
PF: predicated region fallthrough
CT: control target
= control target key end

     0   :  { %s6719_s0 = inlined_call_operand.vmem [shape: f32[2,16,1024], index: 0, kind: input, shape index: {}]   ;;  %s6720_s1 = inlined_call_operand.vmem [shape: f32[4,16], index: 1, kind: input, shape index: {}]   ;;  %s6721_s2 = inlined_call_operand.vmem [shape: f32[4,1], index: 2, kind: input, shape index: {}]   ;;  %s6722_s3 = inlined_call_operand.vmem [shape: f32[4,4], index: 3, kind: input, shape index: {}]   ;;  %s6723_s4 = inlined_call_operand.vmem [shape: f32[4,1], index: 4, kind: input, shape index: {}]   ;;  %s6724_s5 = inlined_call_operand.vmem [shape: f32[4,4], index: 5, kind: input, shape index: {}]   ;;  %s6725_s6 = inlined_call_operand.vmem [shape: f32[4,9], index: 6, kind: input, shape index: {}]   ;;  %s6726_s7 = inlined_call_operand.vmem [shape: f32[4,1], index: 7, kind: input, shape index: {}]   ;;  %s6727_s8 = inlined_call_operand.vmem [shape: f32[4,4], index: 8, kind: input, shape index: {}]   ;;  %s6728_s9 = inlined_call_operand.vmem [shape: f32[4,9], index: 9, kind: input, shape index: {}]   ;;  %s6729_s10 = inlined_call_operand.vmem [shape: f32[4,1], index: 10, kind: input, shape index: {}]   ;;  %s6730_s11 = inlined_call_operand.vmem [shape: f32[4,4], index: 11, kind: input, shape index: {}]   ;;  %s6731_s12 = inlined_call_operand.vmem [shape: f32[4,9], index: 12, kind: input, shape index: {}]   ;;  %s6732_s13 = inlined_call_operand.vmem [shape: f32[4,1], index: 13, kind: input, shape index: {}]   ;;  %s6733_s14 = inlined_call_operand.vmem [shape: f32[4,4], index: 14, kind: input, shape index: {}]   ;;  %s6734_s15 = inlined_call_operand.vmem [shape: f32[4,9], index: 15, kind: input, shape index: {}]   ;;  %s6735_s16 = inlined_call_operand.vmem [shape: f32[4,1], index: 16, kind: input, shape index: {}]   ;;  %s6736_s17 = inlined_call_operand.vmem [shape: f32[16,4], index: 17, kind: input, shape index: {}]   ;;  %s6737_s18 = inlined_call_operand.vmem [shape: f32[16,1], index: 18, kind: input, shape index: {}]   ;;  %s6738_s19 = inlined_call_operand.hbm [shape: f32[958,225], index: 19, kind: input, shape index: {}]   ;;  %s6739_s20 = inlined_call_operand.vmem [shape: f32[129,9], index: 20, kind: input, shape index: {}]   ;;  %s6740_s21 = inlined_call_operand.vmem [shape: f32[9,25], index: 21, kind: input, shape index: {}]   ;;  %s6741_s22 = inlined_call_operand.vmem [shape: f32[13,9], index: 22, kind: input, shape index: {}]   ;;  %s6742_s23 = inlined_call_operand.vmem [shape: f32[9,1024], index: 23, kind: input, shape index: {}]   ;;  %s6743_s24 = inlined_call_operand.vmem [shape: f32[2,16,1024], index: 24, kind: output, shape index: {}]  }
   0x1   :  { %6759 = sst [smem:[#allocation5_spill]] %s6719_s0 }
   0x2   :  { %6760 = sst [smem:[#allocation6_spill]] %s6720_s1 }
   0x3   :  { %6761 = sst [smem:[#allocation7_spill]] %s6721_s2 }
   0x4   :  { %6762 = sst [smem:[#allocation8_spill]] %s6722_s3 }
   0x5   :  { %6763 = sst [smem:[#allocation9_spill]] %s6723_s4 }
   0x6   :  { %6764 = sst [smem:[#allocation10_spill]] %s6724_s5 }
   0x7   :  { %6765 = sst [smem:[#allocation11_spill]] %s6725_s6 }
   0x8   :  { %6766 = sst [smem:[#allocation12_spill]] %s6726_s7 }
   0x9   :  { %6767 = sst [smem:[#allocation13_spill]] %s6727_s8 }
   0xa   :  { %29 = vsyncpa [#allocation3], 0  ;;  %s5687_s5 = smov 0  }
   0xb LB: > { %s5693_s26 = sadd.s32 4294967295, %s5522_s5   ;;  %p4778_p0 = scmp.ge.s32.totalorder %s5522_s5, 1  ;;  %s5522_s5 = sphi %s5687_s5, %s35_s5  }
   0xc   : > { %p575_p1 = scmp.lt.s32.totalorder %s5522_s5, 3  ;;  %s5524_s27 = smov [#allocation2]  }
   0xd   : > { %s641_s28 = sshll.u32 %s5524_s27, 4  ;;  %p6744_p3 = scmp.eq.s32.totalorder %s5693_s26, 0  ;;  %s642_s28 = int_to_ptr.vmem [resolvable:$true] %s641_s28 }
   0xe   : > { %p5697_p2 = pnand %p4778_p0, %p575_p1  ;;  %s5484_s7 = scalar_lea.hbm %s6738_s19, 30720 }
   0xf   : > { %p5485_p6 = scmp.ne.s32.totalorder %s6738_s19, %s5484_s7  ;;  %p5491_p10 = scmp.lt.u32.totalorder %s5484_s7, %s6738_s19 }
  0x10   : > { %s6768_s6 = scalar_select %p5697_p2, 1, 0 }
  0x11   : > { %p5309_p4 = pneg %p5697_p2 }
  0x13   : > { %p5706_p5 = pnand %p6744_p3, %p5309_p4 }
  0x15   : > { %p5486_p7 = pneg %p5706_p5 }
  0x17   : > { %p5487_p8 = pnand %p5486_p7, %p5485_p6 }
  0x19   : > { %p5488_p9 = pneg %p5487_p8 }
  0x1b   : > { %p5493_p11 = pnand %p5491_p10, %p5488_p9 }
  0x1d   : > { %5496 = shalt.err (!%p5493_p11)
}
  0x1e   : > { %s5497_s4 = scalar_lea.vmem %s642_s28, 30720  ;;  %p5505_p1 = scmp.lt.s32.totalorder %s642_s28, %s642_s28 }
  0x1f   : > { %p5498_p12 = scmp.ne.s32.totalorder %s642_s28, %s5497_s4  ;;  %p5506_p4 = scmp.lt.s32.totalorder %s5497_s4, %s5497_s4 }
  0x21   : > { %p5500_p13 = pnand %p5498_p12, %p5486_p7  ;;  %p5507_p3 = por %p5506_p4, %p5505_p1 }
  0x23   : > { %p5501_p0 = pneg %p5500_p13 }
  0x25   : > { %p5508_p2 = pnand %p5507_p3, %p5501_p0 }
  0x27   : > { %5511 = shalt.err (!%p5508_p2)
}
  0x28   : > { %s5525_s1 = smov 256   ;;  %s5526_s27 = smov 16  }
  0x29   : > { %5312 = dma.hbm_to_vmem [thread:$0]  (!%p5706_p5), %s6738_s19, 30720, %s642_s28, [#allocation3], %s5525_s1, %s5525_s1, %s5526_s27  }
  0x2a   : > { %p6770_p6 = scmp.ne.s32.totalorder %s6768_s6, 0 }
  0x2b   : > { %p6771_p8 = scmp.eq.s32.totalorder (!%p6770_p6), %s5693_s26, 0 }
  0x2c   : > { %677 = sbr.rel (%p6770_p6) target bundleno = 4355 (0x1103), region = 116 }
  0x33   : > { %5517 = dma.done.wait (%p6771_p8), [#allocation3], 30720   ;;  %p6772_p7 = pmov %p6771_p8 }
  0x34   : > { %p743_p2 = scmp.lt.s32.totalorder %s5693_s26, 1  ;;  %v5527_v0 = vmov 0.0   ;;  %v6752_v1 = vmov 0   ;;  %s6773_s7 = sld [smem:[#allocation5_spill]]  ;;  %vm776_vm0 = vcmask 130048   ;;  %v6746_v29 = vmov 2  }
  0x35   : > { %5519 = vsyncadd (%p6772_p7), [#allocation3], 4294936576  ;;  %844 = vmatprep.mubr.f32.mxu1 %v5527_v0  ;;  %986 = vmatprep.mubr.f32.mxu0 %v5527_v0  ;;  %s6774_s8 = sld [smem:[#allocation6_spill]]  ;;  %s6775_s27 = sld [smem:[#allocation7_spill]]  ;;  %v6748_v30 = vmov 1   ;;  %v5531_v31 = vmov 3  }
  0x36   : > { %s6794_s26 = smov (!%p743_p2, %s5693_s26), 1  ;;  %5361 = vset.pattern.permute.xlu0 %v6752_v1  ;;  %s6776_s6 = sld [smem:[#allocation11_spill]]  ;;  %5363 = vset.pattern.permute.xlu1 %v6746_v29  ;;  %v5532_v32 = vmov 5   ;;  %v5533_v33 = vmov 4   ;;  %v6750_v34 = vmov 8   ;;  %v6754_v35 = vmov 6  }
  0x37   : > { %s6756_s28 = sshll.u32 %s6794_s26, 7  ;;  %v5536_v36 = vmov 7   ;;  %vm1069_vm1 = vcmask 1043456   ;;  %s6777_s3 = sld [smem:[#allocation10_spill]]  ;;  %vm1065_vm2 = vcmask 31744   ;;  %v1873_v55 = vld [vmem:[#allocation2 + $0x8] sm:$0xff] }
  0x38   : > { %v1875_v56 = vld [vmem:[#allocation2 + $0x18] sm:$0xff]  ;;  %v1872_v57 = vld [vmem:[#allocation2] sm:$0xff]  ;;  %v1874_v59 = vld [vmem:[#allocation2 + $0x10] sm:$0xff]  ;;  %s5537_s25 = smov 126   ;;  %s5539_s4 = smov 95   ;;  %vm2121_vm3 = vcmask 1045504  }
  0x39   : > { %v4967_v58 = vpack.c.bf16 %v1875_v56, %v1873_v55  ;;  %v4969_v60 = vpack.c.bf16 %v1874_v59, %v1872_v57  ;;  %v1877_v61 = vld [vmem:[#allocation2 + $0x28] sm:$0xff]  ;;  %v1879_v62 = vld [vmem:[#allocation2 + $0x38] sm:$0xff]  ;;  %v1876_v63 = vld [vmem:[#allocation2 + $0x20] sm:$0xff]  ;;  %s5540_s1 = smov 96   ;;  %s5542_s29 = smov 94   ;;  %vm5545_vm4 = vmmov 1  }
  0x3a   : > { %s5745_s30 = scalar_lea.vmem %s6773_s7, %s6756_s28  ;;  %v1903_v55 = vld [vmem:[#allocation2 + $0xf8] sm:$0xff]  ;;  %s5543_s0 = smov 63   ;;  %vm5204_vm5 = vmpackc.low %vm2121_vm3, %vm5545_vm4  ;;  %vm1428_vm6 = vcmask 1039360   ;;  %vm1488_vm7 = vcmask 1031168   ;;  %vm1548_vm8 = vcmask 785408   ;;  %vm1608_vm9 = vcmask 777216  }
  0x3b   : > { %v754_v2 = vld [vmem:[%s5745_s30 + $0x8] sm:$0xff]  ;;  %v753_v7 = vld [vmem:[%s5745_s30] sm:$0xff]  ;;  %v756_v15 = vld [vmem:[%s5745_s30 + $0x18] sm:$0xff]  ;;  %vm1668_vm10 = vcmask 769024   ;;  %vm1728_vm11 = vcmask 523264   ;;  %vm1788_vm12 = vcmask 515072  }
  0x3c   : > { %v762_v3 = vld [vmem:[%s5745_s30 + $0x48] sm:$0xff]  ;;  %v761_v8 = vld [vmem:[%s5745_s30 + $0x40] sm:$0xff]  ;;  %v764_v16 = vld [vmem:[%s5745_s30 + $0x58] sm:$0xff]  ;;  %vm1848_vm13 = vcmask 506880   ;;  %vm2436_vm14 = vcmask 1022976   ;;  %vm2446_vm15 = vcmask 1014784  }
  0x3d   : > { %v758_v4 = vld [vmem:[%s5745_s30 + $0x28] sm:$0xff]  ;;  %v4951_v5 = vpack.c.bf16 %v762_v3, %v754_v2  ;;  %v4953_v10 = vpack.c.bf16 %v761_v8, %v753_v7  ;;  %v757_v11 = vld [vmem:[%s5745_s30 + $0x20] sm:$0xff]  ;;  %v755_v17 = vld [vmem:[%s5745_s30 + $0x10] sm:$0xff]  ;;  %v4955_v18 = vpack.c.bf16 %v764_v16, %v756_v15  ;;  %v4971_v2 = vpack.c.bf16 %v1879_v62, %v1877_v61  ;;  %s5554_s28 = smov 68   ;;  %s6788_s2 = smov 122  }
  0x3e   : > { %v766_v6 = vld [vmem:[%s5745_s30 + $0x68] sm:$0xff]  ;;  %v765_v12 = vld [vmem:[%s5745_s30 + $0x60] sm:$0xff]  ;;  %v763_v19 = vld [vmem:[%s5745_s30 + $0x50] sm:$0xff]  ;;  %vm2466_vm3 = vcmask 998400   ;;  %s5558_s7 = smov 121  }
  0x3f   : > { %v4959_v9 = vpack.c.bf16 %v766_v6, %v758_v4  ;;  %v769_v13 = vld [vmem:[%s6774_s8] sm:$0xf]  ;;  %4952 = vmatprep.subr.bf16.mxu1 %v4951_v5  ;;  %v4961_v14 = vpack.c.bf16 %v765_v12, %v757_v11  ;;  %v760_v20 = vld [vmem:[%s5745_s30 + $0x38] sm:$0xff]  ;;  %v4957_v22 = vpack.c.bf16 %v763_v19, %v755_v17  ;;  %v759_v24 = vld [vmem:[%s5745_s30 + $0x30] sm:$0xff]  ;;  %s5538_s8 = smov 127  }
  0x40   : > { %4954 = vmatpush1.bf16.msra.mxu1 %v4953_v10  ;;  %v768_v21 = vld [vmem:[%s5745_s30 + $0x78] sm:$0xff]  ;;  %v767_v25 = vld [vmem:[%s5745_s30 + $0x70] sm:$0xff]  ;;  %v770_v26 = vld [vmem:[%s6775_s27] sm:$0xf]  ;;  %s5541_s27 = smov 64  }
  0x41   : > { %4960 = vmatprep.subr.bf16.mxu0 %v4959_v9  ;;  %v4963_v23 = vpack.c.bf16 %v768_v21, %v760_v20  ;;  %4956 = vmatprep.subr.bf16.mxu1 %v4955_v18  ;;  %v4965_v27 = vpack.c.bf16 %v767_v25, %v759_v24  ;;  %v1378_v28 = vld [vmem:[%s6776_s6] sm:$0xf]  ;;  %v1878_v3 = vld [vmem:[#allocation2 + $0x30] sm:$0xff]  ;;  %v1881_v5 = vld [vmem:[#allocation2 + $0x48] sm:$0xff]  ;;  %s5544_s6 = smov 62  }
  0x42   : > { %4962 = vmatpush1.bf16.msra.mxu0 %v4961_v14  ;;  %773 = vperm.xlu0 %5361, %v770_v26   ;;  %v1064_v44 = vld [vmem:[%s6777_s3] sm:$0xf]  ;;  %v4973_v4 = vpack.c.bf16 %v1878_v3, %v1876_v63  ;;  %v1883_v6 = vld [vmem:[#allocation2 + $0x58] sm:$0xff]  ;;  %v1882_v9 = vld [vmem:[#allocation2 + $0x50] sm:$0xff]  ;;  %s6778_s3 = sld [smem:[#allocation12_spill]] }
  0x43   : > { %4787 = vmatmul.mubr.msk.f32.vlgmr.msra.gmra.mrb[0].mxu1 %vm776_vm0, %v769_v13  ;;  %1453 = vperm.xlu1 %5363, %v1378_v28   ;;  %v1880_v7 = vld [vmem:[#allocation2 + $0x40] sm:$0xff]  ;;  %v4975_v8 = vpack.c.bf16 %v1883_v6, %v1881_v5  ;;  %v1885_v11 = vld [vmem:[#allocation2 + $0x68] sm:$0xff]  ;;  %v1887_v12 = vld [vmem:[#allocation2 + $0x78] sm:$0xff] }
  0x44   : > { %4958 = vmatpush1.bf16.msra.mxu1 %v4957_v22  ;;  %915 = vmatprep.mubr.f32.mxu1 %v5527_v0  ;;  %v4977_v10 = vpack.c.bf16 %v1882_v9, %v1880_v7  ;;  %v4979_v14 = vpack.c.bf16 %v1887_v12, %v1885_v11  ;;  %v1886_v15 = vld [vmem:[#allocation2 + $0x70] sm:$0xff]  ;;  %v1889_v17 = vld [vmem:[#allocation2 + $0x88] sm:$0xff]  ;;  %v1891_v18 = vld [vmem:[#allocation2 + $0x98] sm:$0xff] }
  0x45   : > { %4789 = vmatmul.mubr.msk.f32.vlgmr.msra.gmra.mrb[0].mxu0 %vm776_vm0, %v769_v13  ;;  %4964 = vmatprep.subr.bf16.mxu1 %v4963_v23  ;;  %v4983_v20 = vpack.c.bf16 %v1891_v18, %v1889_v17  ;;  %v1888_v21 = vld [vmem:[#allocation2 + $0x80] sm:$0xff]  ;;  %v1890_v22 = vld [vmem:[#allocation2 + $0x90] sm:$0xff]  ;;  %v1893_v24 = vld [vmem:[#allocation2 + $0xa8] sm:$0xff] }
  0x46   : > { %1158 = vmatprep.mubr.f32.mxu0 %v5527_v0  ;;  %5362 = vset.pattern.permute.xlu0 %v6748_v30  ;;  %v4985_v23 = vpack.c.bf16 %v1890_v22, %v1888_v21  ;;  %v1895_v25 = vld [vmem:[#allocation2 + $0xb8] sm:$0xff]  ;;  %v1905_v17 = vld [vmem:[#allocation2 + $0x108] sm:$0xff]  ;;  %v1904_v22 = vld [vmem:[#allocation2 + $0x100] sm:$0xff] }
  0x47   : > { %4788 = vmatmul.mubr.msk.f32.vlgmr.msra.gmra.mrb[2].mxu1 %vm776_vm0, %v769_v13  ;;  %1393 = vperm.xlu0 %5362, %v1378_v28   ;;  %v4987_v26 = vpack.c.bf16 %v1895_v25, %v1893_v24  ;;  %v1907_v18 = vld [vmem:[#allocation2 + $0x118] sm:$0xff] }
  0x48   : > { %4966 = vmatpush1.bf16.msra.mxu1 %v4965_v27  ;;  %1057 = vmatprep.mubr.f32.mxu1 %v5527_v0  ;;  %v1892_v27 = vld [vmem:[#allocation2 + $0xa0] sm:$0xff]  ;;  %v4999_v25 = vpack.c.bf16 %v1907_v18, %v1905_v17  ;;  %v1918_v18 = vld [vmem:[#allocation2 + $0x170] sm:$0xff] }
  0x49   : > { %5364 = vset.pattern.permute.xlu1 %v5531_v31  ;;  %v1916_v17 = vld [vmem:[#allocation2 + $0x160] sm:$0xff] }
  0x4a   : > { %1513 = vperm.xlu1 %5364, %v1378_v28  }
  0x4b   : > { %4790 = vmatmul.mubr.msk.f32.vlgmr.msra.gmra.mrb[4].mxu1 %vm776_vm0, %v769_v13  ;;  %5366 = vset.pattern.permute.xlu0 %v5532_v32  ;;  %v1884_v13 = vld [vmem:[#allocation2 + $0x60] sm:$0xff]  ;;  %vm2456_vm0 = vcmask 1006592  }
  0x4c   : > { %1229 = vmatprep.mubr.f32.mxu1 %v5527_v0  ;;  %1633 = vperm.xlu0 %5366, %v1378_v28   ;;  %v4981_v16 = vpack.c.bf16 %v1886_v15, %v1884_v13  ;;  %v1900_v15 = vld [vmem:[#allocation2 + $0xe0] sm:$0xff] }
  0x4e   : > { %5365 = vset.pattern.permute.xlu1 %v5533_v33 }
  0x4f   : > { %1573 = vperm.xlu1 %5365, %v1378_v28  }
  0x50   : > { %5369 = vset.pattern.permute.xlu0 %v6750_v34 }
  0x51   : > { %1813 = vperm.xlu0 %5369, %v1378_v28  }
  0x53   : > { %5367 = vset.pattern.permute.xlu1 %v6754_v35 }
  0x54   : > { %1693 = vperm.xlu1 %5367, %v1378_v28  }
  0x55   : > { %5371 = vset.pattern.permute.xlu0 %v6748_v30 }
  0x58   : > { %5368 = vset.pattern.permute.xlu1 %v5536_v36 }
  0x59   : > { %1753 = vperm.xlu1 %5368, %v1378_v28  }
  0x5d   : > { %5370 = vset.pattern.permute.xlu1 %v6752_v1 }
  0x5e   : > { %1381 = vperm.xlu1 %5370, %v1378_v28   ;;  %v1894_v28 = vld [vmem:[#allocation2 + $0xb0] sm:$0xff] }
  0xc1   : > { %v774_v37 = vpop.permute.xlu0 %773 }
  0xc2   : > { %v5831_v19 = vpop.permute.xlu1 %1453 }
 0x116   : > { %v846_v38 = vpop.f32.mrb[0].mxu1 }
 0x117   : > { %v848_v40 = vpop.f32.mrb[1].mxu1  ;;  %v5792_v43 = vadd.f32 %v846_v38, %v774_v37  ;;  %v4989_v38 = vpack.c.bf16 %v1894_v28, %v1892_v27  ;;  %v1911_v27 = vld [vmem:[#allocation2 + $0x138] sm:$0xff] }
 0x118   : > { %v988_v39 = vpop.f32.mrb[0].mxu0  ;;  %v5790_v41 = vadd.f32 %v848_v40, %v774_v37  ;;  %v1899_v40 = vld [vmem:[#allocation2 + $0xd8] sm:$0xff] }
 0x119   : > { %v990_v42 = vpop.f32.mrb[1].mxu0  ;;  %v5801_v47 = vadd.f32 %v988_v39, %v774_v37  ;;  %v1897_v39 = vld [vmem:[#allocation2 + $0xc8] sm:$0xff] }
 0x11a   : > { %v5797_v45 = vadd.f32 %v990_v42, %v774_v37  ;;  %v917_v46 = vpop.f32.mrb[2].mxu1  ;;  %4791 = vmatprep.subr.msk.mxu0 %vm1069_vm1, %v5790_v41  ;;  %v4991_v42 = vpack.c.bf16 %v1899_v40, %v1897_v39 }
 0x11b   : > { %v919_v48 = vpop.f32.mrb[3].mxu1  ;;  %4792 = vmatpush1.msk.msra.mxu0 %vm1069_vm1, %v5792_v43  ;;  %v5810_v50 = vadd.f32 %v917_v46, %v774_v37  ;;  %v1898_v46 = vld [vmem:[#allocation2 + $0xd0] sm:$0xff] }
 0x11c   : > { %v5805_v49 = vadd.f32 %v919_v48, %v774_v37  ;;  %4793 = vmatmul.mubr.msk.f32.vlgmr.msra.gmra.mrb[2].mxu0 %vm1065_vm2, %v1064_v44  ;;  %4797 = vmatprep.subr.msk.mxu0 %vm1069_vm1, %v5797_v45 }
 0x11d   : > { %4798 = vmatpush1.msk.msra.mxu0 %vm1069_vm1, %v5801_v47  ;;  %1300 = vmatprep.mubr.f32.mxu0 %v5527_v0 }
 0x11e   : > { %v1059_v51 = vpop.f32.mrb[4].mxu1  ;;  %4794 = vmatprep.subr.msk.mxu1 %vm1069_vm1, %v5805_v49  ;;  %4968 = vmatprep.subr.bf16.mxu0 %v4967_v58 }
 0x11f   : > { %v1061_v52 = vpop.f32.mrb[5].mxu1  ;;  %4795 = vmatpush1.msk.msra.mxu1 %vm1069_vm1, %v5810_v50  ;;  %v5823_v54 = vadd.f32 %v1059_v51, %v774_v37  ;;  %v5835_v51 = vpop.permute.xlu0 %1393 }
 0x120   : > { %v5819_v53 = vadd.f32 %v1061_v52, %v774_v37  ;;  %4796 = vmatmul.mubr.msk.f32.vlgmr.msra.gmra.mrb[6].mxu1 %vm1065_vm2, %v1064_v44  ;;  %4799 = vmatmul.mubr.msk.f32.vlgmr.msra.gmra.mrb[4].mxu0 %vm1065_vm2, %v1064_v44  ;;  %v5833_v37 = vpop.permute.xlu1 %1513  ;;  %v1901_v52 = vld [vmem:[#allocation2 + $0xe8] sm:$0xff] }
 0x121   : > { %1371 = vmatprep.mubr.f32.mxu1 %v5527_v0  ;;  %4970 = vmatpush1.bf16.msra.mxu0 %v4969_v60  ;;  %v4995_v58 = vpack.c.bf16 %v1903_v55, %v1901_v52  ;;  %v1915_v52 = vld [vmem:[#allocation2 + $0x158] sm:$0xff] }
 0x122   : > { %4800 = vmatprep.subr.msk.mxu1 %vm1069_vm1, %v5819_v53  ;;  %4972 = vmatprep.subr.bf16.mxu0 %v4971_v2 }
 0x123   : > { %4801 = vmatpush1.msk.msra.mxu1 %vm1069_vm1, %v5823_v54  ;;  %v5865_v7 = vpop.permute.xlu0 %1633 }
 0x124   : > { %4802 = vmatmul.mubr.msk.f32.vlgmr.msra.gmra.mrb[8].mxu1 %vm1065_vm2, %v1064_v44  ;;  %v1896_v44 = vld [vmem:[#allocation2 + $0xc0] sm:$0xff]  ;;  %v5837_v56 = vpop.permute.xlu1 %1573 }
 0x125   : > { %4974 = vmatpush1.bf16.msra.mxu0 %v4973_v4  ;;  %v4993_v48 = vpack.c.bf16 %v1898_v46, %v1896_v44  ;;  %v1910_v44 = vld [vmem:[#allocation2 + $0x130] sm:$0xff] }
 0x126   : > { %4976 = vmatprep.subr.bf16.mxu0 %v4975_v8 }
 0x127   : > { %v5895_v46 = vpop.permute.xlu0 %1813 }
 0x128   : > { %v5861_v6 = vpop.permute.xlu1 %1693 }
 0x129   : > { %4978 = vmatpush1.bf16.msra.mxu0 %v4977_v10 }
 0x12a   : > { %4980 = vmatprep.subr.bf16.mxu0 %v4979_v14 }
 0x12c   : > { %v5877_v12 = vpop.permute.xlu1 %1753 }
 0x12d   : > { %4982 = vmatpush1.bf16.msra.mxu0 %v4981_v16  ;;  %v1902_v16 = vld [vmem:[#allocation2 + $0xf0] sm:$0xff] }
 0x12e   : > { %4984 = vmatprep.subr.bf16.mxu0 %v4983_v20  ;;  %v4997_v24 = vpack.c.bf16 %v1902_v16, %v1900_v15 }
 0x131   : > { %4986 = vmatpush1.bf16.msra.mxu0 %v4985_v23  ;;  %v1906_v23 = vld [vmem:[#allocation2 + $0x110] sm:$0xff] }
 0x132   : > { %4988 = vmatprep.subr.bf16.mxu0 %v4987_v26  ;;  %v1909_v26 = vld [vmem:[#allocation2 + $0x128] sm:$0xff]  ;;  %v5001_v28 = vpack.c.bf16 %v1906_v23, %v1904_v22  ;;  %v5013_v22 = vpack.c.bf16 %v1918_v18, %v1916_v17 }
 0x133   : > { %v5003_v40 = vpack.c.bf16 %v1911_v27, %v1909_v26  ;;  %v1920_v26 = vld [vmem:[#allocation2 + $0x180] sm:$0xff]  ;;  %v1922_v27 = vld [vmem:[#allocation2 + $0x190] sm:$0xff] }
 0x135   : > { %4990 = vmatpush1.bf16.msra.mxu0 %v4989_v38 }
 0x136   : > { %4992 = vmatprep.subr.bf16.mxu0 %v4991_v42  ;;  %v1908_v42 = vld [vmem:[#allocation2 + $0x120] sm:$0xff] }
 0x137   : > { %v5005_v55 = vpack.c.bf16 %v1910_v44, %v1908_v42 }
 0x139   : > { %4994 = vmatpush1.bf16.msra.mxu0 %v4993_v48  ;;  %v1913_v48 = vld [vmem:[#allocation2 + $0x148] sm:$0xff] }
 0x13a   : > { %4996 = vmatprep.subr.bf16.mxu0 %v4995_v58 }
 0x13d   : > { %4998 = vmatpush1.bf16.msra.mxu0 %v4997_v24 }
 0x13e   : > { %5000 = vmatprep.subr.bf16.mxu0 %v4999_v25 }
 0x141   : > { %5002 = vmatpush1.bf16.msra.mxu0 %v5001_v28  ;;  %v1925_v28 = vld [vmem:[#allocation2 + $0x1a8] sm:$0xff] }
 0x142   : > { %5004 = vmatprep.subr.bf16.mxu0 %v5003_v40 }
 0x145   : > { %5006 = vmatpush1.bf16.msra.mxu0 %v5005_v55  ;;  %v1929_v55 = vld [vmem:[#allocation2 + $0x1c8] sm:$0xff] }
 0x1ef   : > { %v5839_v57 = vpop.f32.mrb[2].mxu0 }
 0x1f0   : > { %v5841_v59 = vpop.f32.mrb[3].mxu0  ;;  %v1456_v60 = vmul.f32 %v5831_v19, %v5839_v57  ;;  %v1396_v61 = vmul.f32 %v5835_v51, %v5839_v57  ;;  %v1576_v4 = vmul.f32 %v5837_v56, %v5839_v57  ;;  %v1516_v5 = vmul.f32 %v5833_v37, %v5839_v57 }
 0x1f1   : > { %v1696_v10 = vmul.f32 %v5861_v6, %v5839_v57  ;;  %v1636_v11 = vmul.f32 %v5865_v7, %v5839_v57  ;;  %v1756_v13 = vmul.f32 %v5877_v12, %v5839_v57  ;;  %v1457_v14 = vmul.f32 %v5831_v19, %v5841_v59 }
 0x1f2   : > { %1472 = vrot.lane.b32.xlu0 %v1456_v60, %s5537_s25  ;;  %1412 = vrot.lane.b32.xlu1 %v1396_v61, %s5538_s8  ;;  %v1577_v20 = vmul.f32 %v5837_v56, %v5841_v59  ;;  %v1397_v21 = vmul.f32 %v5835_v51, %v5841_v59  ;;  %v1697_v38 = vmul.f32 %v5861_v6, %v5841_v59 }
 0x1f3   : > { %v5849_v62 = vpop.f32.mrb[6].mxu1  ;;  %v5851_v63 = vpop.f32.mrb[4].mxu0  ;;  %v1517_v39 = vmul.f32 %v5833_v37, %v5841_v59  ;;  %v1817_v58 = vmul.f32 %v5895_v46, %v5841_v59  ;;  %v1637_v60 = vmul.f32 %v5865_v7, %v5841_v59  ;;  %v5007_v61 = vpack.c.bf16 %v1915_v52, %v1913_v48  ;;  %v1924_v48 = vld [vmem:[#allocation2 + $0x1a0] sm:$0xff]  ;;  %v1926_v52 = vld [vmem:[#allocation2 + $0x1b0] sm:$0xff] }
 0x1f4   : > { %v5853_v2 = vpop.f32.mrb[7].mxu1  ;;  %v5855_v3 = vpop.f32.mrb[5].mxu0  ;;  %v1757_v15 = vmul.f32 %v5877_v12, %v5841_v59  ;;  %v1518_v23 = vmul.f32 %v5833_v37, %v5849_v62  ;;  %v1458_v24 = vmul.f32 %v5831_v19, %v5849_v62  ;;  %v1638_v40 = vmul.f32 %v5865_v7, %v5849_v62 }
 0x1f5   : > { %5008 = vmatprep.subr.bf16.mxu0 %v5007_v61  ;;  %v1578_v42 = vmul.f32 %v5837_v56, %v5849_v62  ;;  %v1758_v61 = vmul.f32 %v5877_v12, %v5849_v62  ;;  %v1818_v17 = vmul.f32 %v5895_v46, %v5849_v62 }
 0x1f6   : > { %1592 = vrot.lane.b32.xlu0 %v1576_v4, %s5539_s4  ;;  %1532 = vrot.lane.b32.xlu1 %v1516_v5, %s5540_s1  ;;  %v1912_v4 = vld [vmem:[#allocation2 + $0x140] sm:$0xff]  ;;  %v1914_v5 = vld [vmem:[#allocation2 + $0x150] sm:$0xff] }
 0x1f7   : > { %v5867_v8 = vpop.f32.mrb[8].mxu1 }
 0x1f8   : > { %v5869_v9 = vpop.f32.mrb[9].mxu1 }
 0x1fa   : > { %1712 = vrot.lane.b32.xlu0 %v1696_v10, %s5541_s27  ;;  %1652 = vrot.lane.b32.xlu1 %v1636_v11, %s5542_s29  ;;  %v1917_v10 = vld [vmem:[#allocation2 + $0x168] sm:$0xff]  ;;  %v1919_v11 = vld [vmem:[#allocation2 + $0x178] sm:$0xff] }
 0x1fb   : > { %v5011_v16 = vpack.c.bf16 %v1919_v11, %v1917_v10  ;;  %v1928_v10 = vld [vmem:[#allocation2 + $0x1c0] sm:$0xff]  ;;  %v1930_v11 = vld [vmem:[#allocation2 + $0x1d0] sm:$0xff] }
 0x1fe   : > { %1772 = vrot.lane.b32.xlu1 %v1756_v13, %s5543_s0  ;;  %1474 = vrot.lane.b32.xlu0 %v1457_v14, %s5537_s25  ;;  %v5009_v13 = vpack.c.bf16 %v1914_v5, %v1912_v4  ;;  %v1398_v14 = vmul.f32 %v5835_v51, %v5849_v62  ;;  %v1698_v4 = vmul.f32 %v5861_v6, %v5849_v62 }
 0x200   : > { %5010 = vmatpush1.bf16.msra.mxu0 %v5009_v13  ;;  %v1933_v13 = vld [vmem:[#allocation2 + $0x1e8] sm:$0xff] }
 0x201   : > { %5012 = vmatprep.subr.bf16.mxu0 %v5011_v16  ;;  %v1816_v16 = vmul.f32 %v5895_v46, %v5839_v57 }
 0x202   : > { %1594 = vrot.lane.b32.xlu0 %v1577_v20, %s5539_s4  ;;  %1414 = vrot.lane.b32.xlu1 %v1397_v21, %s5538_s8  ;;  %v1921_v20 = vld [vmem:[#allocation2 + $0x188] sm:$0xff]  ;;  %v1923_v21 = vld [vmem:[#allocation2 + $0x198] sm:$0xff] }
 0x203   : > { %v5015_v25 = vpack.c.bf16 %v1923_v21, %v1921_v20  ;;  %v1932_v20 = vld [vmem:[#allocation2 + $0x1e0] sm:$0xff]  ;;  %v1934_v21 = vld [vmem:[#allocation2 + $0x1f0] sm:$0xff] }
 0x204   : > { %5014 = vmatpush1.bf16.msra.mxu0 %v5013_v22  ;;  %v1937_v22 = vld [vmem:[#allocation2 + $0x208] sm:$0xff] }
 0x205   : > { %5016 = vmatprep.subr.bf16.mxu0 %v5015_v25  ;;  %v1399_v25 = vmul.f32 %v5835_v51, %v5853_v2 }
 0x206   : > { %1714 = vrot.lane.b32.xlu0 %v1697_v38, %s5541_s27  ;;  %1534 = vrot.lane.b32.xlu1 %v1517_v39, %s5540_s1  ;;  %v1927_v38 = vld [vmem:[#allocation2 + $0x1b8] sm:$0xff]  ;;  %v5017_v39 = vpack.c.bf16 %v1922_v27, %v1920_v26  ;;  %v1400_v26 = vmul.f32 %v5835_v51, %v5851_v63 }
 0x207   : > { %v5019_v44 = vpack.c.bf16 %v1927_v38, %v1925_v28  ;;  %v1459_v28 = vmul.f32 %v5831_v19, %v5853_v2  ;;  %v1460_v38 = vmul.f32 %v5831_v19, %v5851_v63 }
 0x208   : > { %5018 = vmatpush1.bf16.msra.mxu0 %v5017_v39  ;;  %v1519_v39 = vmul.f32 %v5833_v37, %v5853_v2 }
 0x209   : > { %5020 = vmatprep.subr.bf16.mxu0 %v5019_v44  ;;  %v1580_v44 = vmul.f32 %v5837_v56, %v5851_v63 }
 0x20a   : > { %1834 = vrot.lane.b32.xlu0 %v1817_v58, %s5544_s6  ;;  %1654 = vrot.lane.b32.xlu1 %v1637_v60, %s5542_s29  ;;  %v1931_v58 = vld [vmem:[#allocation2 + $0x1d8] sm:$0xff]  ;;  %v5021_v60 = vpack.c.bf16 %v1926_v52, %v1924_v48  ;;  %v1639_v48 = vmul.f32 %v5865_v7, %v5853_v2  ;;  %v1640_v52 = vmul.f32 %v5865_v7, %v5851_v63 }
 0x20b   : > { %v5023_v5 = vpack.c.bf16 %v1931_v58, %v1929_v55  ;;  %v1699_v55 = vmul.f32 %v5861_v6, %v5853_v2  ;;  %v1700_v58 = vmul.f32 %v5861_v6, %v5851_v63 }
 0x20c   : > { %5022 = vmatpush1.bf16.msra.mxu0 %v5021_v60  ;;  %v2065_v60 = vld [vmem:[#allocation2 + $0x608] sm:$0xff] }
 0x20d   : > { %5024 = vmatprep.subr.bf16.mxu0 %v5023_v5  ;;  %v2066_v5 = vld [vmem:[#allocation2 + $0x610] sm:$0xff] }
 0x20e   : > { %1416 = vrot.lane.b32.xlu0 %v1398_v14, %s5538_s8  ;;  %1774 = vrot.lane.b32.xlu1 %v1757_v15, %s5543_s0  ;;  %v1935_v14 = vld [vmem:[#allocation2 + $0x1f8] sm:$0xff]  ;;  %v5025_v15 = vpack.c.bf16 %v1930_v11, %v1928_v10  ;;  %v1759_v10 = vmul.f32 %v5877_v12, %v5853_v2  ;;  %v1760_v11 = vmul.f32 %v5877_v12, %v5851_v63 }
 0x20f   : > { %v5027_v18 = vpack.c.bf16 %v1935_v14, %v1933_v13 }
 0x210   : > { %5026 = vmatpush1.bf16.msra.mxu0 %v5025_v15  ;;  %v2069_v15 = vld [vmem:[#allocation2 + $0x628] sm:$0xff] }
 0x211   : > { %5028 = vmatprep.subr.bf16.mxu0 %v5027_v18  ;;  %v2070_v18 = vld [vmem:[#allocation2 + $0x630] sm:$0xff] }
 0x212   : > { %1536 = vrot.lane.b32.xlu0 %v1518_v23, %s5540_s1  ;;  %1476 = vrot.lane.b32.xlu1 %v1458_v24, %s5537_s25  ;;  %v1939_v23 = vld [vmem:[#allocation2 + $0x218] sm:$0xff]  ;;  %v5029_v24 = vpack.c.bf16 %v1934_v21, %v1932_v20  ;;  %v1819_v20 = vmul.f32 %v5895_v46, %v5853_v2  ;;  %v1820_v21 = vmul.f32 %v5895_v46, %v5851_v63 }
 0x213   : > { %v5031_v27 = vpack.c.bf16 %v1939_v23, %v1937_v22 }
 0x214   : > { %5030 = vmatpush1.bf16.msra.mxu0 %v5029_v24  ;;  %v2073_v24 = vld [vmem:[#allocation2 + $0x648] sm:$0xff] }
 0x215   : > { %5032 = vmatprep.subr.bf16.mxu0 %v5031_v27  ;;  %v2074_v27 = vld [vmem:[#allocation2 + $0x650] sm:$0xff] }
 0x216   : > { %1656 = vrot.lane.b32.xlu0 %v1638_v40, %s5542_s29  ;;  %1596 = vrot.lane.b32.xlu1 %v1578_v42, %s5539_s4  ;;  %v1520_v40 = vmul.f32 %v5833_v37, %v5851_v63  ;;  %v1579_v42 = vmul.f32 %v5837_v56, %v5853_v2 }
 0x21a   : > { %1776 = vrot.lane.b32.xlu0 %v1758_v61, %s5543_s0  ;;  %1716 = vrot.lane.b32.xlu1 %v1698_v4, %s5541_s27  ;;  %v2067_v61 = vld [vmem:[#allocation2 + $0x618] sm:$0xff]  ;;  %v2064_v4 = vld [vmem:[#allocation2 + $0x600] sm:$0xff] }
 0x21b   : > { %v5159_v13 = vpack.c.bf16 %v2067_v61, %v2065_v60  ;;  %v5161_v14 = vpack.c.bf16 %v2066_v5, %v2064_v4  ;;  %v2081_v4 = vld [vmem:[#allocation2 + $0x688] sm:$0xff]  ;;  %v2083_v5 = vld [vmem:[#allocation2 + $0x698] sm:$0xff] }
 0x21d   : > { %5160 = vmatprep.subr.bf16.mxu1 %v5159_v13  ;;  %v1761_v13 = vmul.f32 %v5877_v12, %v5855_v3 }
 0x21e   : > { %1832 = vrot.lane.b32.xlu0 %v1816_v16, %s5544_s6  ;;  %1836 = vrot.lane.b32.xlu1 %v1818_v17, %s5544_s6  ;;  %v2071_v16 = vld [vmem:[#allocation2 + $0x638] sm:$0xff]  ;;  %v2068_v17 = vld [vmem:[#allocation2 + $0x620] sm:$0xff] }
 0x21f   : > { %5162 = vmatpush1.bf16.msra.mxu1 %v5161_v14  ;;  %v5163_v22 = vpack.c.bf16 %v2071_v16, %v2069_v15  ;;  %v5165_v23 = vpack.c.bf16 %v2070_v18, %v2068_v17  ;;  %v1581_v14 = vmul.f32 %v5837_v56, %v5855_v3  ;;  %v5175_v15 = vpack.c.bf16 %v2083_v5, %v2081_v4  ;;  %v2085_v17 = vld [vmem:[#allocation2 + $0x6a8] sm:$0xff]  ;;  %v2087_v18 = vld [vmem:[#allocation2 + $0x6b8] sm:$0xff] }
 0x221   : > { %5164 = vmatprep.subr.bf16.mxu1 %v5163_v22  ;;  %v1402_v22 = vmul.f32 %v5835_v51, %v5867_v8 }
 0x222   : > { %1418 = vrot.lane.b32.xlu1 %v1399_v25, %s5538_s8  ;;  %1420 = vrot.lane.b32.xlu0 %v1400_v26, %s5538_s8  ;;  %v2075_v25 = vld [vmem:[#allocation2 + $0x658] sm:$0xff]  ;;  %v2072_v26 = vld [vmem:[#allocation2 + $0x640] sm:$0xff] }
 0x223   : > { %5166 = vmatpush1.bf16.msra.mxu1 %v5165_v23  ;;  %v1701_v23 = vmul.f32 %v5861_v6, %v5855_v3 }
 0x226   : > { %1478 = vrot.lane.b32.xlu1 %v1459_v28, %s5537_s25  ;;  %1480 = vrot.lane.b32.xlu0 %v1460_v38, %s5537_s25  ;;  %v1521_v28 = vmul.f32 %v5833_v37, %v5855_v3  ;;  %v1401_v38 = vmul.f32 %v5835_v51, %v5855_v3 }
 0x22a   : > { %1538 = vrot.lane.b32.xlu1 %v1519_v39, %s5540_s1  ;;  %1540 = vrot.lane.b32.xlu0 %v1520_v40, %s5540_s1  ;;  %v5167_v39 = vpack.c.bf16 %v2075_v25, %v2073_v24  ;;  %v5169_v40 = vpack.c.bf16 %v2074_v27, %v2072_v26  ;;  %v5179_v24 = vpack.c.bf16 %v2087_v18, %v2085_v17  ;;  %v2089_v26 = vld [vmem:[#allocation2 + $0x6c8] sm:$0xff]  ;;  %v2091_v27 = vld [vmem:[#allocation2 + $0x6d8] sm:$0xff] }
 0x22c   : > { %5168 = vmatprep.subr.bf16.mxu1 %v5167_v39  ;;  %v1462_v39 = vmul.f32 %v5831_v19, %v5867_v8 }
 0x22d   : > { %5170 = vmatpush1.bf16.msra.mxu1 %v5169_v40  ;;  %v1821_v40 = vmul.f32 %v5895_v46, %v5855_v3 }
 0x22e   : > { %1598 = vrot.lane.b32.xlu1 %v1579_v42, %s5539_s4  ;;  %1600 = vrot.lane.b32.xlu0 %v1580_v44, %s5539_s4  ;;  %v2077_v42 = vld [vmem:[#allocation2 + $0x668] sm:$0xff]  ;;  %v2079_v44 = vld [vmem:[#allocation2 + $0x678] sm:$0xff] }
 0x22f   : > { %v5171_v60 = vpack.c.bf16 %v2079_v44, %v2077_v42  ;;  %v5183_v42 = vpack.c.bf16 %v2091_v27, %v2089_v26 }
 0x231   : > { %5172 = vmatprep.subr.bf16.mxu1 %v5171_v60  ;;  %v1582_v60 = vmul.f32 %v5837_v56, %v5867_v8 }
 0x232   : > { %1658 = vrot.lane.b32.xlu1 %v1639_v48, %s5542_s29  ;;  %1660 = vrot.lane.b32.xlu0 %v1640_v52, %s5542_s29  ;;  %v2076_v48 = vld [vmem:[#allocation2 + $0x660] sm:$0xff]  ;;  %v2078_v52 = vld [vmem:[#allocation2 + $0x670] sm:$0xff] }
 0x233   : > { %v5173_v61 = vpack.c.bf16 %v2078_v52, %v2076_v48  ;;  %v2093_v48 = vld [vmem:[#allocation2 + $0x6e8] sm:$0xff]  ;;  %v2095_v52 = vld [vmem:[#allocation2 + $0x6f8] sm:$0xff] }
 0x234   : > { %v5187_v4 = vpack.c.bf16 %v2095_v52, %v2093_v48  ;;  %v1403_v48 = vmul.f32 %v5835_v51, %v5869_v9  ;;  %v2111_v51 = vld [vmem:[#allocation2 + $0x778] sm:$0x3f] }
 0x235   : > { %5174 = vmatpush1.bf16.msra.mxu1 %v5173_v61  ;;  %v1522_v61 = vmul.f32 %v5833_v37, %v5867_v8 }
 0x236   : > { %1718 = vrot.lane.b32.xlu1 %v1699_v55, %s5541_s27  ;;  %1720 = vrot.lane.b32.xlu0 %v1700_v58, %s5541_s27  ;;  %v1641_v55 = vmul.f32 %v5865_v7, %v5855_v3  ;;  %v1461_v58 = vmul.f32 %v5831_v19, %v5855_v3 }
 0x237   : > { %5176 = vmatprep.subr.bf16.mxu1 %v5175_v15  ;;  %v1702_v15 = vmul.f32 %v5861_v6, %v5867_v8 }
 0x23a   : > { %1778 = vrot.lane.b32.xlu1 %v1759_v10, %s5543_s0  ;;  %1780 = vrot.lane.b32.xlu0 %v1760_v11, %s5543_s0  ;;  %v2080_v10 = vld [vmem:[#allocation2 + $0x680] sm:$0xff]  ;;  %v2082_v11 = vld [vmem:[#allocation2 + $0x690] sm:$0xff] }
 0x23b   : > { %v5177_v16 = vpack.c.bf16 %v2082_v11, %v2080_v10  ;;  %v2097_v10 = vld [vmem:[#allocation2 + $0x708] sm:$0xff]  ;;  %v2099_v11 = vld [vmem:[#allocation2 + $0x718] sm:$0xff] }
 0x23c   : > { %v5191_v17 = vpack.c.bf16 %v2099_v11, %v2097_v10  ;;  %v2110_v11 = vld [vmem:[#allocation2 + $0x770] sm:$0x3f] }
 0x23d   : > { %5178 = vmatpush1.bf16.msra.mxu1 %v5177_v16  ;;  %v1642_v16 = vmul.f32 %v5865_v7, %v5867_v8 }
 0x23e   : > { %1838 = vrot.lane.b32.xlu1 %v1819_v20, %s5544_s6  ;;  %1840 = vrot.lane.b32.xlu0 %v1820_v21, %s5544_s6  ;;  %v2084_v20 = vld [vmem:[#allocation2 + $0x6a0] sm:$0xff]  ;;  %v2086_v21 = vld [vmem:[#allocation2 + $0x6b0] sm:$0xff] }
 0x23f   : > { %v5181_v25 = vpack.c.bf16 %v2086_v21, %v2084_v20  ;;  %5180 = vmatprep.subr.bf16.mxu1 %v5179_v24  ;;  %v2101_v20 = vld [vmem:[#allocation2 + $0x728] sm:$0xff]  ;;  %v2103_v21 = vld [vmem:[#allocation2 + $0x738] sm:$0xff]  ;;  %v1822_v24 = vmul.f32 %v5895_v46, %v5867_v8 }
 0x240   : > { %v5195_v26 = vpack.c.bf16 %v2103_v21, %v2101_v20  ;;  %v1763_v20 = vmul.f32 %v5877_v12, %v5869_v9 }
 0x241   : > { %5182 = vmatpush1.bf16.msra.mxu1 %v5181_v25  ;;  %v1762_v25 = vmul.f32 %v5877_v12, %v5867_v8 }
 0x242   : > { %1542 = vrot.lane.b32.xlu0 %v1521_v28, %s5540_s1  ;;  %1422 = vrot.lane.b32.xlu1 %v1401_v38, %s5538_s8  ;;  %v2088_v28 = vld [vmem:[#allocation2 + $0x6c0] sm:$0xff]  ;;  %v2090_v38 = vld [vmem:[#allocation2 + $0x6d0] sm:$0xff] }
 0x243   : > { %v5185_v44 = vpack.c.bf16 %v2090_v38, %v2088_v28  ;;  %5184 = vmatprep.subr.bf16.mxu1 %v5183_v42  ;;  %v2105_v28 = vld [vmem:[#allocation2 + $0x748] sm:$0xff]  ;;  %v2107_v38 = vld [vmem:[#allocation2 + $0x758] sm:$0xff]  ;;  %v6031_v42 = vpop.permute.xlu1 %1381 }
 0x244   : > { %v5199_v52 = vpack.c.bf16 %v2107_v38, %v2105_v28 }
 0x245   : > { %5186 = vmatpush1.bf16.msra.mxu1 %v5185_v44  ;;  %v1463_v44 = vmul.f32 %v5831_v19, %v5869_v9  ;;  %v2109_v19 = vld [vmem:[#allocation2 + $0x768] sm:$0xff] }
 0x246   : > { %1662 = vrot.lane.b32.xlu0 %v1641_v55, %s5542_s29  ;;  %1482 = vrot.lane.b32.xlu1 %v1461_v58, %s5537_s25  ;;  %v2092_v55 = vld [vmem:[#allocation2 + $0x6e0] sm:$0xff]  ;;  %v2094_v58 = vld [vmem:[#allocation2 + $0x6f0] sm:$0xff]  ;;  %v5203_v10 = vpack.c.bf16 %v2111_v51, %v2109_v19 }
 0x247   : > { %v5189_v5 = vpack.c.bf16 %v2094_v58, %v2092_v55  ;;  %5188 = vmatprep.subr.bf16.mxu1 %v5187_v4  ;;  %v1523_v4 = vmul.f32 %v5833_v37, %v5869_v9  ;;  %v1703_v37 = vmul.f32 %v5861_v6, %v5869_v9  ;;  %v2112_v6 = vld [vmem:[%s6778_s3] sm:$0xf]  ;;  %s5552_s3 = smov 98  }
 0x249   : > { %5190 = vmatpush1.bf16.msra.mxu1 %v5189_v5  ;;  %v2108_v5 = vld [vmem:[#allocation2 + $0x760] sm:$0xff] }
 0x24a   : > { %1782 = vrot.lane.b32.xlu0 %v1761_v13, %s5543_s0  ;;  %1602 = vrot.lane.b32.xlu1 %v1581_v14, %s5539_s4  ;;  %v2096_v13 = vld [vmem:[#allocation2 + $0x700] sm:$0xff]  ;;  %v2098_v14 = vld [vmem:[#allocation2 + $0x710] sm:$0xff] }
 0x24b   : > { %v5193_v18 = vpack.c.bf16 %v2098_v14, %v2096_v13  ;;  %5192 = vmatprep.subr.bf16.mxu1 %v5191_v17  ;;  %v5206_v13 = vpack.c.bf16 %v2110_v11, %v2108_v5 }
 0x24d   : > { %5194 = vmatpush1.bf16.msra.mxu1 %v5193_v18  ;;  %v1823_v18 = vmul.f32 %v5895_v46, %v5869_v9  ;;  %v1384_v46 = vmul.f32 %v6031_v42, %v5839_v57 }
 0x24e   : > { %1424 = vrot.lane.b32.xlu0 %v1402_v22, %s5538_s8  ;;  %1722 = vrot.lane.b32.xlu1 %v1701_v23, %s5541_s27  ;;  %v2100_v22 = vld [vmem:[#allocation2 + $0x720] sm:$0xff]  ;;  %v2102_v23 = vld [vmem:[#allocation2 + $0x730] sm:$0xff] }
 0x24f   : > { %v5197_v27 = vpack.c.bf16 %v2102_v23, %v2100_v22  ;;  %5196 = vmatprep.subr.bf16.mxu1 %v5195_v26 }
 0x251   : > { %5198 = vmatpush1.bf16.msra.mxu1 %v5197_v27 }
 0x252   : > { %1484 = vrot.lane.b32.xlu0 %v1462_v39, %s5537_s25  ;;  %1842 = vrot.lane.b32.xlu1 %v1821_v40, %s5544_s6  ;;  %v2104_v39 = vld [vmem:[#allocation2 + $0x740] sm:$0xff]  ;;  %v2106_v40 = vld [vmem:[#allocation2 + $0x750] sm:$0xff] }
 0x253   : > { %v5201_v55 = vpack.c.bf16 %v2106_v40, %v2104_v39  ;;  %5200 = vmatprep.subr.bf16.mxu1 %v5199_v52 }
 0x255   : > { %5202 = vmatpush1.bf16.msra.mxu1 %v5201_v55  ;;  %v1385_v55 = vmul.f32 %v6031_v42, %v5841_v59 }
 0x256   : > { %1604 = vrot.lane.b32.xlu0 %v1582_v60, %s5539_s4  ;;  %1544 = vrot.lane.b32.xlu1 %v1522_v61, %s5540_s1  ;;  %v1583_v61 = vmul.f32 %v5837_v56, %v5869_v9 }
 0x257   : > { %5205 = vmatprep.subr.msk.bf16.mxu1 %vm5204_vm5, %v5203_v10 }
 0x259   : > { %5208 = vmatpush1.bf16.msk.msra.mxu1 %vm5204_vm5, %v5206_v13  ;;  %vm2555_vm5 = vcmask 1040384  }
 0x25a   : > { %1724 = vrot.lane.b32.xlu0 %v1702_v15, %s5541_s27  ;;  %1664 = vrot.lane.b32.xlu1 %v1642_v16, %s5542_s29  ;;  %v1643_v15 = vmul.f32 %v5865_v7, %v5869_v9 }
 0x25e   : > { %1844 = vrot.lane.b32.xlu0 %v1822_v24, %s5544_s6  ;;  %1784 = vrot.lane.b32.xlu1 %v1762_v25, %s5543_s0 }
 0x262   : > { %1486 = vrot.lane.b32.xlu0 %v1463_v44, %s5537_s25  ;;  %1426 = vrot.lane.b32.xlu1 %v1403_v48, %s5538_s8 }
 0x264   : > { %v1473_v58 = vpop.permute.xlu0 %1472  ;;  %v1413_v60 = vpop.permute.xlu1 %1412 }
 0x266   : > { %1606 = vrot.lane.b32.xlu0 %v1583_v61, %s5539_s4  ;;  %1546 = vrot.lane.b32.xlu1 %v1523_v4, %s5540_s1  ;;  %s5546_s4 = smov 125   ;;  %s5547_s1 = smov 124  }
 0x268   : > { %v1593_v14 = vpop.permute.xlu0 %1592  ;;  %v1533_v56 = vpop.permute.xlu1 %1532 }
 0x26a   : > { %1726 = vrot.lane.b32.xlu0 %v1703_v37, %s5541_s27  ;;  %1666 = vrot.lane.b32.xlu1 %v1643_v15, %s5542_s29  ;;  %s5548_s27 = smov 123   ;;  %s6757_s29 = smov 122  }
 0x26c   : > { %v1713_v16 = vpop.permute.xlu0 %1712  ;;  %v1653_v17 = vpop.permute.xlu1 %1652 }
 0x26e   : > { %1846 = vrot.lane.b32.xlu0 %v1823_v18, %s5544_s6  ;;  %1786 = vrot.lane.b32.xlu1 %v1763_v20, %s5543_s0  ;;  %s5551_s0 = smov 113   ;;  %s5553_s6 = smov 83  }
 0x270   : > { %v1773_v7 = vpop.permute.xlu1 %1772  ;;  %v1475_v21 = vpop.permute.xlu0 %1474 }
 0x271   : > { %v1489_v27 = vsel %vm1488_vm7, %v1473_v58, %v1475_v21 }
 0x272   : > { %2115 = vperm.xlu1 %5370, %v2112_v6  }
 0x274   : > { %v1595_v22 = vpop.permute.xlu0 %1594  ;;  %v1415_v23 = vpop.permute.xlu1 %1414 }
 0x275   : > { %v1429_v24 = vsel %vm1428_vm6, %v1413_v60, %v1415_v23  ;;  %v1609_v60 = vsel %vm1608_vm9, %v1593_v14, %v1595_v22 }
 0x276   : > { %5372 = vset.pattern.permute.xlu1 %v6746_v29  ;;  %v1444_v12 = vadd.f32 %v1429_v24, %v1384_v46 }
 0x278   : > { %v1715_v25 = vpop.permute.xlu0 %1714  ;;  %v1535_v26 = vpop.permute.xlu1 %1534  ;;  %v1504_v28 = vadd.f32 %v1489_v27, %v1444_v12 }
 0x279   : > { %v1549_v40 = vsel %vm1548_vm8, %v1533_v56, %v1535_v26 }
 0x27a   : > { %v1564_v44 = vadd.f32 %v1549_v40, %v1504_v28 }
 0x27c   : > { %v1835_v38 = vpop.permute.xlu0 %1834  ;;  %v1655_v39 = vpop.permute.xlu1 %1654  ;;  %v1624_v58 = vadd.f32 %v1609_v60, %v1564_v44  ;;  %v1941_v44 = vld [vmem:[#allocation2 + $0x228] sm:$0xff] }
 0x27d   : > { %v1669_v51 = vsel %vm1668_vm10, %v1653_v17, %v1655_v39  ;;  %v1729_v17 = vsel %vm1728_vm11, %v1713_v16, %v1715_v25  ;;  %v1936_v16 = vld [vmem:[#allocation2 + $0x200] sm:$0xff] }
 0x27e   : > { %v1684_v13 = vadd.f32 %v1669_v51, %v1624_v58  ;;  %v1940_v51 = vld [vmem:[#allocation2 + $0x220] sm:$0xff] }
 0x280   : > { %v6067_v48 = vpop.permute.xlu0 %1416  ;;  %v1775_v52 = vpop.permute.xlu1 %1774  ;;  %v1744_v20 = vadd.f32 %v1729_v17, %v1684_v13  ;;  %v1947_v13 = vld [vmem:[#allocation2 + $0x258] sm:$0xff] }
 0x281   : > { %v1430_v57 = vsel %vm1428_vm6, %v1415_v23, %v6067_v48  ;;  %v1789_v24 = vsel %vm1788_vm12, %v1773_v7, %v1775_v52 }
 0x282   : > { %v1445_v61 = vadd.f32 %v1430_v57, %v1385_v55  ;;  %v1804_v27 = vadd.f32 %v1789_v24, %v1744_v20  ;;  %v1943_v57 = vld [vmem:[#allocation2 + $0x238] sm:$0xff]  ;;  %v1949_v20 = vld [vmem:[#allocation2 + $0x268] sm:$0xff] }
 0x284   : > { %v6074_v4 = vpop.permute.xlu0 %1536  ;;  %v6076_v19 = vpop.permute.xlu1 %1476 }
 0x285   : > { %v1490_v5 = vsel %vm1488_vm7, %v1475_v21, %v6076_v19  ;;  %v1550_v11 = vsel %vm1548_vm8, %v1535_v26, %v6074_v4  ;;  %v1938_v26 = vld [vmem:[#allocation2 + $0x210] sm:$0xff] }
 0x286   : > { %v1505_v10 = vadd.f32 %v1490_v5, %v1445_v61  ;;  %v5033_v58 = vpack.c.bf16 %v1938_v26, %v1936_v16  ;;  %v5035_v61 = vpack.c.bf16 %v1943_v57, %v1941_v44  ;;  %v1952_v57 = vld [vmem:[#allocation2 + $0x280] sm:$0xff] }
 0x288   : > { %v6083_v59 = vpop.permute.xlu0 %1656  ;;  %v6085_v14 = vpop.permute.xlu1 %1596  ;;  %v1565_v56 = vadd.f32 %v1550_v11, %v1505_v10  ;;  %v1945_v11 = vld [vmem:[#allocation2 + $0x248] sm:$0xff] }
 0x289   : > { %v1610_v37 = vsel %vm1608_vm9, %v1595_v22, %v6085_v14  ;;  %v1670_v18 = vsel %vm1668_vm10, %v1655_v39, %v6083_v59 }
 0x28a   : > { %v1625_v15 = vadd.f32 %v1610_v37, %v1565_v56  ;;  %v5039_v37 = vpack.c.bf16 %v1947_v13, %v1945_v11 }
 0x28c   : > { %v6092_v6 = vpop.permute.xlu0 %1776  ;;  %v6094_v21 = vpop.permute.xlu1 %1716  ;;  %v1685_v23 = vadd.f32 %v1670_v18, %v1625_v15  ;;  %v1944_v15 = vld [vmem:[#allocation2 + $0x240] sm:$0xff] }
 0x28d   : > { %v1730_v46 = vsel %vm1728_vm11, %v1715_v25, %v6094_v21  ;;  %v1790_v22 = vsel %vm1788_vm12, %v1775_v52, %v6092_v6  ;;  %v1942_v52 = vld [vmem:[#allocation2 + $0x230] sm:$0xff] }
 0x28e   : > { %v1745_v12 = vadd.f32 %v1730_v46, %v1685_v23  ;;  %v5037_v56 = vpack.c.bf16 %v1942_v52, %v1940_v51  ;;  %v1951_v23 = vld [vmem:[#allocation2 + $0x278] sm:$0xff]  ;;  %v1387_v51 = vmul.f32 %v6031_v42, %v5853_v2 }
 0x28f   : > { %v5043_v46 = vpack.c.bf16 %v1951_v23, %v1949_v20  ;;  %v1961_v23 = vld [vmem:[#allocation2 + $0x2c8] sm:$0xff] }
 0x290   : > { %v1833_v28 = vpop.permute.xlu0 %1832  ;;  %v6101_v39 = vpop.permute.xlu1 %1836  ;;  %v1805_v40 = vadd.f32 %v1790_v22, %v1745_v12  ;;  %v1948_v12 = vld [vmem:[#allocation2 + $0x260] sm:$0xff]  ;;  %v1950_v22 = vld [vmem:[#allocation2 + $0x270] sm:$0xff] }
 0x291   : > { %v1849_v55 = vsel %vm1848_vm13, %v1833_v28, %v1835_v38  ;;  %v1850_v7 = vsel %vm1848_vm13, %v1835_v38, %v6101_v39  ;;  %v1946_v38 = vld [vmem:[#allocation2 + $0x250] sm:$0xff]  ;;  %v1955_v28 = vld [vmem:[#allocation2 + $0x298] sm:$0xff] }
 0x292   : > { %v1864_v25 = vadd.f32 %v1849_v55, %v1804_v27  ;;  %v1865_v60 = vadd.f32 %v1850_v7, %v1805_v40  ;;  %v5041_v24 = vpack.c.bf16 %v1946_v38, %v1944_v15  ;;  %v1953_v27 = vld [vmem:[#allocation2 + $0x288] sm:$0xff]  ;;  %v5045_v40 = vpack.c.bf16 %v1950_v22, %v1948_v12  ;;  %v1954_v55 = vld [vmem:[#allocation2 + $0x290] sm:$0xff] }
 0x293   : > { %v5047_v44 = vpack.c.bf16 %v1955_v28, %v1953_v27  ;;  %v5049_v52 = vpack.c.bf16 %v1954_v55, %v1952_v57  ;;  %v1960_v28 = vld [vmem:[#allocation2 + $0x2c0] sm:$0xff] }
 0x294   : > { %v6106_v5 = vpop.permute.xlu1 %1418  ;;  %2192 = vmatprep.mubr.f32.mxu0 %v1865_v60  ;;  %v6108_v10 = vpop.permute.xlu0 %1420  ;;  %v1957_v60 = vld [vmem:[#allocation2 + $0x2a8] sm:$0xff] }
 0x295   : > { %2193 = vmatmul.mubr.f32.vlgmr.msra.gmra.mrb[6].mxu0 %v1864_v25 }
 0x296   : > { %5034 = vmatpush1.bf16.msra.mxu0 %v5033_v58  ;;  %v1959_v58 = vld [vmem:[#allocation2 + $0x2b8] sm:$0xff] }
 0x297   : > { %5036 = vmatprep.subr.bf16.mxu0 %v5035_v61  ;;  %v1432_v61 = vsel %vm1428_vm6, %v6106_v5, %v6108_v10  ;;  %v5051_v13 = vpack.c.bf16 %v1959_v58, %v1957_v60  ;;  %v1965_v60 = vld [vmem:[#allocation2 + $0x2e8] sm:$0xff]  ;;  %v1967_v58 = vld [vmem:[#allocation2 + $0x2f8] sm:$0xff] }
 0x298   : > { %v6110_v17 = vpop.permute.xlu1 %1478  ;;  %v6112_v18 = vpop.permute.xlu0 %1480  ;;  %v1447_v15 = vadd.f32 %v1432_v61, %v1387_v51 }
 0x299   : > { %v1492_v11 = vsel %vm1488_vm7, %v6110_v17, %v6112_v18 }
 0x29a   : > { %5038 = vmatpush1.bf16.msra.mxu0 %v5037_v56  ;;  %v1956_v56 = vld [vmem:[#allocation2 + $0x2a0] sm:$0xff] }
 0x29b   : > { %5040 = vmatprep.subr.bf16.mxu0 %v5039_v37  ;;  %v1958_v37 = vld [vmem:[#allocation2 + $0x2b0] sm:$0xff] }
 0x29c   : > { %v6114_v16 = vpop.permute.xlu1 %1538  ;;  %v6116_v26 = vpop.permute.xlu0 %1540  ;;  %v5053_v12 = vpack.c.bf16 %v1958_v37, %v1956_v56  ;;  %v1964_v56 = vld [vmem:[#allocation2 + $0x2e0] sm:$0xff]  ;;  %v1966_v37 = vld [vmem:[#allocation2 + $0x2f0] sm:$0xff] }
 0x29d   : > { %v1552_v2 = vsel %vm1548_vm8, %v6114_v16, %v6116_v26 }
 0x29e   : > { %5042 = vmatpush1.bf16.msra.mxu0 %v5041_v24  ;;  %v1963_v24 = vld [vmem:[#allocation2 + $0x2d8] sm:$0xff] }
 0x29f   : > { %5044 = vmatprep.subr.bf16.mxu0 %v5043_v46  ;;  %v1507_v46 = vadd.f32 %v1492_v11, %v1447_v15  ;;  %v5055_v27 = vpack.c.bf16 %v1963_v24, %v1961_v23 }
 0x2a0   : > { %v6118_v7 = vpop.permute.xlu1 %1598  ;;  %v6120_v25 = vpop.permute.xlu0 %1600 }
 0x2a1   : > { %v1612_v22 = vsel %vm1608_vm9, %v6118_v7, %v6120_v25 }
 0x2a2   : > { %5046 = vmatpush1.bf16.msra.mxu0 %v5045_v40  ;;  %v1962_v40 = vld [vmem:[#allocation2 + $0x2d0] sm:$0xff] }
 0x2a3   : > { %5048 = vmatprep.subr.bf16.mxu0 %v5047_v44  ;;  %v1567_v44 = vadd.f32 %v1552_v2, %v1507_v46  ;;  %v1969_v2 = vld [vmem:[#allocation2 + $0x308] sm:$0xff]  ;;  %v1971_v46 = vld [vmem:[#allocation2 + $0x318] sm:$0xff] }
 0x2a4   : > { %v6130_v38 = vpop.permute.xlu1 %1658  ;;  %v6132_v20 = vpop.permute.xlu0 %1660 }
 0x2a5   : > { %v1672_v61 = vsel %vm1668_vm10, %v6130_v38, %v6132_v20  ;;  %v1627_v51 = vadd.f32 %v1612_v22, %v1567_v44  ;;  %v1970_v44 = vld [vmem:[#allocation2 + $0x310] sm:$0xff] }
 0x2a6   : > { %5050 = vmatpush1.bf16.msra.mxu0 %v5049_v52  ;;  %v5057_v52 = vpack.c.bf16 %v1962_v40, %v1960_v28  ;;  %v5063_v28 = vpack.c.bf16 %v1971_v46, %v1969_v2  ;;  %v1968_v40 = vld [vmem:[#allocation2 + $0x300] sm:$0xff]  ;;  %v1979_v2 = vld [vmem:[#allocation2 + $0x358] sm:$0xff] }
 0x2a7   : > { %5052 = vmatprep.subr.bf16.mxu0 %v5051_v13  ;;  %v5059_v13 = vpack.c.bf16 %v1967_v58, %v1965_v60  ;;  %v1687_v15 = vadd.f32 %v1672_v61, %v1627_v51  ;;  %v1973_v61 = vld [vmem:[#allocation2 + $0x328] sm:$0xff]  ;;  %v1975_v51 = vld [vmem:[#allocation2 + $0x338] sm:$0xff] }
 0x2a8   : > { %v6140_v57 = vpop.permute.xlu1 %1718  ;;  %v6142_v55 = vpop.permute.xlu0 %1720 }
 0x2a9   : > { %v1732_v11 = vsel %vm1728_vm11, %v6140_v57, %v6142_v55 }
 0x2aa   : > { %5054 = vmatpush1.bf16.msra.mxu0 %v5053_v12  ;;  %v1747_v22 = vadd.f32 %v1732_v11, %v1687_v15  ;;  %v5061_v12 = vpack.c.bf16 %v1966_v37, %v1964_v56  ;;  %v5065_v11 = vpack.c.bf16 %v1970_v44, %v1968_v40  ;;  %v1974_v56 = vld [vmem:[#allocation2 + $0x330] sm:$0xff]  ;;  %v1977_v15 = vld [vmem:[#allocation2 + $0x348] sm:$0xff] }
 0x2ab   : > { %5056 = vmatprep.subr.bf16.mxu0 %v5055_v27  ;;  %v1978_v40 = vld [vmem:[#allocation2 + $0x350] sm:$0xff] }
 0x2ac   : > { %v6150_v23 = vpop.permute.xlu1 %1778  ;;  %v1781_v24 = vpop.permute.xlu0 %1780 }
 0x2ad   : > { %v1792_v29 = vsel %vm1788_vm12, %v6150_v23, %v1781_v24 }
 0x2ae   : > { %5058 = vmatpush1.bf16.msra.mxu0 %v5057_v52  ;;  %v1807_v27 = vadd.f32 %v1792_v29, %v1747_v22  ;;  %v5067_v52 = vpack.c.bf16 %v1975_v51, %v1973_v61  ;;  %v1388_v22 = vmul.f32 %v6031_v42, %v5851_v63  ;;  %v1981_v61 = vld [vmem:[#allocation2 + $0x368] sm:$0xff]  ;;  %v1983_v51 = vld [vmem:[#allocation2 + $0x378] sm:$0xff] }
 0x2af   : > { %5060 = vmatprep.subr.bf16.mxu0 %v5059_v13  ;;  %v1972_v13 = vld [vmem:[#allocation2 + $0x320] sm:$0xff] }
 0x2b0   : > { %v6154_v60 = vpop.permute.xlu1 %1838  ;;  %v6156_v58 = vpop.permute.xlu0 %1840 }
 0x2b1   : > { %v1852_v30 = vsel %vm1848_vm13, %v6154_v60, %v6156_v58 }
 0x2b2   : > { %v1867_v34 = vadd.f32 %v1852_v30, %v1807_v27  ;;  %5062 = vmatpush1.bf16.msra.mxu0 %v5061_v12  ;;  %v5069_v30 = vpack.c.bf16 %v1974_v56, %v1972_v13  ;;  %v5071_v12 = vpack.c.bf16 %v1979_v2, %v1977_v15  ;;  %v1982_v13 = vld [vmem:[#allocation2 + $0x370] sm:$0xff] }
 0x2b3   : > { %5064 = vmatprep.subr.bf16.mxu0 %v5063_v28  ;;  %v1976_v28 = vld [vmem:[#allocation2 + $0x340] sm:$0xff] }
 0x2b4   : > { %2263 = vmatprep.mubr.f32.mxu0 %v1867_v34  ;;  %v6161_v37 = vpop.permute.xlu0 %1542  ;;  %v1423_v29 = vpop.permute.xlu1 %1422 }
 0x2b5   : > { %v1433_v46 = vsel %vm1428_vm6, %v6108_v10, %v1423_v29  ;;  %v5073_v10 = vpack.c.bf16 %v1978_v40, %v1976_v28  ;;  %v1553_v63 = vsel %vm1548_vm8, %v6116_v26, %v6161_v37  ;;  %v1984_v28 = vld [vmem:[#allocation2 + $0x380] sm:$0xff]  ;;  %v1986_v40 = vld [vmem:[#allocation2 + $0x390] sm:$0xff] }
 0x2b6   : > { %5066 = vmatpush1.bf16.msra.mxu0 %v5065_v11  ;;  %v1448_v44 = vadd.f32 %v1433_v46, %v1388_v22  ;;  %v5075_v11 = vpack.c.bf16 %v1983_v51, %v1981_v61  ;;  %v1985_v46 = vld [vmem:[#allocation2 + $0x388] sm:$0xff]  ;;  %v1987_v22 = vld [vmem:[#allocation2 + $0x398] sm:$0xff] }
 0x2b7   : > { %5068 = vmatprep.subr.bf16.mxu0 %v5067_v52  ;;  %v1980_v52 = vld [vmem:[#allocation2 + $0x360] sm:$0xff] }
 0x2b8   : > { %v6167_v27 = vpop.permute.xlu0 %1662  ;;  %v1483_v34 = vpop.permute.xlu1 %1482  ;;  %v5077_v26 = vpack.c.bf16 %v1982_v13, %v1980_v52  ;;  %v1386_v52 = vmul.f32 %v6031_v42, %v5849_v62  ;;  %v1993_v62 = vld [vmem:[#allocation2 + $0x3c8] sm:$0xff] }
 0x2b9   : > { %v1493_v1 = vsel %vm1488_vm7, %v6112_v18, %v1483_v34 }
 0x2ba   : > { %v1508_v35 = vadd.f32 %v1493_v1, %v1448_v44  ;;  %5070 = vmatpush1.bf16.msra.mxu0 %v5069_v30 }
 0x2bb   : > { %5072 = vmatprep.subr.bf16.mxu0 %v5071_v12  ;;  %v1673_v12 = vsel %vm1668_vm10, %v6132_v20, %v6167_v27 }
 0x2bc   : > { %v6174_v56 = vpop.permute.xlu0 %1782  ;;  %v1568_v15 = vadd.f32 %v1553_v63, %v1508_v35  ;;  %v6176_v2 = vpop.permute.xlu1 %1602  ;;  %v5079_v35 = vpack.c.bf16 %v1987_v22, %v1985_v46  ;;  %v1991_v63 = vld [vmem:[#allocation2 + $0x3b8] sm:$0xff]  ;;  %v1988_v46 = vld [vmem:[#allocation2 + $0x3a0] sm:$0xff]  ;;  %v1990_v22 = vld [vmem:[#allocation2 + $0x3b0] sm:$0xff] }
 0x2bd   : > { %v1793_v1 = vsel %vm1788_vm12, %v1781_v24, %v6174_v56  ;;  %v1613_v18 = vsel %vm1608_vm9, %v6120_v25, %v6176_v2  ;;  %v1989_v24 = vld [vmem:[#allocation2 + $0x3a8] sm:$0xff] }
 0x2be   : > { %v1628_v30 = vadd.f32 %v1613_v18, %v1568_v15  ;;  %5074 = vmatpush1.bf16.msra.mxu0 %v5073_v10  ;;  %v1431_v10 = vsel %vm1428_vm6, %v6067_v48, %v6106_v5  ;;  %v5083_v15 = vpack.c.bf16 %v1991_v63, %v1989_v24  ;;  %v1389_v48 = vmul.f32 %v6031_v42, %v5855_v3  ;;  %v1994_v24 = vld [vmem:[#allocation2 + $0x3d0] sm:$0xff] }
 0x2bf   : > { %5076 = vmatprep.subr.bf16.mxu0 %v5075_v11  ;;  %v5081_v11 = vpack.c.bf16 %v1986_v40, %v1984_v28 }
 0x2c0   : > { %v6186_v44 = vpop.permute.xlu0 %1424  ;;  %v1688_v61 = vadd.f32 %v1673_v12, %v1628_v30  ;;  %v6188_v51 = vpop.permute.xlu1 %1722  ;;  %v1446_v12 = vadd.f32 %v1431_v10, %v1386_v52 }
 0x2c1   : > { %v1733_v25 = vsel %vm1728_vm11, %v6142_v55, %v6188_v51  ;;  %v1434_v13 = vsel %vm1428_vm6, %v1423_v29, %v6186_v44  ;;  %v1491_v55 = vsel %vm1488_vm7, %v6076_v19, %v6110_v17  ;;  %v1551_v19 = vsel %vm1548_vm8, %v6074_v4, %v6114_v16  ;;  %v1997_v4 = vld [vmem:[#allocation2 + $0x3e8] sm:$0xff]  ;;  %v1999_v16 = vld [vmem:[#allocation2 + $0x3f8] sm:$0xff] }
 0x2c2   : > { %v1748_v20 = vadd.f32 %v1733_v25, %v1688_v61  ;;  %5078 = vmatpush1.bf16.msra.mxu0 %v5077_v26  ;;  %v1995_v26 = vld [vmem:[#allocation2 + $0x3d8] sm:$0xff]  ;;  %v1449_v3 = vadd.f32 %v1434_v13, %v1389_v48  ;;  %v1506_v28 = vadd.f32 %v1491_v55, %v1446_v12  ;;  %v1992_v61 = vld [vmem:[#allocation2 + $0x3c0] sm:$0xff] }
 0x2c3   : > { %5080 = vmatprep.subr.bf16.mxu0 %v5079_v35  ;;  %v5087_v40 = vpack.c.bf16 %v1995_v26, %v1993_v62  ;;  %v5089_v13 = vpack.c.bf16 %v1994_v24, %v1992_v61  ;;  %v1791_v26 = vsel %vm1788_vm12, %v6092_v6, %v6150_v23  ;;  %v2005_v23 = vld [vmem:[#allocation2 + $0x428] sm:$0xff] }
 0x2c4   : > { %v6205_v5 = vpop.permute.xlu0 %1484  ;;  %v1808_v18 = vadd.f32 %v1793_v1, %v1748_v20  ;;  %v6207_v30 = vpop.permute.xlu1 %1842  ;;  %v5085_v1 = vpack.c.bf16 %v1990_v22, %v1988_v46  ;;  %v1566_v10 = vadd.f32 %v1551_v19, %v1506_v28  ;;  %v1996_v46 = vld [vmem:[#allocation2 + $0x3e0] sm:$0xff]  ;;  %v1998_v22 = vld [vmem:[#allocation2 + $0x3f0] sm:$0xff] }
 0x2c5   : > { %v1494_v29 = vsel %vm1488_vm7, %v1483_v34, %v6205_v5  ;;  %v1853_v35 = vsel %vm1848_vm13, %v6156_v58, %v6207_v30  ;;  %v1611_v34 = vsel %vm1608_vm9, %v6085_v14, %v6118_v7  ;;  %v2000_v19 = vld [vmem:[#allocation2 + $0x400] sm:$0xff] }
 0x2c6   : > { %v6217_v17 = vadd.f32 %v1853_v35, %v1808_v18  ;;  %5082 = vmatpush1.bf16.msra.mxu0 %v5081_v11  ;;  %v1509_v63 = vadd.f32 %v1494_v29, %v1449_v3  ;;  %v1671_v11 = vsel %vm1668_vm10, %v6083_v59, %v6130_v38  ;;  %v1626_v14 = vadd.f32 %v1611_v34, %v1566_v10  ;;  %v2001_v38 = vld [vmem:[#allocation2 + $0x408] sm:$0xff]  ;;  %v2003_v18 = vld [vmem:[#allocation2 + $0x418] sm:$0xff]  ;;  %v2002_v3 = vld [vmem:[#allocation2 + $0x410] sm:$0xff] }
 0x2c7   : > { %5084 = vmatprep.subr.bf16.mxu0 %v5083_v15  ;;  %v5091_v15 = vpack.c.bf16 %v1999_v16, %v1997_v4  ;;  %v5093_v29 = vpack.c.bf16 %v1998_v22, %v1996_v46  ;;  %v5095_v35 = vpack.c.bf16 %v2003_v18, %v2001_v38  ;;  %v5097_v34 = vpack.c.bf16 %v2002_v3, %v2000_v19  ;;  %v2004_v16 = vld [vmem:[#allocation2 + $0x420] sm:$0xff]  ;;  %v2006_v10 = vld [vmem:[#allocation2 + $0x430] sm:$0xff] }
 0x2c8   : > { %v6222_v58 = vpop.permute.xlu0 %1604  ;;  %v6224_v25 = vpop.permute.xlu1 %1544  ;;  %v1686_v62 = vadd.f32 %v1671_v11, %v1626_v14  ;;  %v1390_v11 = vmul.f32 %v6031_v42, %v5867_v8  ;;  %v2011_v14 = vld [vmem:[#allocation2 + $0x458] sm:$0xff]  ;;  %v2008_v8 = vld [vmem:[#allocation2 + $0x440] sm:$0xff]  ;;  %v2014_v19 = vld [vmem:[#allocation2 + $0x470] sm:$0xff] }
 0x2c9   : > { %v1554_v20 = vsel %vm1548_vm8, %v6161_v37, %v6224_v25  ;;  %v1614_v7 = vsel %vm1608_vm9, %v6176_v2, %v6222_v58  ;;  %v1731_v37 = vsel %vm1728_vm11, %v6094_v21, %v6140_v57 }
 0x2ca   : > { %v1569_v52 = vadd.f32 %v1554_v20, %v1509_v63  ;;  %5086 = vmatpush1.bf16.msra.mxu0 %v5085_v1  ;;  %v1746_v21 = vadd.f32 %v1731_v37, %v1686_v62  ;;  %v2013_v62 = vld [vmem:[#allocation2 + $0x468] sm:$0xff] }
 0x2cb   : > { %5088 = vmatprep.subr.bf16.mxu0 %v5087_v40  ;;  %v2007_v40 = vld [vmem:[#allocation2 + $0x438] sm:$0xff] }
 0x2cc   : > { %v6238_v55 = vpop.permute.xlu0 %1724  ;;  %v6240_v48 = vpop.permute.xlu1 %1664  ;;  %v1629_v59 = vadd.f32 %v1614_v7, %v1569_v52  ;;  %v1806_v61 = vadd.f32 %v1791_v26, %v1746_v21  ;;  %v5099_v4 = vpack.c.bf16 %v2007_v40, %v2005_v23  ;;  %v2017_v23 = vld [vmem:[#allocation2 + $0x488] sm:$0xff]  ;;  %v2019_v40 = vld [vmem:[#allocation2 + $0x498] sm:$0xff] }
 0x2cd   : > { %v1674_v2 = vsel %vm1668_vm10, %v6167_v27, %v6240_v48  ;;  %v1734_v57 = vsel %vm1728_vm11, %v6188_v51, %v6238_v55  ;;  %v1851_v27 = vsel %vm1848_vm13, %v6101_v39, %v6154_v60  ;;  %v1391_v60 = vmul.f32 %v6031_v42, %v5869_v9  ;;  %v2010_v42 = vld [vmem:[#allocation2 + $0x450] sm:$0xff] }
 0x2ce   : > { %v1689_v12 = vadd.f32 %v1674_v2, %v1629_v59  ;;  %5090 = vmatpush1.bf16.msra.mxu0 %v5089_v13  ;;  %v1866_v63 = vadd.f32 %v1851_v27, %v1806_v61  ;;  %v2009_v13 = vld [vmem:[#allocation2 + $0x448] sm:$0xff]  ;;  %v5101_v9 = vpack.c.bf16 %v2006_v10, %v2004_v16  ;;  %v2015_v2 = vld [vmem:[#allocation2 + $0x478] sm:$0xff] }
 0x2cf   : > { %5092 = vmatprep.subr.bf16.mxu0 %v5091_v15  ;;  %v5103_v37 = vpack.c.bf16 %v2011_v14, %v2009_v13 }
 0x2d0   : > { %v6254_v1 = vpop.permute.xlu0 %1844  ;;  %v6256_v28 = vpop.permute.xlu1 %1784  ;;  %v1749_v6 = vadd.f32 %v1734_v57, %v1689_v12  ;;  %v5107_v57 = vpack.c.bf16 %v2015_v2, %v2013_v62  ;;  %v2028_v62 = vld [vmem:[#allocation2 + $0x4e0] sm:$0xff]  ;;  %v2030_v2 = vld [vmem:[#allocation2 + $0x4f0] sm:$0xff] }
 0x2d1   : > { %v1794_v51 = vsel %vm1788_vm12, %v6174_v56, %v6256_v28  ;;  %v1854_v39 = vsel %vm1848_vm13, %v6207_v30, %v6254_v1 }
 0x2d2   : > { %v1809_v24 = vadd.f32 %v1794_v51, %v1749_v6  ;;  %5094 = vmatpush1.bf16.msra.mxu0 %v5093_v29  ;;  %v5105_v29 = vpack.c.bf16 %v2010_v42, %v2008_v8  ;;  %v2024_v8 = vld [vmem:[#allocation2 + $0x4c0] sm:$0xff]  ;;  %v2026_v42 = vld [vmem:[#allocation2 + $0x4d0] sm:$0xff] }
 0x2d3   : > { %5096 = vmatprep.subr.bf16.mxu0 %v5095_v35  ;;  %v2012_v35 = vld [vmem:[#allocation2 + $0x460] sm:$0xff] }
 0x2d4   : > { %v1487_v20 = vpop.permute.xlu0 %1486  ;;  %v1427_v56 = vpop.permute.xlu1 %1426  ;;  %v1869_v52 = vadd.f32 %v1854_v39, %v1809_v24  ;;  %v5109_v24 = vpack.c.bf16 %v2014_v19, %v2012_v35  ;;  %v2016_v39 = vld [vmem:[#allocation2 + $0x480] sm:$0xff]  ;;  %v2039_v35 = vld [vmem:[#allocation2 + $0x538] sm:$0xff] }
 0x2d5   : > { %2264 = vmatmul.mubr.f32.vlgmr.msra.gmra.mrb[6].mxu0 %v1866_v63  ;;  %v1435_v7 = vsel %vm1428_vm6, %v6186_v44, %v1427_v56  ;;  %v1451_v30 = vadd.f32 %v1427_v56, %v1391_v60  ;;  %v1495_v46 = vsel %vm1488_vm7, %v6205_v5, %v1487_v20  ;;  %v5111_v63 = vpack.c.bf16 %v2019_v40, %v2017_v23  ;;  %v2018_v60 = vld [vmem:[#allocation2 + $0x490] sm:$0xff]  ;;  %v2041_v23 = vld [vmem:[#allocation2 + $0x548] sm:$0xff]  ;;  %v2043_v40 = vld [vmem:[#allocation2 + $0x558] sm:$0xff] }
 0x2d6   : > { %v1450_v15 = vadd.f32 %v1435_v7, %v1390_v11  ;;  %5098 = vmatpush1.bf16.msra.mxu0 %v5097_v34  ;;  %2334 = vmatprep.mubr.f32.mxu0 %v1869_v52  ;;  %v2023_v11 = vld [vmem:[#allocation2 + $0x4b8] sm:$0xff]  ;;  %v5113_v13 = vpack.c.bf16 %v2018_v60, %v2016_v39  ;;  %v2044_v60 = vld [vmem:[#allocation2 + $0x560] sm:$0xff] }
 0x2d7   : > { %5100 = vmatprep.subr.bf16.mxu0 %v5099_v4  ;;  %v1511_v22 = vadd.f32 %v1487_v20, %v1451_v30  ;;  %v2021_v20 = vld [vmem:[#allocation2 + $0x4a8] sm:$0xff]  ;;  %v2020_v30 = vld [vmem:[#allocation2 + $0x4a0] sm:$0xff] }
 0x2d8   : > { %v1607_v59 = vpop.permute.xlu0 %1606  ;;  %v1510_v38 = vadd.f32 %v1495_v46, %v1450_v15  ;;  %v1547_v18 = vpop.permute.xlu1 %1546  ;;  %v5115_v7 = vpack.c.bf16 %v2023_v11, %v2021_v20  ;;  %v2022_v15 = vld [vmem:[#allocation2 + $0x4b0] sm:$0xff]  ;;  %v2025_v46 = vld [vmem:[#allocation2 + $0x4c8] sm:$0xff] }
 0x2d9   : > { %v1555_v44 = vsel %vm1548_vm8, %v6224_v25, %v1547_v18  ;;  %v1571_v26 = vadd.f32 %v1547_v18, %v1511_v22  ;;  %v1615_v5 = vsel %vm1608_vm9, %v6222_v58, %v1607_v59  ;;  %v2027_v22 = vld [vmem:[#allocation2 + $0x4d8] sm:$0xff]  ;;  %vm2498_vm8 = vcmask 678912  }
 0x2da   : > { %v1570_v12 = vadd.f32 %v1555_v44, %v1510_v38  ;;  %5102 = vmatpush1.bf16.msra.mxu0 %v5101_v9  ;;  %v2031_v38 = vld [vmem:[#allocation2 + $0x4f8] sm:$0xff]  ;;  %v2033_v44 = vld [vmem:[#allocation2 + $0x508] sm:$0xff]  ;;  %vm2508_vm9 = vcmask 556032  }
 0x2db   : > { %5104 = vmatprep.subr.bf16.mxu0 %v5103_v37  ;;  %v1631_v21 = vadd.f32 %v1607_v59, %v1571_v26  ;;  %v5119_v37 = vpack.c.bf16 %v2027_v22, %v2025_v46  ;;  %v2029_v59 = vld [vmem:[#allocation2 + $0x4e8] sm:$0xff]  ;;  %v2035_v26 = vld [vmem:[#allocation2 + $0x518] sm:$0xff] }
 0x2dc   : > { %v1727_v3 = vpop.permute.xlu0 %1726  ;;  %v1630_v27 = vadd.f32 %v1615_v5, %v1570_v12  ;;  %v1667_v6 = vpop.permute.xlu1 %1666  ;;  %v5123_v18 = vpack.c.bf16 %v2031_v38, %v2029_v59  ;;  %v5125_v12 = vpack.c.bf16 %v2030_v2, %v2028_v62  ;;  %v2032_v5 = vld [vmem:[#allocation2 + $0x500] sm:$0xff] }
 0x2dd   : > { %v1675_v25 = vsel %vm1668_vm10, %v6240_v48, %v1667_v6  ;;  %v1691_v61 = vadd.f32 %v1667_v6, %v1631_v21  ;;  %v1735_v58 = vsel %vm1728_vm11, %v6238_v55, %v1727_v3  ;;  %v2034_v21 = vld [vmem:[#allocation2 + $0x510] sm:$0xff]  ;;  %vm2518_vm10 = vcmask 433152  }
 0x2de   : > { %v1690_v51 = vadd.f32 %v1675_v25, %v1630_v27  ;;  %5106 = vmatpush1.bf16.msra.mxu0 %v5105_v29  ;;  %v5127_v29 = vpack.c.bf16 %v2035_v26, %v2033_v44  ;;  %v5129_v19 = vpack.c.bf16 %v2034_v21, %v2032_v5  ;;  %v2036_v27 = vld [vmem:[#allocation2 + $0x520] sm:$0xff]  ;;  %v2038_v6 = vld [vmem:[#allocation2 + $0x530] sm:$0xff]  ;;  %vm2528_vm11 = vcmask 310272  }
 0x2df   : > { %5108 = vmatprep.subr.bf16.mxu0 %v5107_v57  ;;  %v1751_v34 = vadd.f32 %v1727_v3, %v1691_v61  ;;  %v2037_v57 = vld [vmem:[#allocation2 + $0x528] sm:$0xff]  ;;  %v5133_v25 = vpack.c.bf16 %v2038_v6, %v2036_v27  ;;  %v5135_v61 = vpack.c.bf16 %v2043_v40, %v2041_v23  ;;  %v5550_v27 = vmov 0.0|0.0   ;;  %v2537_v23 = vld [vmem:[%s6739_s20 + $0x18] sm:$0xff] }
 0x2e0   : > { %v1847_v4 = vpop.permute.xlu0 %1846  ;;  %v1750_v16 = vadd.f32 %v1735_v58, %v1690_v51  ;;  %v1787_v10 = vpop.permute.xlu1 %1786  ;;  %v5131_v3 = vpack.c.bf16 %v2039_v35, %v2037_v57  ;;  %v2040_v51 = vld [vmem:[#allocation2 + $0x540] sm:$0xff]  ;;  %v2045_v58 = vld [vmem:[#allocation2 + $0x568] sm:$0xff]  ;;  %5209 = vmatprep.subr.bf16.mxu1 %v5550_v27 }
 0x2e1   : > { %v1795_v48 = vsel %vm1788_vm12, %v6256_v28, %v1787_v10  ;;  %v1811_v56 = vadd.f32 %v1787_v10, %v1751_v34  ;;  %v1855_v55 = vsel %vm1848_vm13, %v6254_v1, %v1847_v4  ;;  %v5117_v28 = vpack.c.bf16 %v2022_v15, %v2020_v30  ;;  %v2047_v34 = vld [vmem:[#allocation2 + $0x578] sm:$0xff]  ;;  %v2054_v30 = vld [vmem:[#allocation2 + $0x5b0] sm:$0xff]  ;;  %v2057_v15 = vld [vmem:[#allocation2 + $0x5c8] sm:$0xff] }
 0x2e2   : > { %v1810_v52 = vadd.f32 %v1795_v48, %v1750_v16  ;;  %5110 = vmatpush1.bf16.msra.mxu0 %v5109_v24  ;;  %v5121_v1 = vpack.c.bf16 %v2026_v42, %v2024_v8  ;;  %v2042_v24 = vld [vmem:[#allocation2 + $0x550] sm:$0xff]  ;;  %v5139_v39 = vpack.c.bf16 %v2047_v34, %v2045_v58  ;;  %v2049_v16 = vld [vmem:[#allocation2 + $0x588] sm:$0xff]  ;;  %v2051_v10 = vld [vmem:[#allocation2 + $0x598] sm:$0xff]  ;;  %vm2551_vm12 = vcmask 7168  }
 0x2e3   : > { %v1871_v14 = vadd.f32 %v1847_v4, %v1811_v56  ;;  %5112 = vmatprep.subr.bf16.mxu0 %v5111_v63  ;;  %v5137_v63 = vpack.c.bf16 %v2042_v24, %v2040_v51  ;;  %v2046_v4 = vld [vmem:[#allocation2 + $0x570] sm:$0xff]  ;;  %v5143_v11 = vpack.c.bf16 %v2051_v10, %v2049_v16  ;;  %v2048_v48 = vld [vmem:[#allocation2 + $0x580] sm:$0xff]  ;;  %v2061_v8 = vld [vmem:[#allocation2 + $0x5e8] sm:$0xff] }
 0x2e4   : > { %v1870_v9 = vadd.f32 %v1855_v55, %v1810_v52  ;;  %v5141_v20 = vpack.c.bf16 %v2046_v4, %v2044_v60  ;;  %v2050_v56 = vld [vmem:[#allocation2 + $0x590] sm:$0xff]  ;;  %v2053_v52 = vld [vmem:[#allocation2 + $0x5a8] sm:$0xff]  ;;  %v2063_v42 = vld [vmem:[#allocation2 + $0x5f8] sm:$0xff] }
 0x2e5   : > { %4805 = vmatprep.mubr.msk.f32.mxu1 %vm1848_vm13, %v1871_v14  ;;  %v5145_v55 = vpack.c.bf16 %v2050_v56, %v2048_v48  ;;  %v5155_v38 = vpack.c.bf16 %v2063_v42, %v2061_v8  ;;  %v2540_v56 = vld [vmem:[%s6739_s20 + $0x30] sm:$0xff]  ;;  %vm5557_vm13 = vmmov 0  }
 0x2e6   : > { %5114 = vmatpush1.bf16.msra.mxu0 %v5113_v13  ;;  %2406 = vmatmul.mubr.f32.vlgmr.msra.gmra.mrb[10].mxu1 %v1870_v9  ;;  %v2055_v13 = vld [vmem:[#allocation2 + $0x5b8] sm:$0xff] }
 0x2e7   : > { %5116 = vmatprep.subr.bf16.mxu0 %v5115_v7  ;;  %v5147_v14 = vpack.c.bf16 %v2055_v13, %v2053_v52  ;;  %v2052_v7 = vld [vmem:[#allocation2 + $0x5a0] sm:$0xff]  ;;  %v2059_v9 = vld [vmem:[#allocation2 + $0x5d8] sm:$0xff] }
 0x2e8   : > { %v5149_v46 = vpack.c.bf16 %v2054_v30, %v2052_v7  ;;  %v5151_v22 = vpack.c.bf16 %v2059_v9, %v2057_v15  ;;  %v2541_v52 = vld [vmem:[%s6739_s20 + $0x38] sm:$0xff] }
 0x2ea   : > { %5118 = vmatpush1.bf16.msra.mxu0 %v5117_v28  ;;  %v2056_v28 = vld [vmem:[#allocation2 + $0x5c0] sm:$0xff] }
 0x2eb   : > { %5120 = vmatprep.subr.bf16.mxu0 %v5119_v37  ;;  %v2058_v37 = vld [vmem:[#allocation2 + $0x5d0] sm:$0xff] }
 0x2ec   : > { %v5153_v59 = vpack.c.bf16 %v2058_v37, %v2056_v28  ;;  %v2542_v28 = vld [vmem:[%s6739_s20 + $0x40] sm:$0xff]  ;;  %v2543_v37 = vld [vmem:[%s6739_s20 + $0x48] sm:$0xff] }
 0x2ee   : > { %5122 = vmatpush1.bf16.msra.mxu0 %v5121_v1  ;;  %v2060_v1 = vld [vmem:[#allocation2 + $0x5e0] sm:$0xff] }
 0x2ef   : > { %5124 = vmatprep.subr.bf16.mxu0 %v5123_v18  ;;  %v2062_v18 = vld [vmem:[#allocation2 + $0x5f0] sm:$0xff] }
 0x2f0   : > { %v5157_v62 = vpack.c.bf16 %v2062_v18, %v2060_v1 }
 0x2f1   : > { %v2116_v26 = vpop.permute.xlu1 %2115 }
 0x2f2   : > { %5126 = vmatpush1.bf16.msra.mxu0 %v5125_v12 }
 0x2f3   : > { %5128 = vmatprep.subr.bf16.mxu0 %v5127_v29 }
 0x2f6   : > { %5130 = vmatpush1.bf16.msra.mxu0 %v5129_v19  ;;  %v2535_v19 = vld [vmem:[%s6739_s20 + $0x8] sm:$0xff] }
 0x2f7   : > { %5132 = vmatprep.subr.bf16.mxu0 %v5131_v3  ;;  %v2536_v3 = vld [vmem:[%s6739_s20 + $0x10] sm:$0xff] }
 0x2f8   : > { %v5213_v40 = vpack.c.bf16 %v2537_v23, %v2536_v3  ;;  %v2549_v3 = vld [vmem:[%s6739_s20 + $0x78] sm:$0xff]  ;;  %v2550_v23 = vld [vmem:[%s6739_s20 + $0x80] sm:$0x1] }
 0x2fa   : > { %5134 = vmatpush1.bf16.msra.mxu0 %v5133_v25  ;;  %v2538_v25 = vld [vmem:[%s6739_s20 + $0x20] sm:$0xff] }
 0x2fb   : > { %5136 = vmatprep.subr.bf16.mxu0 %v5135_v61  ;;  %v2539_v61 = vld [vmem:[%s6739_s20 + $0x28] sm:$0xff] }
 0x2fc   : > { %v5216_v51 = vpack.c.bf16 %v2539_v61, %v2538_v25 }
 0x2fe   : > { %5138 = vmatpush1.bf16.msra.mxu0 %v5137_v63 }
 0x2ff   : > { %5140 = vmatprep.subr.bf16.mxu0 %v5139_v39 }
 0x302   : > { %5142 = vmatpush1.bf16.msra.mxu0 %v5141_v20 }
 0x303   : > { %5144 = vmatprep.subr.bf16.mxu0 %v5143_v11 }
 0x306   : > { %5146 = vmatpush1.bf16.msra.mxu0 %v5145_v55 }
 0x307   : > { %5148 = vmatprep.subr.bf16.mxu0 %v5147_v14  ;;  %v5219_v14 = vpack.c.bf16 %v2541_v52, %v2540_v56 }
 0x30a   : > { %5150 = vmatpush1.bf16.msra.mxu0 %v5149_v46 }
 0x30b   : > { %5152 = vmatprep.subr.bf16.mxu0 %v5151_v22 }
 0x30e   : > { %5154 = vmatpush1.bf16.msra.mxu0 %v5153_v59  ;;  %v5222_v59 = vpack.c.bf16 %v2543_v37, %v2542_v28 }
 0x30f   : > { %5156 = vmatprep.subr.bf16.mxu0 %v5155_v38 }
 0x312   : > { %5158 = vmatpush1.bf16.msra.mxu0 %v5157_v62 }
 0x315   : > { %2335 = vmatmul.mubr.f32.vlgmr.msra.gmra.mrb[6].mxu0 %v6217_v17  ;;  %v2534_v17 = vld [vmem:[%s6739_s20] sm:$0xff] }
 0x316   : > { %v5210_v6 = vpack.c.bf16 %v2535_v19, %v2534_v17  ;;  %v2548_v19 = vld [vmem:[%s6739_s20 + $0x70] sm:$0xff] }
 0x318   : > { %5211 = vmatpush1.bf16.msra.mxu1 %v5210_v6  ;;  %v5231_v6 = vpack.c.bf16 %v2549_v3, %v2548_v19 }
 0x319   : > { %5212 = vmatprep.subr.bf16.mxu1 %v5550_v27 }
 0x31c   : > { %5214 = vmatpush1.bf16.msra.mxu1 %v5213_v40 }
 0x31d   : > { %5215 = vmatprep.subr.bf16.mxu1 %v5550_v27 }
 0x320   : > { %5217 = vmatpush1.bf16.msra.mxu1 %v5216_v51 }
 0x321   : > { %5218 = vmatprep.subr.bf16.mxu1 %v5550_v27 }
 0x324   : > { %5220 = vmatpush1.bf16.msra.mxu1 %v5219_v14 }
 0x325   : > { %5221 = vmatprep.subr.bf16.mxu1 %v5550_v27 }
 0x328   : > { %5223 = vmatpush1.bf16.msra.mxu1 %v5222_v59  ;;  %v2707_v59 = vld [vmem:[%s6740_s21 + $0x8] sm:$0x1] }
 0x329   : > { %5224 = vmatprep.subr.bf16.mxu1 %v5550_v27 }
 0x3b9   : > { %v2407_v2 = vpop.f32.mrb[10].mxu1 }
 0x3ba   : > { %v2409_v44 = vpop.f32.mrb[11].mxu1 }
 0x3e8   : > { %v2336_v12 = vpop.f32.mrb[6].mxu0 }
 0x3e9   : > { %v5281_v29 = vadd.f32 %v2336_v12, %v2116_v26  ;;  %v2338_v5 = vpop.f32.mrb[7].mxu0 }
 0x3ea   : > { %v5283_v21 = vadd.f32 %v2338_v5, %v2116_v26  ;;  %v2545_v26 = vld [vmem:[%s6739_s20 + $0x58] sm:$0xff] }
 0x3eb   : > { %v5282_v57 = vadd.f32 %v5281_v29, %v2407_v2 }
 0x3ec   : > { %v5284_v35 = vadd.f32 %v5283_v21, %v2409_v44  ;;  %v2544_v44 = vld [vmem:[%s6739_s20 + $0x50] sm:$0xff] }
 0x3ed   : > { %2414 = vrot.lane.b32.xlu0 %v5282_v57, %s5538_s8  ;;  %v5225_v5 = vpack.c.bf16 %v2545_v26, %v2544_v44  ;;  %v2785_v44 = vld [vmem:[%s6728_s9] sm:$0xf]  ;;  %v6782_v26 = vmov 6  }
 0x3ee   : > { %2416 = vrot.lane.b32.xlu1 %v5284_v35, %s5538_s8 }
 0x3ef   : > { %5226 = vmatpush1.bf16.msra.mxu1 %v5225_v5  ;;  %v6785_v5 = vmov 1  }
 0x3f0   : > { %5227 = vmatprep.subr.bf16.mxu1 %v5550_v27 }
 0x3f1   : > { %2423 = vrot.lane.b32.xlu0 %v5282_v57, %s5537_s25 }
 0x3f2   : > { %2425 = vrot.lane.b32.xlu1 %v5284_v35, %s5537_s25 }
 0x3f5   : > { %2432 = vrot.lane.b32.xlu0 %v5282_v57, %s5546_s4 }
 0x3f6   : > { %2434 = vrot.lane.b32.xlu1 %v5284_v35, %s5546_s4 }
 0x3f9   : > { %2442 = vrot.lane.b32.xlu0 %v5282_v57, %s5547_s1 }
 0x3fa   : > { %2444 = vrot.lane.b32.xlu1 %v5284_v35, %s5547_s1 }
 0x3fd   : > { %2452 = vrot.lane.b32.xlu0 %v5282_v57, %s5548_s27 }
 0x3fe   : > { %2454 = vrot.lane.b32.xlu1 %v5284_v35, %s5548_s27 }
 0x401   : > { %2462 = vrot.lane.b32.xlu0 %v5282_v57, %s6757_s29 }
 0x402   : > { %2464 = vrot.lane.b32.xlu1 %v5284_v35, %s6757_s29  ;;  %s5555_s29 = smov 53  }
 0x45f   : > { %v2415_v24 = vpop.permute.xlu0 %2414 }
 0x460   : > { %v2417_v58 = vpop.permute.xlu1 %2416 }
 0x461   : > { %v2418_v4 = vsel %vm1428_vm6, %v2415_v24, %v2417_v58  ;;  %v2422_v16 = vmax.f32 %v5284_v35, %v2417_v58  ;;  %v2547_v35 = vld [vmem:[%s6739_s20 + $0x68] sm:$0xff]  ;;  %vm2478_vm6 = vcmask 924672  }
 0x462   : > { %v2421_v11 = vmax.f32 %v5282_v57, %v2418_v4  ;;  %v2546_v57 = vld [vmem:[%s6739_s20 + $0x60] sm:$0xff] }
 0x463   : > { %v2424_v34 = vpop.permute.xlu0 %2423  ;;  %v5228_v17 = vpack.c.bf16 %v2547_v35, %v2546_v57 }
 0x464   : > { %v2426_v63 = vpop.permute.xlu1 %2425 }
 0x465   : > { %v2427_v10 = vsel %vm1488_vm7, %v2424_v34, %v2426_v63  ;;  %v2431_v13 = vmax.f32 %v2422_v16, %v2426_v63  ;;  %5229 = vmatpush1.bf16.msra.mxu1 %v5228_v17  ;;  %vm2488_vm7 = vcmask 801792  }
 0x466   : > { %v2430_v7 = vmax.f32 %v2421_v11, %v2427_v10  ;;  %5230 = vmatprep.subr.bf16.mxu1 %v5550_v27 }
 0x467   : > { %v2433_v39 = vpop.permute.xlu0 %2432 }
 0x468   : > { %v2435_v60 = vpop.permute.xlu1 %2434 }
 0x469   : > { %v2437_v55 = vsel %vm2436_vm14, %v2433_v39, %v2435_v60  ;;  %v2441_v30 = vmax.f32 %v2431_v13, %v2435_v60  ;;  %5232 = vmatpush1.bf16.msra.mxu1 %v5231_v6  ;;  %vm6373_vm14 = vmpackc.low %vm2555_vm5, %vm5545_vm4 }
 0x46a   : > { %v2440_v46 = vmax.f32 %v2430_v7, %v2437_v55  ;;  %2591 = vmatprep.subr.mxu1 %v5527_v0 }
 0x46b   : > { %v2443_v20 = vpop.permute.xlu0 %2442 }
 0x46c   : > { %v2445_v48 = vpop.permute.xlu1 %2444 }
 0x46d   : > { %v2447_v15 = vsel %vm2446_vm15, %v2443_v20, %v2445_v48  ;;  %v2451_v8 = vmax.f32 %v2441_v30, %v2445_v48  ;;  %4806 = vmatpush1.msk.msra.mxu1 %vm2555_vm5, %v2550_v23  ;;  %vm2708_vm15 = vcmask 72704  }
 0x46e   : > { %v2450_v38 = vmax.f32 %v2440_v46, %v2447_v15  ;;  %4894 = vmatprep.subr.mxu1 %v5527_v0 }
 0x46f   : > { %v2453_v9 = vpop.permute.xlu0 %2452 }
 0x470   : > { %v2455_v22 = vpop.permute.xlu1 %2454 }
 0x471   : > { %v2457_v42 = vsel %vm2456_vm0, %v2453_v9, %v2455_v22  ;;  %v2461_v1 = vmax.f32 %v2451_v8, %v2455_v22  ;;  %vm2884_vm0 = vcmask 1044480  }
 0x472   : > { %v2460_v62 = vmax.f32 %v2450_v38, %v2457_v42  ;;  %v2706_v42 = vld [vmem:[%s6740_s21] sm:$0xff] }
 0x473   : > { %v2463_v18 = vpop.permute.xlu0 %2462 }
 0x474   : > { %v2465_v2 = vpop.permute.xlu1 %2464 }
 0x475   : > { %v2467_v12 = vsel %vm2466_vm3, %v2463_v18, %v2465_v2  ;;  %v2471_v29 = vmax.f32 %v2461_v1, %v2465_v2  ;;  %v6369_v1 = vpack.c.bf16 %v2707_v59, %v2706_v42  ;;  %vm6412_vm3 = vmpackc.low %vm2884_vm0, %vm5545_vm4  ;;  %vm2880_vm4 = vcmask 105472  }
 0x476   : > { %v2470_v21 = vmax.f32 %v2460_v62, %v2467_v12  ;;  %v6783_v12 = vmov 0  }
 0x477   : > { %2476 = vrot.lane.b32.xlu1 %v2471_v29, %s5551_s0 }
 0x478   : > { %2474 = vrot.lane.b32.xlu0 %v2470_v21, %s5551_s0 }
 0x47b   : > { %2486 = vrot.lane.b32.xlu1 %v2471_v29, %s5552_s3 }
 0x47c   : > { %2484 = vrot.lane.b32.xlu0 %v2470_v21, %s5552_s3  ;;  %s5556_s3 = smov 38  }
 0x47f   : > { %2496 = vrot.lane.b32.xlu1 %v2471_v29, %s5553_s6 }
 0x480   : > { %2494 = vrot.lane.b32.xlu0 %v2470_v21, %s5553_s6  ;;  %s6791_s6 = sld [smem:[#allocation9_spill]] }
 0x483   : > { %2506 = vrot.lane.b32.xlu1 %v2471_v29, %s5554_s28 }
 0x484   : > { %2504 = vrot.lane.b32.xlu0 %v2470_v21, %s5554_s28  ;;  %s6779_s28 = sld [smem:[#allocation13_spill]] }
 0x487   : > { %2516 = vrot.lane.b32.xlu1 %v2471_v29, %s5555_s29 }
 0x488   : > { %2514 = vrot.lane.b32.xlu0 %v2470_v21, %s5555_s29  ;;  %s5560_s29 = smov 116  }
 0x48a   : > { %v2629_v38 = vld [vmem:[%s6779_s28] sm:$0xf]  ;;  %s5559_s28 = smov 118  }
 0x48b   : > { %2526 = vrot.lane.b32.xlu1 %v2471_v29, %s5556_s3 }
 0x48c   : > { %2524 = vrot.lane.b32.xlu0 %v2470_v21, %s5556_s3  ;;  %s5561_s3 = smov 117  }
 0x48f   : > { %2803 = vperm.xlu1 %5372, %v2785_v44  }
 0x490   : > { %2793 = vperm.xlu0 %5371, %v2785_v44  }
 0x493   : > { %5373 = vset.pattern.permute.xlu1 %v5531_v31 }
 0x494   : > { %5374 = vset.pattern.permute.xlu0 %v5533_v33  ;;  %2813 = vperm.xlu1 %5373, %v2785_v44  }
 0x495   : > { %2823 = vperm.xlu0 %5374, %v2785_v44  }
 0x498   : > { %5375 = vset.pattern.permute.xlu1 %v5532_v32 }
 0x499   : > { %5377 = vset.pattern.permute.xlu0 %v5536_v36  ;;  %2833 = vperm.xlu1 %5375, %v2785_v44  }
 0x49a   : > { %2853 = vperm.xlu0 %5377, %v2785_v44  }
 0x49d   : > { %5376 = vset.pattern.permute.xlu1 %v6782_v26 }
 0x49e   : > { %5380 = vset.pattern.permute.xlu0 %v6783_v12  ;;  %2843 = vperm.xlu1 %5376, %v2785_v44  }
 0x4e9   : > { %v2477_v40 = vpop.permute.xlu1 %2476 }
 0x4ea   : > { %v2475_v25 = vpop.permute.xlu0 %2474  ;;  %v2483_v63 = vmax.f32 %v2471_v29, %v2477_v40  ;;  %v6784_v29 = vmov 8  }
 0x4eb   : > { %v2479_v34 = vsel %vm2478_vm6, %v2475_v25, %v2477_v40  ;;  %5378 = vset.pattern.permute.xlu1 %v6784_v29 }
 0x4ec   : > { %v2482_v4 = vmax.f32 %v2470_v21, %v2479_v34  ;;  %2863 = vperm.xlu1 %5378, %v2785_v44  }
 0x4ed   : > { %v2487_v61 = vpop.permute.xlu1 %2486 }
 0x4ee   : > { %v2485_v51 = vpop.permute.xlu0 %2484  ;;  %v2493_v16 = vmax.f32 %v2483_v63, %v2487_v61 }
 0x4ef   : > { %v2489_v39 = vsel %vm2488_vm7, %v2485_v51, %v2487_v61  ;;  %v2872_v51 = vld [vmem:[%s6741_s22] sm:$0xff] }
 0x4f0   : > { %v2492_v11 = vmax.f32 %v2482_v4, %v2489_v39  ;;  %5379 = vset.pattern.permute.xlu1 %v6783_v12 }
 0x4f1   : > { %v2497_v24 = vpop.permute.xlu1 %2496  ;;  %2788 = vperm.xlu1 %5379, %v2785_v44  }
 0x4f2   : > { %v2495_v58 = vpop.permute.xlu0 %2494  ;;  %v2503_v48 = vmax.f32 %v2493_v16, %v2497_v24 }
 0x4f3   : > { %v2499_v20 = vsel %vm2498_vm8, %v2495_v58, %v2497_v24  ;;  %v2873_v24 = vld [vmem:[%s6741_s22 + $0x8] sm:$0x1f] }
 0x4f4   : > { %v2502_v13 = vmax.f32 %v2492_v11, %v2499_v20  ;;  %v6409_v63 = vpack.c.bf16 %v2873_v24, %v2872_v51  ;;  %v2967_v24 = vld [vmem:[%s6730_s11] sm:$0xf] }
 0x4f5   : > { %v2507_v60 = vpop.permute.xlu1 %2506  ;;  %5381 = vset.pattern.permute.xlu1 %v6785_v5 }
 0x4f6   : > { %v2505_v10 = vpop.permute.xlu0 %2504  ;;  %v2513_v55 = vmax.f32 %v2503_v48, %v2507_v60 }
 0x4f7   : > { %v2509_v56 = vsel %vm2508_vm9, %v2505_v10, %v2507_v60 }
 0x4f8   : > { %v2512_v30 = vmax.f32 %v2502_v13, %v2509_v56  ;;  %v2874_v56 = vld [vmem:[%s6729_s10] sm:$0xf] }
 0x4f9   : > { %v2517_v52 = vpop.permute.xlu1 %2516 }
 0x4fa   : > { %v2515_v14 = vpop.permute.xlu0 %2514  ;;  %v2523_v15 = vmax.f32 %v2513_v55, %v2517_v52 }
 0x4fb   : > { %v2519_v7 = vsel %vm2518_vm10, %v2515_v14, %v2517_v52 }
 0x4fc   : > { %v2522_v46 = vmax.f32 %v2512_v30, %v2519_v7 }
 0x4fd   : > { %v2527_v9 = vpop.permute.xlu1 %2526 }
 0x4fe   : > { %v2533_v22 = vmax.f32 %v2523_v15, %v2527_v9  ;;  %v2525_v28 = vpop.permute.xlu0 %2524 }
 0x4ff   : > { %v2529_v37 = vsel %vm2528_vm11, %v2525_v28, %v2527_v9 }
 0x500   : > { %v2532_v8 = vmax.f32 %v2522_v46, %v2529_v37  ;;  %4807 = vmatprep.mubr.msk.f32.mxu1 %vm2551_vm12, %v2533_v22 }
 0x502   : > { %2624 = vmatmul.mubr.f32.vlgmr.msra.gmra.mrb[12].mxu1 %v2532_v8 }
 0x503   : > { %4896 = vmatprep.mubr.msk.f32.mxu1 %vm5557_vm13, %v5527_v0 }
 0x50e   : > { %v2804_v35 = vpop.permute.xlu1 %2803 }
 0x50f   : > { %v2794_v19 = vpop.permute.xlu0 %2793 }
 0x513   : > { %v2814_v17 = vpop.permute.xlu1 %2813 }
 0x514   : > { %v2824_v61 = vpop.permute.xlu0 %2823 }
 0x518   : > { %v2834_v3 = vpop.permute.xlu1 %2833 }
 0x519   : > { %v2854_v10 = vpop.permute.xlu0 %2853 }
 0x51d   : > { %v2844_v60 = vpop.permute.xlu1 %2843 }
 0x56b   : > { %v2864_v20 = vpop.permute.xlu1 %2863 }
 0x570   : > { %v2789_v52 = vpop.permute.xlu1 %2788 }
 0x5d5   : > { %v2625_v62 = vpop.f32.mrb[12].mxu1 }
 0x5d6   : > { %v2627_v2 = vpop.f32.mrb[13].mxu1  ;;  %4895 = vmatpush3.msk.msra.mxu1 %vm1069_vm1, %v2625_v62 }
 0x5d7   : > { %4897 = vmatmul.mubr.msk.f32.vlgmr.msra.gmra.mrb[14].mxu1 %vm1065_vm2, %v2629_v38  ;;  %5233 = vmatprep.subr.bf16.mxu1 %v5550_v27 }
 0x5d8   : > { %5236 = vmatpush3.bf16.msk.msra.mxu1 %vm6373_vm14, %v6369_v1  ;;  %4903 = vmatprep.mubr.msk.f32.mxu1 %vm5557_vm13, %v5527_v0 }
 0x5d9   : > { %5237 = vmatprep.subr.bf16.mxu1 %v5550_v27 }
 0x6aa   : > { %v2702_v21 = vpop.f32.mrb[14].mxu1 }
 0x6ab   : > { %v4898_v57 = vpop.f32.mrb[15].mxu1  ;;  %4904 = vmatmul.mubr.msk.f32.vlgmr.msra.gmra.mrb[16].mxu1 %vm2708_vm15, %v2702_v21 }
 0x6ac   : > { %4910 = vmatprep.mubr.msk.f32.mxu1 %vm5557_vm13, %v5527_v0  ;;  %5240 = vmatpush3.bf16.msk.msra.mxu1 %vm6412_vm3, %v6409_v63 }
 0x6ad   : > { %4913 = vmatprep.subr.mxu1 %v5527_v0 }
 0x77e   : > { %v2781_v6 = vpop.f32.mrb[16].mxu1 }
 0x77f   : > { %v4905_v23 = vpop.f32.mrb[17].mxu1  ;;  %v2806_v40 = vmul.f32 %v2804_v35, %v2781_v6  ;;  %v2796_v25 = vmul.f32 %v2794_v19, %v2781_v6  ;;  %v2816_v58 = vmul.f32 %v2814_v17, %v2781_v6  ;;  %v2826_v34 = vmul.f32 %v2824_v61, %v2781_v6 }
 0x780   : > { %v2836_v4 = vmul.f32 %v2834_v3, %v2781_v6  ;;  %v2846_v16 = vmul.f32 %v2844_v60, %v2781_v6  ;;  %v2856_v11 = vmul.f32 %v2854_v10, %v2781_v6  ;;  %v2866_v48 = vmul.f32 %v2864_v20, %v2781_v6 }
 0x781   : > { %2808 = vrot.lane.b32.xlu1 %v2806_v40, %s5537_s25  ;;  %2798 = vrot.lane.b32.xlu0 %v2796_v25, %s5538_s8  ;;  %v2791_v13 = vmul.f32 %v2789_v52, %v2781_v6 }
 0x785   : > { %2818 = vrot.lane.b32.xlu0 %v2816_v58, %s5548_s27  ;;  %2828 = vrot.lane.b32.xlu1 %v2826_v34, %s6788_s2  ;;  %v3117_v58 = vld [vmem:[%s6731_s12] sm:$0xf]  ;;  %v6789_v34 = vmov 2  }
 0x789   : > { %2838 = vrot.lane.b32.xlu0 %v2836_v4, %s5558_s7  ;;  %2848 = vrot.lane.b32.xlu1 %v2846_v16, %s5559_s28 }
 0x78d   : > { %2868 = vrot.lane.b32.xlu1 %v2866_v48, %s5560_s29  ;;  %2858 = vrot.lane.b32.xlu0 %v2856_v11, %s5561_s3 }
 0x791   : > { %2877 = vperm.xlu0 %5380, %v2874_v56   ;;  %3125 = vperm.xlu1 %5381, %v3117_v58  }
 0x795   : > { %5383 = vset.pattern.permute.xlu0 %v5531_v31  ;;  %5382 = vset.pattern.permute.xlu1 %v6789_v34 }
 0x796   : > { %3145 = vperm.xlu0 %5383, %v3117_v58   ;;  %3135 = vperm.xlu1 %5382, %v3117_v58  }
 0x79a   : > { %5386 = vset.pattern.permute.xlu0 %v6782_v26  ;;  %5384 = vset.pattern.permute.xlu1 %v5533_v33 }
 0x79b   : > { %3175 = vperm.xlu0 %5386, %v3117_v58   ;;  %3155 = vperm.xlu1 %5384, %v3117_v58  }
 0x79f   : > { %5389 = vset.pattern.permute.xlu0 %v6783_v12  ;;  %5385 = vset.pattern.permute.xlu1 %v5532_v32 }
 0x7a0   : > { %3120 = vperm.xlu0 %5389, %v3117_v58   ;;  %3165 = vperm.xlu1 %5385, %v3117_v58  }
 0x7a4   : > { %5387 = vset.pattern.permute.xlu1 %v5536_v36 }
 0x7a5   : > { %3185 = vperm.xlu1 %5387, %v3117_v58  }
 0x7a9   : > { %5388 = vset.pattern.permute.xlu1 %v6784_v29 }
 0x7aa   : > { %3195 = vperm.xlu1 %5388, %v3117_v58  }
 0x7ae   : > { %5390 = vset.pattern.permute.xlu1 %v6785_v5 }
 0x7f3   : > { %v2809_v55 = vpop.permute.xlu1 %2808  ;;  %v2799_v14 = vpop.permute.xlu0 %2798 }
 0x7f4   : > { %v2801_v7 = vadd.f32 %v2799_v14, %v2791_v13 }
 0x7f6   : > { %v2811_v30 = vadd.f32 %v2809_v55, %v2801_v7 }
 0x7f7   : > { %v2829_v15 = vpop.permute.xlu1 %2828  ;;  %v2819_v9 = vpop.permute.xlu0 %2818 }
 0x7f8   : > { %v2821_v46 = vadd.f32 %v2819_v9, %v2811_v30 }
 0x7fa   : > { %v2831_v22 = vadd.f32 %v2829_v15, %v2821_v46  ;;  %v3204_v46 = vld [vmem:[%s6732_s13] sm:$0xf] }
 0x7fb   : > { %v2849_v28 = vpop.permute.xlu1 %2848  ;;  %v2839_v37 = vpop.permute.xlu0 %2838 }
 0x7fc   : > { %v2841_v8 = vadd.f32 %v2839_v37, %v2831_v22 }
 0x7fe   : > { %v2851_v42 = vadd.f32 %v2849_v28, %v2841_v8 }
 0x7ff   : > { %v2859_v59 = vpop.permute.xlu0 %2858  ;;  %v2869_v62 = vpop.permute.xlu1 %2868 }
 0x800   : > { %v2861_v38 = vadd.f32 %v2859_v59, %v2851_v42 }
 0x802   : > { %v2871_v2 = vadd.f32 %v2869_v62, %v2861_v38 }
 0x804   : > { %4911 = vmatmul.mubr.msk.f32.vlgmr.msra.gmra.mrb[18].mxu1 %vm2880_vm4, %v2871_v2 }
 0x805   : > { %4915 = vmatprep.mubr.msk.f32.mxu1 %vm5557_vm13, %v5527_v0 }
 0x810   : > { %v2878_v44 = vpop.permute.xlu0 %2877  ;;  %v3126_v16 = vpop.permute.xlu1 %3125 }
 0x815   : > { %v3136_v10 = vpop.permute.xlu1 %3135  ;;  %v3146_v11 = vpop.permute.xlu0 %3145 }
 0x81a   : > { %v3156_v20 = vpop.permute.xlu1 %3155  ;;  %v3176_v9 = vpop.permute.xlu0 %3175 }
 0x81f   : > { %v3166_v13 = vpop.permute.xlu1 %3165  ;;  %v3121_v8 = vpop.permute.xlu0 %3120 }
 0x824   : > { %v3186_v7 = vpop.permute.xlu1 %3185 }
 0x829   : > { %v3196_v28 = vpop.permute.xlu1 %3195 }
 0x8d7   : > { %v2954_v21 = vpop.f32.mrb[18].mxu1 }
 0x8d8   : > { %v2955_v57 = vadd.f32 %v2954_v21, %v2878_v44  ;;  %v4912_v35 = vpop.f32.mrb[19].mxu1 }
 0x8da   : > { %v2959_v17 = vmul.f32 0.044715, %v2955_v57  ;;  %v2958_v25 = vmul.f32 0.5, %v2955_v57 }
 0x8dc   : > { %v2960_v19 = vmul.f32 %v2959_v17, %v2955_v57 }
 0x8de   : > { %v2961_v3 = vmul.f32 %v2960_v19, %v2955_v57 }
 0x8e0   : > { %v2962_v6 = vadd.f32 %v2961_v3, %v2955_v57 }
 0x8e2   : > { %v2963_v23 = vmul.f32 0.7978846, %v2962_v6 }
 0x8e4   : > { %5400 = vtanh.f32 %v2963_v23 }
 0x8ee   : > { %v5401_v40 = vpop.eup %5400 }
 0x8ef   : > { %v2965_v61 = vadd.f32 1.0, %v5401_v40 }
 0x8f1   : > { %v2966_v51 = vmul.f32 %v2965_v61, %v2958_v25 }
 0x8f3   : > { %4914 = vmatpush3.msk.msra.mxu1 %vm1069_vm1, %v2966_v51 }
 0x8f4   : > { %4916 = vmatmul.mubr.msk.f32.vlgmr.msra.gmra.mrb[20].mxu1 %vm1065_vm2, %v2967_v24  ;;  %5241 = vmatprep.subr.bf16.mxu1 %v5550_v27 }
 0x8f5   : > { %5244 = vmatpush3.bf16.msk.msra.mxu1 %vm6373_vm14, %v6369_v1  ;;  %4922 = vmatprep.mubr.msk.f32.mxu1 %vm5557_vm13, %v5527_v0 }
 0x8f6   : > { %5245 = vmatprep.subr.bf16.mxu1 %v5550_v27 }
 0x9c7   : > { %v3040_v60 = vpop.f32.mrb[20].mxu1 }
 0x9c8   : > { %v4917_v4 = vpop.f32.mrb[21].mxu1  ;;  %4923 = vmatmul.mubr.msk.f32.vlgmr.msra.gmra.mrb[22].mxu1 %vm2708_vm15, %v3040_v60 }
 0x9c9   : > { %5248 = vmatpush3.bf16.msk.msra.mxu1 %vm6412_vm3, %v6409_v63  ;;  %4929 = vmatprep.mubr.msk.f32.mxu1 %vm5557_vm13, %v5527_v0 }
 0x9ca   : > { %4932 = vmatprep.subr.mxu1 %v5527_v0 }
 0xa9b   : > { %v3113_v48 = vpop.f32.mrb[22].mxu1 }
 0xa9c   : > { %v4924_v56 = vpop.f32.mrb[23].mxu1  ;;  %v3128_v5 = vmul.f32 %v3126_v16, %v3113_v48  ;;  %v3148_v52 = vmul.f32 %v3146_v11, %v3113_v48  ;;  %v3138_v55 = vmul.f32 %v3136_v10, %v3113_v48  ;;  %v3168_v14 = vmul.f32 %v3166_v13, %v3113_v48  ;;  %v3442_v13 = vld [vmem:[%s6734_s15] sm:$0xf] }
 0xa9d   : > { %v3158_v30 = vmul.f32 %v3156_v20, %v3113_v48  ;;  %v3188_v15 = vmul.f32 %v3186_v7, %v3113_v48  ;;  %v3178_v22 = vmul.f32 %v3176_v9, %v3113_v48  ;;  %v3198_v37 = vmul.f32 %v3196_v28, %v3113_v48  ;;  %v3529_v28 = vld [vmem:[%s6735_s16] sm:$0xf] }
 0xa9e   : > { %3130 = vrot.lane.b32.xlu1 %v3128_v5, %s5538_s8  ;;  %3150 = vrot.lane.b32.xlu0 %v3148_v52, %s5548_s27  ;;  %v3123_v59 = vmul.f32 %v3121_v8, %v3113_v48  ;;  %v3292_v52 = vld [vmem:[%s6733_s14] sm:$0xf]  ;;  %v4232_v8 = vld [vmem:[%s6737_s18 + $0x8] sm:$0xff] }
 0xaa2   : > { %3140 = vrot.lane.b32.xlu1 %v3138_v55, %s5537_s25  ;;  %3170 = vrot.lane.b32.xlu0 %v3168_v14, %s5558_s7 }
 0xaa6   : > { %3160 = vrot.lane.b32.xlu1 %v3158_v30, %s6788_s2  ;;  %3190 = vrot.lane.b32.xlu0 %v3188_v15, %s5561_s3 }
 0xaaa   : > { %3207 = vperm.xlu0 %5389, %v3204_v46   ;;  %3180 = vrot.lane.b32.xlu1 %v3178_v22, %s5559_s28 }
 0xaae   : > { %3200 = vrot.lane.b32.xlu1 %v3198_v37, %s5560_s29  ;;  %5391 = vset.pattern.permute.xlu0 %v6789_v34  ;;  %v4231_v37 = vld [vmem:[%s6737_s18] sm:$0xff] }
 0xaaf   : > { %3460 = vperm.xlu0 %5391, %v3442_v13  }
 0xab2   : > { %3450 = vperm.xlu1 %5390, %v3442_v13  }
 0xab3   : > { %5394 = vset.pattern.permute.xlu0 %v5532_v32 }
 0xab4   : > { %3490 = vperm.xlu0 %5394, %v3442_v13  }
 0xab6   : > { %5392 = vset.pattern.permute.xlu1 %v5531_v31 }
 0xab7   : > { %3470 = vperm.xlu1 %5392, %v3442_v13  }
 0xab8   : > { %5397 = vset.pattern.permute.xlu0 %v6784_v29 }
 0xab9   : > { %3520 = vperm.xlu0 %5397, %v3442_v13  }
 0xabb   : > { %5393 = vset.pattern.permute.xlu1 %v5533_v33 }
 0xabc   : > { %3480 = vperm.xlu1 %5393, %v3442_v13  }
 0xabd   : > { %5399 = vset.pattern.permute.xlu0 %v6783_v12 }
 0xac0   : > { %5395 = vset.pattern.permute.xlu1 %v6782_v26 }
 0xac1   : > { %3500 = vperm.xlu1 %5395, %v3442_v13  }
 0xac5   : > { %5396 = vset.pattern.permute.xlu1 %v5536_v36 }
 0xac6   : > { %3510 = vperm.xlu1 %5396, %v3442_v13  }
 0xaca   : > { %5398 = vset.pattern.permute.xlu1 %v6783_v12 }
 0xacb   : > { %3445 = vperm.xlu1 %5398, %v3442_v13  }
 0xb10   : > { %v3131_v42 = vpop.permute.xlu1 %3130  ;;  %v3151_v38 = vpop.permute.xlu0 %3150 }
 0xb11   : > { %v3133_v62 = vadd.f32 %v3131_v42, %v3123_v59 }
 0xb14   : > { %v3141_v2 = vpop.permute.xlu1 %3140  ;;  %v3171_v57 = vpop.permute.xlu0 %3170 }
 0xb15   : > { %v3143_v44 = vadd.f32 %v3141_v2, %v3133_v62 }
 0xb17   : > { %v3153_v21 = vadd.f32 %v3151_v38, %v3143_v44 }
 0xb18   : > { %v3161_v35 = vpop.permute.xlu1 %3160  ;;  %v3191_v23 = vpop.permute.xlu0 %3190 }
 0xb19   : > { %v3163_v17 = vadd.f32 %v3161_v35, %v3153_v21 }
 0xb1b   : > { %v3173_v19 = vadd.f32 %v3171_v57, %v3163_v17 }
 0xb1c   : > { %v3181_v3 = vpop.permute.xlu1 %3180 }
 0xb1d   : > { %v3183_v6 = vadd.f32 %v3181_v3, %v3173_v19 }
 0xb1f   : > { %v3193_v40 = vadd.f32 %v3191_v23, %v3183_v6 }
 0xb20   : > { %v3201_v25 = vpop.permute.xlu1 %3200 }
 0xb21   : > { %v3203_v61 = vadd.f32 %v3201_v25, %v3193_v40 }
 0xb23   : > { %4930 = vmatmul.mubr.msk.f32.vlgmr.msra.gmra.mrb[24].mxu1 %vm2880_vm4, %v3203_v61 }
 0xb24   : > { %4934 = vmatprep.mubr.msk.f32.mxu1 %vm5557_vm13, %v5527_v0 }
 0xb29   : > { %v3208_v51 = vpop.permute.xlu0 %3207 }
 0xb31   : > { %v3451_v33 = vpop.permute.xlu1 %3450 }
 0xb36   : > { %v3471_v36 = vpop.permute.xlu1 %3470 }
 0xbf6   : > { %v3279_v24 = vpop.f32.mrb[24].mxu1 }
 0xbf7   : > { %v3280_v58 = vadd.f32 %v3279_v24, %v3208_v51  ;;  %v4931_v34 = vpop.f32.mrb[25].mxu1 }
 0xbf9   : > { %v3284_v60 = vmul.f32 0.044715, %v3280_v58  ;;  %v3283_v48 = vmul.f32 0.5, %v3280_v58 }
 0xbfb   : > { %v3285_v4 = vmul.f32 %v3284_v60, %v3280_v58  ;;  %v3625_v60 = vld [vmem:[%s6791_s6] sm:$0xf] }
 0xbfd   : > { %v3286_v16 = vmul.f32 %v3285_v4, %v3280_v58  ;;  %v3610_v4 = vld [vmem:[%s6742_s23 + $0x10] sm:$0xff] }
 0xbff   : > { %v3287_v10 = vadd.f32 %v3286_v16, %v3280_v58  ;;  %v3617_v58 = vld [vmem:[%s6742_s23 + $0x48] sm:$0x1]  ;;  %v3618_v16 = vld [vmem:[%s6742_s23 + $0x50] sm:$0x1] }
 0xc01   : > { %v3288_v20 = vmul.f32 0.7978846, %v3287_v10  ;;  %v3613_v10 = vld [vmem:[%s6742_s23 + $0x28] sm:$0xff] }
 0xc03   : > { %5402 = vtanh.f32 %v3288_v20  ;;  %v3621_v20 = vld [vmem:[%s6742_s23 + $0x68] sm:$0x1] }
 0xc04   : > { %v5269_v13 = vpack.c.bf16 %v3621_v20, %v3613_v10 }
 0xc0d   : > { %v5403_v11 = vpop.eup %5402 }
 0xc0e   : > { %v3290_v56 = vadd.f32 1.0, %v5403_v11 }
 0xc10   : > { %v3291_v5 = vmul.f32 %v3290_v56, %v3283_v48  ;;  %v5266_v56 = vpack.c.bf16 %v3618_v16, %v3610_v4 }
 0xc12   : > { %4933 = vmatpush3.msk.msra.mxu1 %vm1069_vm1, %v3291_v5 }
 0xc13   : > { %4935 = vmatmul.mubr.msk.f32.vlgmr.msra.gmra.mrb[26].mxu1 %vm1065_vm2, %v3292_v52  ;;  %5249 = vmatprep.subr.bf16.mxu1 %v5550_v27 }
 0xc14   : > { %5252 = vmatpush3.bf16.msk.msra.mxu1 %vm6373_vm14, %v6369_v1  ;;  %4941 = vmatprep.mubr.msk.f32.mxu1 %vm5557_vm13, %v5527_v0  ;;  %v3481_v1 = vpop.permute.xlu1 %3480 }
 0xc15   : > { %5253 = vmatprep.subr.bf16.mxu1 %v5550_v27  ;;  %v3461_v27 = vpop.permute.xlu0 %3460 }
 0xc18   : > { %v3501_v7 = vpop.permute.xlu1 %3500 }
 0xc19   : > { %v3491_v39 = vpop.permute.xlu0 %3490 }
 0xc1c   : > { %v3511_v9 = vpop.permute.xlu1 %3510 }
 0xc1d   : > { %v3521_v15 = vpop.permute.xlu0 %3520 }
 0xc20   : > { %v3446_v42 = vpop.permute.xlu1 %3445 }
 0xce6   : > { %v3365_v31 = vpop.f32.mrb[26].mxu1 }
 0xce7   : > { %v4936_v32 = vpop.f32.mrb[27].mxu1  ;;  %4942 = vmatmul.mubr.msk.f32.vlgmr.msra.gmra.mrb[28].mxu1 %vm2708_vm15, %v3365_v31  ;;  %v3612_v31 = vld [vmem:[%s6742_s23 + $0x20] sm:$0xff] }
 0xce8   : > { %5256 = vmatpush3.bf16.msk.msra.mxu1 %vm6412_vm3, %v6409_v63  ;;  %4948 = vmatprep.mubr.msk.f32.mxu1 %vm5557_vm13, %v5527_v0  ;;  %v3620_v32 = vld [vmem:[%s6742_s23 + $0x60] sm:$0x1] }
 0xce9   : > { %4826 = vmatprep.subr.msk.mxu1 %vm1069_vm1, %v5790_v41 }
 0xdba   : > { %v3438_v26 = vpop.f32.mrb[28].mxu1 }
 0xdbb   : > { %v4943_v12 = vpop.f32.mrb[29].mxu1  ;;  %v3453_v29 = vmul.f32 %v3451_v33, %v3438_v26  ;;  %v3463_v55 = vmul.f32 %v3461_v27, %v3438_v26  ;;  %v3473_v63 = vmul.f32 %v3471_v36, %v3438_v26  ;;  %v3483_v14 = vmul.f32 %v3481_v1, %v3438_v26  ;;  %v3615_v33 = vld [vmem:[%s6742_s23 + $0x38] sm:$0xff] }
 0xdbc   : > { %v3503_v41 = vmul.f32 %v3501_v7, %v3438_v26  ;;  %v3493_v30 = vmul.f32 %v3491_v39, %v3438_v26  ;;  %v3523_v46 = vmul.f32 %v3521_v15, %v3438_v26  ;;  %v3513_v22 = vmul.f32 %v3511_v9, %v3438_v26  ;;  %v3623_v36 = vld [vmem:[%s6742_s23 + $0x78] sm:$0x1]  ;;  %v3622_v12 = vld [vmem:[%s6742_s23 + $0x70] sm:$0x1] }
 0xdbd   : > { %3455 = vrot.lane.b32.xlu1 %v3453_v29, %s5538_s8  ;;  %3465 = vrot.lane.b32.xlu0 %v3463_v55, %s5537_s25  ;;  %v3448_v59 = vmul.f32 %v3446_v42, %v3438_v26  ;;  %v5272_v27 = vpack.c.bf16 %v3620_v32, %v3612_v31  ;;  %v5275_v1 = vpack.c.bf16 %v3623_v36, %v3615_v33  ;;  %v3614_v26 = vld [vmem:[%s6742_s23 + $0x30] sm:$0xff]  ;;  %s6792_s25 = sshll.u32 %s6794_s26, 7 }
 0xdbe   : > { %v5278_v29 = vpack.c.bf16 %v3622_v12, %v3614_v26 }
 0xdc1   : > { %3475 = vrot.lane.b32.xlu1 %v3473_v63, %s5548_s27  ;;  %3485 = vrot.lane.b32.xlu0 %v3483_v14, %s6788_s2  ;;  %s6681_s2 = scalar_lea.vmem %s6743_s24, %s6792_s25 }
 0xdc5   : > { %3505 = vrot.lane.b32.xlu0 %v3503_v41, %s5559_s28  ;;  %3495 = vrot.lane.b32.xlu1 %v3493_v30, %s5558_s7  ;;  %v3918_v41 = vld [vmem:[%s6736_s17] sm:$0xff] }
 0xdc9   : > { %3515 = vrot.lane.b32.xlu1 %v3513_v22, %s5561_s3  ;;  %3525 = vrot.lane.b32.xlu0 %v3523_v46, %s5560_s29  ;;  %s6790_s3 = sld [smem:[#allocation8_spill]]  ;;  %v3919_v46 = vld [vmem:[%s6736_s17 + $0x8] sm:$0xff] }
 0xdcd   : > { %3532 = vperm.xlu1 %5398, %v3529_v28   ;;  %3628 = vperm.xlu0 %5399, %v3625_v60  }
 0xdcf   : > { %v3624_v24 = vld [vmem:[%s6790_s3] sm:$0xf] }
 0xdd1   : > { %4235 = vperm.xlu1 %5398, %v4231_v37  }
 0xdd5   : > { %4240 = vperm.xlu1 %5398, %v4232_v8  }
 0xe2f   : > { %v3456_v38 = vpop.permute.xlu1 %3455  ;;  %v3466_v62 = vpop.permute.xlu0 %3465 }
 0xe30   : > { %v3458_v2 = vadd.f32 %v3456_v38, %v3448_v59 }
 0xe32   : > { %v3468_v44 = vadd.f32 %v3466_v62, %v3458_v2 }
 0xe33   : > { %v3476_v21 = vpop.permute.xlu1 %3475  ;;  %v3486_v57 = vpop.permute.xlu0 %3485 }
 0xe34   : > { %v3478_v35 = vadd.f32 %v3476_v21, %v3468_v44 }
 0xe36   : > { %v3488_v17 = vadd.f32 %v3486_v57, %v3478_v35 }
 0xe37   : > { %v3496_v19 = vpop.permute.xlu1 %3495  ;;  %v3506_v3 = vpop.permute.xlu0 %3505 }
 0xe38   : > { %v3498_v6 = vadd.f32 %v3496_v19, %v3488_v17 }
 0xe3a   : > { %v3508_v23 = vadd.f32 %v3506_v3, %v3498_v6 }
 0xe3b   : > { %v3516_v40 = vpop.permute.xlu1 %3515  ;;  %v3526_v61 = vpop.permute.xlu0 %3525 }
 0xe3c   : > { %v3518_v25 = vadd.f32 %v3516_v40, %v3508_v23 }
 0xe3e   : > { %v3528_v51 = vadd.f32 %v3526_v61, %v3518_v25 }
 0xe40   : > { %4949 = vmatmul.mubr.msk.f32.vlgmr.msra.gmra.mrb[30].mxu1 %vm2880_vm4, %v3528_v51 }
 0xe41   : > { %4827 = vmatpush1.msk.msra.mxu1 %vm1069_vm1, %v5792_v43  ;;  %3698 = vmatprep.mubr.f32.mxu1 %v5527_v0  ;;  %v3609_v43 = vld [vmem:[%s6742_s23 + $0x8] sm:$0xff] }
 0xe42   : > { %4829 = vmatprep.subr.msk.mxu1 %vm1069_vm1, %v5805_v49  ;;  %v5257_v49 = vpack.c.bf16 %v3617_v58, %v3609_v43 }
 0xe44   : > { %4828 = vmatmul.mubr.msk.f32.vlgmr.msra.gmra.mrb[32].mxu1 %vm1065_vm2, %v3624_v24 }
 0xe45   : > { %4830 = vmatpush1.msk.msra.mxu1 %vm1069_vm1, %v5810_v50  ;;  %3769 = vmatprep.mubr.f32.mxu1 %v5527_v0 }
 0xe46   : > { %4832 = vmatprep.subr.msk.mxu1 %vm1069_vm1, %v5797_v45  ;;  %v3608_v45 = vld [vmem:[%s6742_s23] sm:$0xff] }
 0xe48   : > { %4831 = vmatmul.mubr.msk.f32.vlgmr.msra.gmra.mrb[34].mxu1 %vm1065_vm2, %v3624_v24 }
 0xe49   : > { %4833 = vmatpush1.msk.msra.mxu1 %vm1069_vm1, %v5801_v47  ;;  %3840 = vmatprep.mubr.f32.mxu1 %v5527_v0  ;;  %v3616_v47 = vld [vmem:[%s6742_s23 + $0x40] sm:$0x1] }
 0xe4a   : > { %4835 = vmatprep.subr.msk.mxu1 %vm1069_vm1, %v5819_v53  ;;  %v5260_v50 = vpack.c.bf16 %v3616_v47, %v3608_v45  ;;  %v3611_v53 = vld [vmem:[%s6742_s23 + $0x18] sm:$0xff] }
 0xe4c   : > { %4834 = vmatmul.mubr.msk.f32.vlgmr.msra.gmra.mrb[36].mxu1 %vm1065_vm2, %v3624_v24  ;;  %v3533_v11 = vpop.permute.xlu1 %3532  ;;  %v3629_v55 = vpop.permute.xlu0 %3628 }
 0xe4d   : > { %4836 = vmatpush1.msk.msra.mxu1 %vm1069_vm1, %v5823_v54  ;;  %3911 = vmatprep.mubr.f32.mxu1 %v5527_v0  ;;  %v3619_v54 = vld [vmem:[%s6742_s23 + $0x58] sm:$0x1] }
 0xe4e   : > { %5259 = vmatprep.subr.msk.bf16.mxu1 %vm6373_vm14, %v5257_v49  ;;  %v5263_v34 = vpack.c.bf16 %v3619_v54, %v3611_v53 }
 0xe50   : > { %4837 = vmatmul.mubr.msk.f32.vlgmr.msra.gmra.mrb[38].mxu1 %vm1065_vm2, %v3624_v24  ;;  %v6657_v2 = vpop.permute.xlu1 %4235 }
 0xe51   : > { %4011 = vmatprep.mubr.f32.mxu1 %v5527_v0  ;;  %5262 = vmatpush1.bf16.msk.msra.mxu1 %vm6373_vm14, %v5260_v50 }
 0xe52   : > { %5265 = vmatprep.subr.msk.bf16.mxu1 %vm6373_vm14, %v5263_v34 }
 0xe54   : > { %v6661_v19 = vpop.permute.xlu1 %4240 }
 0xf13   : > { %v3604_v48 = vpop.f32.mrb[30].mxu1 }
 0xf14   : > { %v3605_v5 = vadd.f32 %v3604_v48, %v3533_v11  ;;  %v4950_v52 = vpop.f32.mrb[31].mxu1 }
 0xf16   : > { %4840 = vmatmul.mubr.msk.f32.vlgmr.msra.gmra.mrb[32].mxu1 %vm2708_vm15, %v3605_v5 }
 0xf17   : > { %5268 = vmatpush1.bf16.msk.msra.mxu1 %vm6373_vm14, %v5266_v56  ;;  %4082 = vmatprep.mubr.f32.mxu1 %v5527_v0 }
 0xf18   : > { %5271 = vmatprep.subr.msk.bf16.mxu1 %vm6373_vm14, %v5269_v13 }
 0xf1a   : > { %4843 = vmatmul.mubr.msk.f32.vlgmr.msra.gmra.mrb[34].mxu1 %vm2708_vm15, %v3605_v5 }
 0xf1b   : > { %5274 = vmatpush1.bf16.msk.msra.mxu1 %vm6373_vm14, %v5272_v27  ;;  %4153 = vmatprep.mubr.f32.mxu1 %v5527_v0 }
 0xf1c   : > { %5277 = vmatprep.subr.msk.bf16.mxu1 %vm6373_vm14, %v5275_v1 }
 0xf1e   : > { %4846 = vmatmul.mubr.msk.f32.vlgmr.msra.gmra.mrb[36].mxu1 %vm2708_vm15, %v3605_v5 }
 0xf1f   : > { %5280 = vmatpush1.bf16.msk.msra.mxu1 %vm6373_vm14, %v5278_v29  ;;  %4224 = vmatprep.mubr.f32.mxu1 %v5527_v0 }
 0xf22   : > { %4849 = vmatmul.mubr.msk.f32.vlgmr.msra.gmra.mrb[38].mxu1 %vm2708_vm15, %v3605_v5 }
 0xf23   : > { %4337 = vmatprep.mubr.f32.mxu1 %v5527_v0 }
 0xfe9   : > { %v4013_v39 = vpop.f32.mrb[32].mxu1 }
 0xfea   : > { %v4015_v63 = vpop.f32.mrb[33].mxu1  ;;  %v5285_v7 = vadd.f32 %v4013_v39, %v3629_v55 }
 0xfeb   : > { %v5286_v14 = vadd.f32 %v4015_v63, %v3629_v55 }
 0xfed   : > { %v4084_v30 = vpop.f32.mrb[34].mxu1  ;;  %4850 = vmatprep.subr.msk.mxu1 %vm1069_vm1, %v5286_v14 }
 0xfee   : > { %v4086_v18 = vpop.f32.mrb[35].mxu1  ;;  %4851 = vmatpush1.msk.msra.mxu1 %vm1069_vm1, %v5285_v7  ;;  %v5287_v9 = vadd.f32 %v4084_v30, %v3629_v55 }
 0xfef   : > { %v5288_v15 = vadd.f32 %v4086_v18, %v3629_v55  ;;  %4852 = vmatmul.mubr.msk.f32.vlgmr.msra.gmra.mrb[40].mxu1 %vm1065_vm2, %v3918_v41 }
 0xff0   : > { %4343 = vmatprep.mubr.f32.mxu1 %v5527_v0 }
 0xff1   : > { %v4155_v22 = vpop.f32.mrb[36].mxu1  ;;  %4854 = vmatprep.subr.msk.mxu1 %vm1069_vm1, %v5288_v15 }
 0xff2   : > { %v4157_v28 = vpop.f32.mrb[37].mxu1  ;;  %4855 = vmatpush1.msk.msra.mxu1 %vm1069_vm1, %v5287_v9  ;;  %v5289_v42 = vadd.f32 %v4155_v22, %v3629_v55 }
 0xff3   : > { %v5290_v37 = vadd.f32 %v4157_v28, %v3629_v55  ;;  %4853 = vmatmul.mubr.msk.f32.gmra.mrb[42].mxu1 %vm1065_vm2, %v3919_v46 }
 0xff4   : > { %4414 = vmatprep.mubr.f32.mxu1 %v5527_v0 }
 0xff5   : > { %v4226_v8 = vpop.f32.mrb[38].mxu1  ;;  %4858 = vmatprep.subr.msk.mxu1 %vm1069_vm1, %v5290_v37 }
 0xff6   : > { %v4228_v59 = vpop.f32.mrb[39].mxu1  ;;  %v5291_v62 = vadd.f32 %v4226_v8, %v3629_v55 }
 0xff7   : > { %v5292_v38 = vadd.f32 %v4228_v59, %v3629_v55  ;;  %4856 = vmatmul.mubr.msk.f32.vlgmr.msra.gmra.mrb[44].mxu1 %vm1065_vm2, %v3918_v41 }
 0xff8   : > { %4859 = vmatpush1.msk.msra.mxu1 %vm1069_vm1, %v5289_v42  ;;  %4420 = vmatprep.mubr.f32.mxu1 %v5527_v0 }
 0xff9   : > { %4862 = vmatprep.subr.msk.mxu1 %vm1069_vm1, %v5292_v38 }
 0xffb   : > { %4857 = vmatmul.mubr.msk.f32.gmra.mrb[46].mxu1 %vm1065_vm2, %v3919_v46 }
 0xffc   : > { %4491 = vmatprep.mubr.f32.mxu1 %v5527_v0 }
 0xfff   : > { %4860 = vmatmul.mubr.msk.f32.vlgmr.msra.gmra.mrb[48].mxu1 %vm1065_vm2, %v3918_v41 }
0x1000   : > { %4863 = vmatpush1.msk.msra.mxu1 %vm1069_vm1, %v5291_v62  ;;  %4497 = vmatprep.mubr.f32.mxu1 %v5527_v0 }
0x1003   : > { %4861 = vmatmul.mubr.msk.f32.gmra.mrb[50].mxu1 %vm1065_vm2, %v3919_v46 }
0x1004   : > { %4568 = vmatprep.mubr.f32.mxu1 %v5527_v0 }
0x1007   : > { %4864 = vmatmul.mubr.msk.f32.vlgmr.msra.gmra.mrb[52].mxu1 %vm1065_vm2, %v3918_v41 }
0x1008   : > { %4574 = vmatprep.mubr.f32.mxu1 %v5527_v0 }
0x100b   : > { %4865 = vmatmul.mubr.msk.f32.gmra.mrb[54].mxu1 %vm1065_vm2, %v3919_v46 }
0x10c2   : > { %v4339_v44 = vpop.f32.mrb[40].mxu1 }
0x10c3   : > { %v4340_v21 = vadd.f32 %v4339_v44, %v6657_v2  ;;  %v4341_v57 = vpop.f32.mrb[41].mxu1 }
0x10c4   : > { %v4342_v35 = vadd.f32 %v4341_v57, %v6657_v2 }
0x10c5   : > { %v4581_v17 = vsub.f32 0.0, %v4340_v21 }
0x10c6   : > { %v4582_v3 = vsub.f32 0.0, %v4342_v35  ;;  %v4345_v6 = vpop.f32.mrb[42].mxu1 }
0x10c7   : > { %v4597_v23 = vmul.f32 1.442695, %v4581_v17  ;;  %v4346_v40 = vadd.f32 %v4345_v6, %v6661_v19  ;;  %v4347_v25 = vpop.f32.mrb[43].mxu1 }
0x10c8   : > { %v4599_v0 = vmul.f32 1.442695, %v4582_v3  ;;  %v4348_v61 = vadd.f32 %v4347_v25, %v6661_v19 }
0x10c9   : > { %5404 = vpow2.f32 %v4597_v23  ;;  %v4589_v51 = vsub.f32 0.0, %v4346_v40 }
0x10ca   : > { %5406 = vpow2.f32 %v4599_v0  ;;  %v4590_v24 = vsub.f32 0.0, %v4348_v61  ;;  %v4416_v43 = vpop.f32.mrb[44].mxu1 }
0x10cb   : > { %v4613_v58 = vmul.f32 1.442695, %v4589_v51  ;;  %v4417_v49 = vadd.f32 %v4416_v43, %v6657_v2  ;;  %v4418_v45 = vpop.f32.mrb[45].mxu1 }
0x10cc   : > { %v4615_v47 = vmul.f32 1.442695, %v4590_v24  ;;  %v4419_v50 = vadd.f32 %v4418_v45, %v6657_v2  ;;  %v5468_v24 = vld [vmem:[%s5745_s30] sm:$0xff]  ;;  %v5469_v45 = vld [vmem:[%s5745_s30 + $0x8] sm:$0xff] }
0x10cd   : > { %5408 = vpow2.f32 %v4613_v58  ;;  %v4583_v53 = vsub.f32 0.0, %v4417_v49 }
0x10ce   : > { %5410 = vpow2.f32 %v4615_v47  ;;  %v4584_v54 = vsub.f32 0.0, %v4419_v50  ;;  %v4422_v34 = vpop.f32.mrb[46].mxu1 }
0x10cf   : > { %v4601_v60 = vmul.f32 1.442695, %v4583_v53  ;;  %v4423_v4 = vadd.f32 %v4422_v34, %v6661_v19  ;;  %v4424_v16 = vpop.f32.mrb[47].mxu1 }
0x10d0   : > { %v4603_v10 = vmul.f32 1.442695, %v4584_v54  ;;  %v4425_v20 = vadd.f32 %v4424_v16, %v6661_v19 }
0x10d1   : > { %5412 = vpow2.f32 %v4601_v60  ;;  %v4591_v11 = vsub.f32 0.0, %v4423_v4 }
0x10d2   : > { %5414 = vpow2.f32 %v4603_v10  ;;  %v4592_v48 = vsub.f32 0.0, %v4425_v20  ;;  %v4493_v56 = vpop.f32.mrb[48].mxu1  ;;  %v5470_v10 = vld [vmem:[%s5745_s30 + $0x40] sm:$0xff] }
0x10d3   : > { %v5405_v5 = vpop.eup %5404  ;;  %v4617_v52 = vmul.f32 1.442695, %v4591_v11  ;;  %v4494_v13 = vadd.f32 %v4493_v56, %v6657_v2  ;;  %v4495_v31 = vpop.f32.mrb[49].mxu1 }
0x10d4   : > { %v5407_v32 = vpop.eup %5406  ;;  %v4629_v33 = vadd.f32 1.0, %v5405_v5  ;;  %v4619_v36 = vmul.f32 1.442695, %v4592_v48  ;;  %v4496_v27 = vadd.f32 %v4495_v31, %v6657_v2  ;;  %v5471_v48 = vld [vmem:[%s5745_s30 + $0x48] sm:$0xff] }
0x10d5   : > { %v4630_v1 = vadd.f32 1.0, %v5407_v32  ;;  %5416 = vpow2.f32 %v4617_v52  ;;  %v4585_v26 = vsub.f32 0.0, %v4494_v13 }
0x10d6   : > { %5418 = vrcp.f32 %v4629_v33  ;;  %v4586_v12 = vsub.f32 0.0, %v4496_v27  ;;  %v4499_v29 = vpop.f32.mrb[50].mxu1  ;;  %v5472_v33 = vld [vmem:[%s5745_s30 + $0x10] sm:$0xff] }
0x10d7   : > { %v5409_v55 = vpop.eup %5408  ;;  %5420 = vrcp.f32 %v4630_v1  ;;  %v4605_v39 = vmul.f32 1.442695, %v4585_v26  ;;  %v4500_v63 = vadd.f32 %v4499_v29, %v6661_v19  ;;  %v4501_v14 = vpop.f32.mrb[51].mxu1  ;;  %v5473_v1 = vld [vmem:[%s5745_s30 + $0x18] sm:$0xff] }
0x10d8   : > { %v5411_v7 = vpop.eup %5410  ;;  %v4637_v41 = vadd.f32 1.0, %v5409_v55  ;;  %5422 = vpow2.f32 %v4619_v36  ;;  %v4607_v30 = vmul.f32 1.442695, %v4586_v12  ;;  %v4502_v18 = vadd.f32 %v4501_v14, %v6661_v19  ;;  %v5474_v14 = vld [vmem:[%s5745_s30 + $0x50] sm:$0xff] }
0x10d9   : > { %v4638_v15 = vadd.f32 1.0, %v5411_v7  ;;  %5424 = vpow2.f32 %v4605_v39  ;;  %v4593_v9 = vsub.f32 0.0, %v4500_v63 }
0x10da   : > { %5426 = vrcp.f32 %v4637_v41  ;;  %v4594_v46 = vsub.f32 0.0, %v4502_v18  ;;  %v4570_v22 = vpop.f32.mrb[52].mxu1 }
0x10db   : > { %v5413_v28 = vpop.eup %5412  ;;  %5428 = vrcp.f32 %v4638_v15  ;;  %v4621_v37 = vmul.f32 1.442695, %v4593_v9  ;;  %v4571_v8 = vadd.f32 %v4570_v22, %v6657_v2  ;;  %v4572_v42 = vpop.f32.mrb[53].mxu1  ;;  %v5475_v15 = vld [vmem:[%s5745_s30 + $0x58] sm:$0xff]  ;;  %v5476_v22 = vld [vmem:[%s5745_s30 + $0x20] sm:$0xff] }
0x10dc   : > { %v5415_v59 = vpop.eup %5414  ;;  %v4631_v38 = vadd.f32 1.0, %v5413_v28  ;;  %5430 = vpow2.f32 %v4607_v30  ;;  %v4623_v62 = vmul.f32 1.442695, %v4594_v46  ;;  %v4573_v44 = vadd.f32 %v4572_v42, %v6657_v2 }
0x10dd   : > { %v4632_v21 = vadd.f32 1.0, %v5415_v59  ;;  %5432 = vpow2.f32 %v4621_v37  ;;  %v4587_v57 = vsub.f32 0.0, %v4571_v8 }
0x10de   : > { %5434 = vrcp.f32 %v4631_v38  ;;  %v4588_v35 = vsub.f32 0.0, %v4573_v44  ;;  %v4576_v17 = vpop.f32.mrb[54].mxu1 }
0x10df   : > { %v5417_v3 = vpop.eup %5416  ;;  %5436 = vrcp.f32 %v4632_v21  ;;  %v4609_v6 = vmul.f32 1.442695, %v4587_v57  ;;  %v4577_v23 = vadd.f32 %v4576_v17, %v6661_v19  ;;  %v4578_v40 = vpop.f32.mrb[55].mxu1  ;;  %v5478_v21 = vld [vmem:[%s5745_s30 + $0x60] sm:$0xff] }
0x10e0   : > { %v5419_v25 = vpop.eup %5418  ;;  %v4639_v2 = vadd.f32 1.0, %v5417_v3  ;;  %5438 = vpow2.f32 %v4623_v62  ;;  %v4611_v0 = vmul.f32 1.442695, %v4588_v35  ;;  %v4579_v61 = vadd.f32 %v4578_v40, %v6661_v19  ;;  %v5477_v62 = vld [vmem:[%s5745_s30 + $0x28] sm:$0xff] }
0x10e1   : > { %v5421_v51 = vpop.eup %5420  ;;  %v4677_v43 = vmul.f32 %v5468_v24, %v5419_v25  ;;  %5440 = vpow2.f32 %v4609_v6  ;;  %v4595_v58 = vsub.f32 0.0, %v4577_v23  ;;  %v5479_v3 = vld [vmem:[%s5745_s30 + $0x68] sm:$0xff]  ;;  %v5480_v23 = vld [vmem:[%s5745_s30 + $0x30] sm:$0xff] }
0x10e2   : > { %v5423_v49 = vpop.eup %5422  ;;  %v4678_v47 = vmul.f32 %v5469_v45, %v5421_v51  ;;  %5442 = vrcp.f32 %v4639_v2  ;;  %v4596_v50 = vsub.f32 0.0, %v4579_v61  ;;  %v5481_v2 = vld [vmem:[%s5745_s30 + $0x38] sm:$0xff]  ;;  %v5482_v24 = vld [vmem:[%s5745_s30 + $0x70] sm:$0xff] }
0x10e3   : > { %v5425_v53 = vpop.eup %5424  ;;  %4693 = vst [vmem:[%s6681_s2] sm:$0xff] %v4677_v43  ;;  %v4640_v54 = vadd.f32 1.0, %v5423_v49  ;;  %5444 = vpow2.f32 %v4611_v0  ;;  %v4625_v34 = vmul.f32 1.442695, %v4595_v58  ;;  %v5483_v58 = vld [vmem:[%s5745_s30 + $0x78] sm:$0xff] }
0x10e4   : > { %v5427_v19 = vpop.eup %5426  ;;  %4694 = vst [vmem:[%s6681_s2 + $0x8] sm:$0xff] %v4678_v47  ;;  %v4633_v60 = vadd.f32 1.0, %v5425_v53  ;;  %v4627_v4 = vmul.f32 1.442695, %v4596_v50 }
0x10e5   : > { %v5429_v16 = vpop.eup %5428  ;;  %v4685_v20 = vmul.f32 %v5470_v10, %v5427_v19  ;;  %5446 = vrcp.f32 %v4640_v54 }
0x10e6   : > { %v5431_v11 = vpop.eup %5430  ;;  %v4686_v56 = vmul.f32 %v5471_v48, %v5429_v16  ;;  %5448 = vrcp.f32 %v4633_v60 }
0x10e7   : > { %v5433_v5 = vpop.eup %5432  ;;  %4701 = vst [vmem:[%s6681_s2 + $0x40] sm:$0xff] %v4685_v20  ;;  %v4634_v52 = vadd.f32 1.0, %v5431_v11  ;;  %5450 = vpow2.f32 %v4625_v34 }
0x10e8   : > { %v5435_v13 = vpop.eup %5434  ;;  %4702 = vst [vmem:[%s6681_s2 + $0x48] sm:$0xff] %v4686_v56  ;;  %v4641_v31 = vadd.f32 1.0, %v5433_v5  ;;  %5452 = vpow2.f32 %v4627_v4 }
0x10e9   : > { %v5437_v32 = vpop.eup %5436  ;;  %v4679_v36 = vmul.f32 %v5472_v33, %v5435_v13  ;;  %5454 = vrcp.f32 %v4634_v52 }
0x10ea   : > { %v5439_v27 = vpop.eup %5438  ;;  %v4680_v26 = vmul.f32 %v5473_v1, %v5437_v32  ;;  %5456 = vrcp.f32 %v4641_v31 }
0x10eb   : > { %v5441_v12 = vpop.eup %5440  ;;  %4695 = vst [vmem:[%s6681_s2 + $0x10] sm:$0xff] %v4679_v36  ;;  %v4642_v29 = vadd.f32 1.0, %v5439_v27 }
0x10ec   : > { %v5443_v55 = vpop.eup %5442  ;;  %4696 = vst [vmem:[%s6681_s2 + $0x18] sm:$0xff] %v4680_v26  ;;  %v4635_v39 = vadd.f32 1.0, %v5441_v12 }
0x10ed   : > { %v5445_v63 = vpop.eup %5444  ;;  %v4687_v7 = vmul.f32 %v5474_v14, %v5443_v55  ;;  %5458 = vrcp.f32 %v4642_v29 }
0x10ee   : > { %5460 = vrcp.f32 %v4635_v39  ;;  %v4636_v41 = vadd.f32 1.0, %v5445_v63 }
0x10ef   : > { %v5447_v30 = vpop.eup %5446  ;;  %4703 = vst [vmem:[%s6681_s2 + $0x50] sm:$0xff] %v4687_v7 }
0x10f0   : > { %v5449_v18 = vpop.eup %5448  ;;  %v4688_v9 = vmul.f32 %v5475_v15, %v5447_v30  ;;  %5462 = vrcp.f32 %v4636_v41 }
0x10f1   : > { %v5451_v46 = vpop.eup %5450  ;;  %v4681_v28 = vmul.f32 %v5476_v22, %v5449_v18 }
0x10f2   : > { %v5453_v37 = vpop.eup %5452  ;;  %4704 = vst [vmem:[%s6681_s2 + $0x58] sm:$0xff] %v4688_v9  ;;  %v4643_v8 = vadd.f32 1.0, %v5451_v46 }
0x10f3   : > { %v5455_v42 = vpop.eup %5454  ;;  %4697 = vst [vmem:[%s6681_s2 + $0x20] sm:$0xff] %v4681_v28  ;;  %v4644_v59 = vadd.f32 1.0, %v5453_v37 }
0x10f4   : > { %v5457_v38 = vpop.eup %5456  ;;  %v4682_v44 = vmul.f32 %v5477_v62, %v5455_v42  ;;  %5464 = vrcp.f32 %v4643_v8 }
0x10f5   : > { %v4689_v57 = vmul.f32 %v5478_v21, %v5457_v38  ;;  %5466 = vrcp.f32 %v4644_v59 }
0x10f6   : > { %4698 = vst [vmem:[%s6681_s2 + $0x28] sm:$0xff] %v4682_v44 }
0x10f7   : > { %v5459_v35 = vpop.eup %5458  ;;  %4705 = vst [vmem:[%s6681_s2 + $0x60] sm:$0xff] %v4689_v57 }
0x10f8   : > { %v5461_v17 = vpop.eup %5460  ;;  %v4690_v6 = vmul.f32 %v5479_v3, %v5459_v35 }
0x10f9   : > { %v4683_v40 = vmul.f32 %v5480_v23, %v5461_v17 }
0x10fa   : > { %v5463_v25 = vpop.eup %5462  ;;  %4706 = vst [vmem:[%s6681_s2 + $0x68] sm:$0xff] %v4690_v6 }
0x10fb   : > { %4699 = vst [vmem:[%s6681_s2 + $0x30] sm:$0xff] %v4683_v40  ;;  %v4684_v0 = vmul.f32 %v5481_v2, %v5463_v25 }
0x10fd   : > { %4700 = vst [vmem:[%s6681_s2 + $0x38] sm:$0xff] %v4684_v0 }
0x10fe   : > { %v5465_v61 = vpop.eup %5464 }
0x10ff   : > { %v5467_v51 = vpop.eup %5466  ;;  %v4691_v43 = vmul.f32 %v5482_v24, %v5465_v61 }
0x1100   : > { %v4692_v49 = vmul.f32 %v5483_v58, %v5467_v51 }
0x1101   : > { %4707 = vst [vmem:[%s6681_s2 + $0x70] sm:$0xff] %v4691_v43 }
0x1102   : > { %4708 = vst [vmem:[%s6681_s2 + $0x78] sm:$0xff] %v4692_v49 }
0x1103 PF: > { %s35_s5 = sadd.s32 1, %s5522_s5  }
0x1104   : > { %p32_p3 = scmp.ge.s32.totalorder %s35_s5, 4  }
0x1106   :  { %34 = sbr.rel (!%p32_p3) target bundleno = 11 (0xb), region = 151 }
0x110d   :  { %4730 = vsyncpa [#allocation3], 1 }
0x110e   :  { %4732 = vsyncpa [#allocation3 + $0x1], 1 }

</bundles_post_ra>
